<compile_context>
chip_gen: v6e
topology: v6e:2x2x1
jax: 0.10.0
libtpu: 0.0.40
codegen_flags: <defaults>
</compile_context>

<pallas_src>
import jax
import jax.numpy as jnp
from jax.experimental import pallas as pl
from jax.experimental.pallas import tpu as pltpu


def _autoencoder_kernel(
    x_ref,
    w1_ref, b1_ref, w2_ref, b2_ref, w3_ref, b3_ref,   # encoder
    w4_ref, b4_ref, w5_ref, b5_ref, w6_ref, b6_ref,   # decoder
    enc_ref, dec_ref,
):
    # x tile is already f32; only cast matmul inputs to bf16 (MXU-native),
    # accumulate in f32, and keep bias/tanh math in f32.
    def dense(h, w_ref, b_ref):
        y = jnp.dot(h.astype(jnp.bfloat16), w_ref[...],
                    preferred_element_type=jnp.float32)
        return y + b_ref[...]          # (1, out) broadcast-add, f32

    x = x_ref[...]                                        # (TB, dim) f32

    # ---- encoder: Linear -> tanh -> Linear -> tanh -> Linear ----
    h = jnp.tanh(dense(x, w1_ref, b1_ref))
    h = jnp.tanh(dense(h, w2_ref, b2_ref))
    enc = dense(h, w3_ref, b3_ref)                        # (TB, d8) f32

    # ---- decoder: Linear -> tanh -> Linear -> tanh -> Linear ----
    d = jnp.tanh(dense(enc, w4_ref, b4_ref))
    d = jnp.tanh(dense(d, w5_ref, b5_ref))
    dec = dense(d, w6_ref, b6_ref)                        # (TB, dim) f32

    # Lane-dense enc store: pad to enc_ref's (>=128) lane width if needed.
    pad = enc_ref.shape[-1] - enc.shape[-1]
    if pad > 0:
        enc = jnp.concatenate(
            [enc, jnp.zeros((enc.shape[0], pad), enc.dtype)], axis=-1)

    enc_ref[...] = enc.astype(enc_ref.dtype)
    dec_ref[...] = dec.astype(dec_ref.dtype)


def _pick_batch_tile(batch):
    """Largest of {512, 256, 128} that evenly divides batch, else full batch."""
    for tb in (512, 256, 128):
        if batch % tb == 0 and batch >= tb:
            return tb
    return batch  # single full-array block (legal even if batch % 8 != 0)


def simple_autoencoder(x, params, *, tb=None):
    """x: [B, dim] float32. params: weights bf16 [in,out], biases f32 [1,out]."""
    B, dim = x.shape
    assert dim % 8 == 0, "dim must be divisible by 8"
    d8 = dim // 8
    enc_pad = max(d8, 128)          # lane-dense encoded output width
    if tb is None:
        tb = _pick_batch_tile(B)
    grid = (B // tb,)

    weight_args = (
        params["w1"], params["b1"], params["w2"], params["b2"],
        params["w3"], params["b3"], params["w4"], params["b4"],
        params["w5"], params["b5"], params["w6"], params["b6"],
    )

    # x / outputs tiled along batch; weights & biases VMEM-resident
    # (constant block index across the batch grid).
    x_spec = pl.BlockSpec((tb, dim), lambda i: (i, 0))
    const_specs = [pl.BlockSpec(a.shape, lambda i: (0, 0)) for a in weight_args]
    in_specs = [x_spec] + const_specs

    out_shapes = (
        jax.ShapeDtypeStruct((B, enc_pad), jnp.float32),  # encoded (padded lanes)
        jax.ShapeDtypeStruct((B, dim), jnp.float32),      # decoded
    )
    out_specs = (
        pl.BlockSpec((tb, enc_pad), lambda i: (i, 0)),
        pl.BlockSpec((tb, dim), lambda i: (i, 0)),
    )

    enc_full, dec = pl.pallas_call(
        _autoencoder_kernel,
        out_shape=out_shapes,
        grid_spec=pltpu.PrefetchScalarGridSpec(
            num_scalar_prefetch=0,
            grid=grid,
            in_specs=in_specs,
            out_specs=out_specs,
        ),
        compiler_params=pltpu.CompilerParams(
            dimension_semantics=("parallel",),   # megacore/dual-TC sharding
        ),
    )(x, *weight_args)

    return enc_full[:, :d8], dec


def init_params(key, dim):
    """PyTorch-style init. Weights stored transposed [in, out] in bf16, biases f32 [1, out]."""
    d2, d4, d8 = dim // 2, dim // 4, dim // 8
    layer_dims = [(dim, d2), (d2, d4), (d4, d8), (d8, d4), (d4, d2), (d2, dim)]
    params = {}
    for idx, (fan_in, fan_out) in enumerate(layer_dims, start=1):
        key, kw, kb = jax.random.split(key, 3)
        bound = 1.0 / jnp.sqrt(fan_in)  # PyTorch default U(-1/sqrt(fan_in), 1/sqrt(fan_in))
        w = jax.random.uniform(kw, (fan_in, fan_out), jnp.float32, -bound, bound)
        b = jax.random.uniform(kb, (1, fan_out), jnp.float32, -bound, bound)
        params[f"w{idx}"] = w.astype(jnp.bfloat16)   # halve HBM weight traffic
        params[f"b{idx}"] = b                        # biases stay f32
    return params


def reference_forward(x, params):
    """Pure-JAX reference using the same bf16-input / f32-accumulate matmul recipe."""
    def dense(h, w, b):
        return jnp.dot(h.astype(jnp.bfloat16), w,
                       preferred_element_type=jnp.float32) + b
    h = jnp.tanh(dense(x, params["w1"], params["b1"]))
    h = jnp.tanh(dense(h, params["w2"], params["b2"]))
    enc = dense(h, params["w3"], params["b3"])
    d = jnp.tanh(dense(enc, params["w4"], params["b4"]))
    d = jnp.tanh(dense(d, params["w5"], params["b5"]))
    dec = dense(d, params["w6"], params["b6"])
    return enc, dec


if __name__ == "__main__":
    key = jax.random.PRNGKey(0)
    batch, dim = 512, 256   # batch tiles to 256 -> 2 pipelined grid steps

    kx, kp = jax.random.split(key)
    x = jax.random.normal(kx, (batch, dim), dtype=jnp.float32)
    params = init_params(kp, dim)

    enc, dec = simple_autoencoder(x, params)
    jax.block_until_ready((enc, dec))

    enc_ref, dec_ref = reference_forward(x, params)
    assert enc.shape == (batch, dim // 8) and dec.shape == (batch, dim)
    assert jnp.allclose(enc, enc_ref, atol=1e-3, rtol=1e-3)
    assert jnp.allclose(dec, dec_ref, atol=1e-3, rtol=1e-3)

    print("KERNEL_OK")
</pallas_src>

<mosaic_0001>
module attributes {stable_mosaic.version = 11 : i64} {
  func.func @_autoencoder_kernel(%arg0: i32, %arg1: memref<512x256xf32, #tpu.memory_space<vmem>>, %arg2: memref<256x128xbf16, #tpu.memory_space<vmem>>, %arg3: memref<1x128xf32, #tpu.memory_space<vmem>>, %arg4: memref<128x64xbf16, #tpu.memory_space<vmem>>, %arg5: memref<1x64xf32, #tpu.memory_space<vmem>>, %arg6: memref<64x32xbf16, #tpu.memory_space<vmem>>, %arg7: memref<1x32xf32, #tpu.memory_space<vmem>>, %arg8: memref<32x64xbf16, #tpu.memory_space<vmem>>, %arg9: memref<1x64xf32, #tpu.memory_space<vmem>>, %arg10: memref<64x128xbf16, #tpu.memory_space<vmem>>, %arg11: memref<1x128xf32, #tpu.memory_space<vmem>>, %arg12: memref<128x256xbf16, #tpu.memory_space<vmem>>, %arg13: memref<1x256xf32, #tpu.memory_space<vmem>>, %arg14: memref<512x128xf32, #tpu.memory_space<vmem>>, %arg15: memref<512x256xf32, #tpu.memory_space<vmem>>) attributes {dimension_semantics = [#tpu.dimension_semantics<parallel>], iteration_bounds = array<i64: 1>, scalar_prefetch = 0 : i64, scratch_operands = 0 : i64, tpu.core_type = #tpu.core_type<tc>, window_params = [{transform_indices = @transform_0, window_bounds = array<i64: 512, 256>}, {pipeline_mode = #tpu.pipeline_mode<synchronous>, transform_indices = @transform_1, window_bounds = array<i64: 256, 128>}, {pipeline_mode = #tpu.pipeline_mode<synchronous>, transform_indices = @transform_2, window_bounds = array<i64: 1, 128>}, {pipeline_mode = #tpu.pipeline_mode<synchronous>, transform_indices = @transform_3, window_bounds = array<i64: 128, 64>}, {pipeline_mode = #tpu.pipeline_mode<synchronous>, transform_indices = @transform_4, window_bounds = array<i64: 1, 64>}, {pipeline_mode = #tpu.pipeline_mode<synchronous>, transform_indices = @transform_5, window_bounds = array<i64: 64, 32>}, {pipeline_mode = #tpu.pipeline_mode<synchronous>, transform_indices = @transform_6, window_bounds = array<i64: 1, 32>}, {pipeline_mode = #tpu.pipeline_mode<synchronous>, transform_indices = @transform_7, window_bounds = array<i64: 32, 64>}, {pipeline_mode = #tpu.pipeline_mode<synchronous>, transform_indices = @transform_8, window_bounds = array<i64: 1, 64>}, {pipeline_mode = #tpu.pipeline_mode<synchronous>, transform_indices = @transform_9, window_bounds = array<i64: 64, 128>}, {pipeline_mode = #tpu.pipeline_mode<synchronous>, transform_indices = @transform_10, window_bounds = array<i64: 1, 128>}, {pipeline_mode = #tpu.pipeline_mode<synchronous>, transform_indices = @transform_11, window_bounds = array<i64: 128, 256>}, {pipeline_mode = #tpu.pipeline_mode<synchronous>, transform_indices = @transform_12, window_bounds = array<i64: 1, 256>}, {transform_indices = @transform_13, window_bounds = array<i64: 512, 128>}, {transform_indices = @transform_14, window_bounds = array<i64: 512, 256>}]} {
    %c0 = arith.constant 0 : index
    %c0_0 = arith.constant 0 : index
    %0 = vector.load %arg1[%c0, %c0_0] : memref<512x256xf32, #tpu.memory_space<vmem>>, vector<512x256xf32>
    %1 = arith.truncf %0 : vector<512x256xf32> to vector<512x256xbf16>
    %c0_1 = arith.constant 0 : index
    %c0_2 = arith.constant 0 : index
    %2 = vector.load %arg2[%c0_1, %c0_2] : memref<256x128xbf16, #tpu.memory_space<vmem>>, vector<256x128xbf16>
    %cst = arith.constant dense<0.000000e+00> : vector<512x128xf32>
    %3 = tpu.matmul %1, %2, %cst {dimension_numbers = #tpu.dot_dimension_numbers<[1], [0], [0], [1], [0, 0, 1, 1], [], []>} : vector<512x256xbf16>, vector<256x128xbf16>, vector<512x128xf32> -> vector<512x128xf32>
    %c0_3 = arith.constant 0 : index
    %c0_4 = arith.constant 0 : index
    %4 = vector.load %arg3[%c0_3, %c0_4] : memref<1x128xf32, #tpu.memory_space<vmem>>, vector<1x128xf32>
    %5 = vector.broadcast %4 : vector<1x128xf32> to vector<512x128xf32>
    %6 = arith.addf %3, %5 : vector<512x128xf32>
    %7 = math.tanh %6 : vector<512x128xf32>
    %8 = arith.truncf %7 : vector<512x128xf32> to vector<512x128xbf16>
    %c0_5 = arith.constant 0 : index
    %c0_6 = arith.constant 0 : index
    %9 = vector.load %arg4[%c0_5, %c0_6] : memref<128x64xbf16, #tpu.memory_space<vmem>>, vector<128x64xbf16>
    %cst_7 = arith.constant dense<0.000000e+00> : vector<512x64xf32>
    %10 = tpu.matmul %8, %9, %cst_7 {dimension_numbers = #tpu.dot_dimension_numbers<[1], [0], [0], [1], [0, 0, 1, 1], [], []>} : vector<512x128xbf16>, vector<128x64xbf16>, vector<512x64xf32> -> vector<512x64xf32>
    %c0_8 = arith.constant 0 : index
    %c0_9 = arith.constant 0 : index
    %11 = vector.load %arg5[%c0_8, %c0_9] : memref<1x64xf32, #tpu.memory_space<vmem>>, vector<1x64xf32>
    %12 = vector.broadcast %11 : vector<1x64xf32> to vector<512x64xf32>
    %13 = arith.addf %10, %12 : vector<512x64xf32>
    %14 = math.tanh %13 : vector<512x64xf32>
    %15 = arith.truncf %14 : vector<512x64xf32> to vector<512x64xbf16>
    %c0_10 = arith.constant 0 : index
    %c0_11 = arith.constant 0 : index
    %16 = vector.load %arg6[%c0_10, %c0_11] : memref<64x32xbf16, #tpu.memory_space<vmem>>, vector<64x32xbf16>
    %cst_12 = arith.constant dense<0.000000e+00> : vector<512x32xf32>
    %17 = tpu.matmul %15, %16, %cst_12 {dimension_numbers = #tpu.dot_dimension_numbers<[1], [0], [0], [1], [0, 0, 1, 1], [], []>} : vector<512x64xbf16>, vector<64x32xbf16>, vector<512x32xf32> -> vector<512x32xf32>
    %c0_13 = arith.constant 0 : index
    %c0_14 = arith.constant 0 : index
    %18 = vector.load %arg7[%c0_13, %c0_14] : memref<1x32xf32, #tpu.memory_space<vmem>>, vector<1x32xf32>
    %19 = vector.broadcast %18 : vector<1x32xf32> to vector<512x32xf32>
    %20 = arith.addf %17, %19 : vector<512x32xf32>
    %21 = arith.truncf %20 : vector<512x32xf32> to vector<512x32xbf16>
    %c0_15 = arith.constant 0 : index
    %c0_16 = arith.constant 0 : index
    %22 = vector.load %arg8[%c0_15, %c0_16] : memref<32x64xbf16, #tpu.memory_space<vmem>>, vector<32x64xbf16>
    %cst_17 = arith.constant dense<0.000000e+00> : vector<512x64xf32>
    %23 = tpu.matmul %21, %22, %cst_17 {dimension_numbers = #tpu.dot_dimension_numbers<[1], [0], [0], [1], [0, 0, 1, 1], [], []>} : vector<512x32xbf16>, vector<32x64xbf16>, vector<512x64xf32> -> vector<512x64xf32>
    %c0_18 = arith.constant 0 : index
    %c0_19 = arith.constant 0 : index
    %24 = vector.load %arg9[%c0_18, %c0_19] : memref<1x64xf32, #tpu.memory_space<vmem>>, vector<1x64xf32>
    %25 = vector.broadcast %24 : vector<1x64xf32> to vector<512x64xf32>
    %26 = arith.addf %23, %25 : vector<512x64xf32>
    %27 = math.tanh %26 : vector<512x64xf32>
    %28 = arith.truncf %27 : vector<512x64xf32> to vector<512x64xbf16>
    %c0_20 = arith.constant 0 : index
    %c0_21 = arith.constant 0 : index
    %29 = vector.load %arg10[%c0_20, %c0_21] : memref<64x128xbf16, #tpu.memory_space<vmem>>, vector<64x128xbf16>
    %cst_22 = arith.constant dense<0.000000e+00> : vector<512x128xf32>
    %30 = tpu.matmul %28, %29, %cst_22 {dimension_numbers = #tpu.dot_dimension_numbers<[1], [0], [0], [1], [0, 0, 1, 1], [], []>} : vector<512x64xbf16>, vector<64x128xbf16>, vector<512x128xf32> -> vector<512x128xf32>
    %c0_23 = arith.constant 0 : index
    %c0_24 = arith.constant 0 : index
    %31 = vector.load %arg11[%c0_23, %c0_24] : memref<1x128xf32, #tpu.memory_space<vmem>>, vector<1x128xf32>
    %32 = vector.broadcast %31 : vector<1x128xf32> to vector<512x128xf32>
    %33 = arith.addf %30, %32 : vector<512x128xf32>
    %34 = math.tanh %33 : vector<512x128xf32>
    %35 = arith.truncf %34 : vector<512x128xf32> to vector<512x128xbf16>
    %c0_25 = arith.constant 0 : index
    %c0_26 = arith.constant 0 : index
    %36 = vector.load %arg12[%c0_25, %c0_26] : memref<128x256xbf16, #tpu.memory_space<vmem>>, vector<128x256xbf16>
    %cst_27 = arith.constant dense<0.000000e+00> : vector<512x256xf32>
    %37 = tpu.matmul %35, %36, %cst_27 {dimension_numbers = #tpu.dot_dimension_numbers<[1], [0], [0], [1], [0, 0, 1, 1], [], []>} : vector<512x128xbf16>, vector<128x256xbf16>, vector<512x256xf32> -> vector<512x256xf32>
    %c0_28 = arith.constant 0 : index
    %c0_29 = arith.constant 0 : index
    %38 = vector.load %arg13[%c0_28, %c0_29] : memref<1x256xf32, #tpu.memory_space<vmem>>, vector<1x256xf32>
    %39 = vector.broadcast %38 : vector<1x256xf32> to vector<512x256xf32>
    %40 = arith.addf %37, %39 : vector<512x256xf32>
    %cst_30 = arith.constant 0.000000e+00 : f32
    %41 = vector.broadcast %cst_30 : f32 to vector<512x96xf32>
    %42 = tpu.concatenate %20, %41 in 1 : vector<512x32xf32>, vector<512x96xf32> -> vector<512x128xf32>
    %c0_31 = arith.constant 0 : index
    %c0_32 = arith.constant 0 : index
    %43 = vector.load %arg14[%c0_31, %c0_32] : memref<512x128xf32, #tpu.memory_space<vmem>>, vector<512x128xf32>
    tpu.vector_store %arg14[%c0_31, %c0_32], %42 {strides = array<i32>} : memref<512x128xf32, #tpu.memory_space<vmem>>, vector<512x128xf32>,
    %c0_33 = arith.constant 0 : index
    %c0_34 = arith.constant 0 : index
    %44 = vector.load %arg15[%c0_33, %c0_34] : memref<512x256xf32, #tpu.memory_space<vmem>>, vector<512x256xf32>
    tpu.vector_store %arg15[%c0_33, %c0_34], %40 {strides = array<i32>} : memref<512x256xf32, #tpu.memory_space<vmem>>, vector<512x256xf32>,
    return
  }
  func.func @transform_0(%arg0: i32) -> (i32, i32) {
    %c0_i32 = arith.constant 0 : i32
    %c0_i32_0 = arith.constant 0 : i32
    return %arg0, %c0_i32 : i32, i32
  }
  func.func @transform_1(%arg0: i32) -> (i32, i32) {
    %c0_i32 = arith.constant 0 : i32
    %c0_i32_0 = arith.constant 0 : i32
    %c0_i32_1 = arith.constant 0 : i32
    return %c0_i32, %c0_i32_0 : i32, i32
  }
  func.func @transform_2(%arg0: i32) -> (i32, i32) {
    %c0_i32 = arith.constant 0 : i32
    %c0_i32_0 = arith.constant 0 : i32
    %c0_i32_1 = arith.constant 0 : i32
    return %c0_i32, %c0_i32_0 : i32, i32
  }
  func.func @transform_3(%arg0: i32) -> (i32, i32) {
    %c0_i32 = arith.constant 0 : i32
    %c0_i32_0 = arith.constant 0 : i32
    %c0_i32_1 = arith.constant 0 : i32
    return %c0_i32, %c0_i32_0 : i32, i32
  }
  func.func @transform_4(%arg0: i32) -> (i32, i32) {
    %c0_i32 = arith.constant 0 : i32
    %c0_i32_0 = arith.constant 0 : i32
    %c0_i32_1 = arith.constant 0 : i32
    return %c0_i32, %c0_i32_0 : i32, i32
  }
  func.func @transform_5(%arg0: i32) -> (i32, i32) {
    %c0_i32 = arith.constant 0 : i32
    %c0_i32_0 = arith.constant 0 : i32
    %c0_i32_1 = arith.constant 0 : i32
    return %c0_i32, %c0_i32_0 : i32, i32
  }
  func.func @transform_6(%arg0: i32) -> (i32, i32) {
    %c0_i32 = arith.constant 0 : i32
    %c0_i32_0 = arith.constant 0 : i32
    %c0_i32_1 = arith.constant 0 : i32
    return %c0_i32, %c0_i32_0 : i32, i32
  }
  func.func @transform_7(%arg0: i32) -> (i32, i32) {
    %c0_i32 = arith.constant 0 : i32
    %c0_i32_0 = arith.constant 0 : i32
    %c0_i32_1 = arith.constant 0 : i32
    return %c0_i32, %c0_i32_0 : i32, i32
  }
  func.func @transform_8(%arg0: i32) -> (i32, i32) {
    %c0_i32 = arith.constant 0 : i32
    %c0_i32_0 = arith.constant 0 : i32
    %c0_i32_1 = arith.constant 0 : i32
    return %c0_i32, %c0_i32_0 : i32, i32
  }
  func.func @transform_9(%arg0: i32) -> (i32, i32) {
    %c0_i32 = arith.constant 0 : i32
    %c0_i32_0 = arith.constant 0 : i32
    %c0_i32_1 = arith.constant 0 : i32
    return %c0_i32, %c0_i32_0 : i32, i32
  }
  func.func @transform_10(%arg0: i32) -> (i32, i32) {
    %c0_i32 = arith.constant 0 : i32
    %c0_i32_0 = arith.constant 0 : i32
    %c0_i32_1 = arith.constant 0 : i32
    return %c0_i32, %c0_i32_0 : i32, i32
  }
  func.func @transform_11(%arg0: i32) -> (i32, i32) {
    %c0_i32 = arith.constant 0 : i32
    %c0_i32_0 = arith.constant 0 : i32
    %c0_i32_1 = arith.constant 0 : i32
    return %c0_i32, %c0_i32_0 : i32, i32
  }
  func.func @transform_12(%arg0: i32) -> (i32, i32) {
    %c0_i32 = arith.constant 0 : i32
    %c0_i32_0 = arith.constant 0 : i32
    %c0_i32_1 = arith.constant 0 : i32
    return %c0_i32, %c0_i32_0 : i32, i32
  }
  func.func @transform_13(%arg0: i32) -> (i32, i32) {
    %c0_i32 = arith.constant 0 : i32
    %c0_i32_0 = arith.constant 0 : i32
    return %arg0, %c0_i32 : i32, i32
  }
  func.func @transform_14(%arg0: i32) -> (i32, i32) {
    %c0_i32 = arith.constant 0 : i32
    %c0_i32_0 = arith.constant 0 : i32
    return %arg0, %c0_i32 : i32, i32
  }
}

</mosaic_0001>

<bundles_post_ra>
// kernel: tpu_custom_call.1
= control target key start
LH: loop header
LB: loop body
LE: loop exit
PB: predicated region body
PF: predicated region fallthrough
CT: control target
= control target key end

     0   :  { %20 = vsyncpa [#allocation3], 0  ;;  %s5878_s0 = inlined_call_operand.hbm [shape: f32[512,256], index: 0, kind: input, shape index: {}]   ;;  %s5879_s1 = inlined_call_operand.vmem [shape: bf16[256,128], index: 1, kind: input, shape index: {}]   ;;  %s5880_s2 = inlined_call_operand.hbm [shape: f32[1,128], index: 2, kind: input, shape index: {}]   ;;  %s5881_s3 = inlined_call_operand.vmem [shape: bf16[128,64], index: 3, kind: input, shape index: {}]   ;;  %s5882_s4 = inlined_call_operand.hbm [shape: f32[1,64], index: 4, kind: input, shape index: {}]   ;;  %s5883_s5 = inlined_call_operand.vmem [shape: bf16[64,32], index: 5, kind: input, shape index: {}]   ;;  %s5884_s6 = inlined_call_operand.hbm [shape: f32[1,32], index: 6, kind: input, shape index: {}]   ;;  %s5885_s7 = inlined_call_operand.hbm [shape: bf16[32,64], index: 7, kind: input, shape index: {}]   ;;  %s5886_s8 = inlined_call_operand.hbm [shape: f32[1,64], index: 8, kind: input, shape index: {}]   ;;  %s5887_s9 = inlined_call_operand.vmem [shape: bf16[64,128], index: 9, kind: input, shape index: {}]   ;;  %s5888_s10 = inlined_call_operand.hbm [shape: f32[1,128], index: 10, kind: input, shape index: {}]   ;;  %s5889_s11 = inlined_call_operand.hbm [shape: bf16[128,256], index: 11, kind: input, shape index: {}]   ;;  %s5890_s12 = inlined_call_operand.vmem [shape: f32[1,256], index: 12, kind: input, shape index: {}]   ;;  %s5891_s13 = inlined_call_operand.hbm [shape: f32[512,128], index: 13, kind: output, shape index: {0}]   ;;  %s5892_s14 = inlined_call_operand.hbm [shape: f32[512,256], index: 14, kind: output, shape index: {1}]  }
   0x1   :  { %21 = vsyncpa [#allocation6], 0 }
   0x2   :  { %22 = vsyncpa [#allocation9], 0 }
   0x3   :  { %23 = vsyncpa [#allocation12], 0 }
   0x4   :  { %24 = vsyncpa [#allocation15], 0 }
   0x5   :  { %25 = vsyncpa [#allocation4], 0 }
   0x6   :  { %26 = vsyncpa [#allocation18], 0  ;;  %s4958_s29 = smov [#allocation5]   ;;  %s4959_s15 = smov [#allocation8]  }
   0x7   :  { %s47_s30 = sshll.u32 %s4958_s29, 4  ;;  %s71_s16 = sshll.u32 %s4959_s15, 4  ;;  %s48_s30 = int_to_ptr.vmem [resolvable:$true] %s47_s30  ;;  %s72_s16 = int_to_ptr.vmem [resolvable:$true] %s71_s16 }
   0x8   :  { %s4752_s17 = scalar_lea.vmem %s48_s30, 16  ;;  %s4756_s18 = scalar_lea.vmem %s48_s30, 32 }
   0x9   :  { %p4753_p0 = scmp.ne.s32.totalorder %s48_s30, %s4752_s17  ;;  %p4757_p1 = scmp.lt.s32.totalorder %s48_s30, %s48_s30 }
   0xa   :  { %p4758_p2 = scmp.lt.s32.totalorder %s4756_s18, %s4752_s17 }
   0xc   :  { %p4759_p3 = por %p4758_p2, %p4757_p1 }
   0xe   :  { %p4760_p4 = pnand %p4759_p3, %p4753_p0 }
  0x10   :  { %4763 = shalt.err (!%p4760_p4)
}
  0x11   :  { %50 = dma.hbm_to_vmem [thread:$0]  %s5880_s2, 16, %s48_s30, [#allocation6]  }
  0x12   :  { %s4772_s21 = scalar_lea.vmem %s72_s16, 16  ;;  %s4776_s22 = scalar_lea.vmem %s72_s16, 32 }
  0x13   :  { %p4773_p5 = scmp.ne.s32.totalorder %s72_s16, %s4772_s21  ;;  %p4777_p6 = scmp.lt.s32.totalorder %s72_s16, %s72_s16 }
  0x14   :  { %p4778_p7 = scmp.lt.s32.totalorder %s4776_s22, %s4772_s21 }
  0x16   :  { %p4779_p8 = por %p4778_p7, %p4777_p6 }
  0x18   :  { %p4780_p9 = pnand %p4779_p8, %p4773_p5 }
  0x1a   :  { %4783 = shalt.err (!%p4780_p9)
}
  0x1b   :  { %74 = dma.hbm_to_vmem [thread:$0]  %s5884_s6, 16, %s72_s16, [#allocation9]  }
  0x1c   :  { %s4960_s25 = smov [#allocation11]   ;;  %s4961_s27 = smov [#allocation2]  }
  0x1d   :  { %s93_s26 = sshll.u32 %s4960_s25, 4  ;;  %s32_s28 = sshll.u32 %s4961_s27, 4  ;;  %s94_s26 = int_to_ptr.vmem [resolvable:$true] %s93_s26  ;;  %s33_s28 = int_to_ptr.vmem [resolvable:$true] %s32_s28 }
  0x1e   :  { %s4792_s29 = scalar_lea.vmem %s94_s26, 16  ;;  %s4796_s2 = scalar_lea.vmem %s94_s26, 32 }
  0x1f   :  { %p4793_p10 = scmp.ne.s32.totalorder %s94_s26, %s4792_s29  ;;  %p4797_p11 = scmp.lt.s32.totalorder %s94_s26, %s94_s26 }
  0x20   :  { %p4798_p12 = scmp.lt.s32.totalorder %s4796_s2, %s4792_s29 }
  0x22   :  { %p4799_p13 = por %p4798_p12, %p4797_p11 }
  0x24   :  { %p4800_p0 = pnand %p4799_p13, %p4793_p10 }
  0x26   :  { %4803 = shalt.err (!%p4800_p0)
}
  0x27   :  { %96 = dma.hbm_to_vmem [thread:$0]  %s5886_s8, 16, %s94_s26, [#allocation12]  }
  0x28   :  { %s4812_s17 = scalar_lea.vmem %s33_s28, 16384  ;;  %p4817_p2 = scmp.lt.s32.totalorder %s33_s28, %s33_s28 }
  0x29   :  { %p4813_p1 = scmp.ne.s32.totalorder %s33_s28, %s4812_s17  ;;  %p4818_p3 = scmp.lt.s32.totalorder %s4812_s17, %s4812_s17 }
  0x2b   :  { %p4819_p4 = por %p4818_p3, %p4817_p2 }
  0x2d   :  { %p4820_p5 = pnand %p4819_p4, %p4813_p1 }
  0x2f   :  { %4823 = shalt.err (!%p4820_p5)
}
  0x30   :  { %s4962_s6 = smov 256   ;;  %s4963_s16 = smov 16  }
  0x31   :  { %38 = dma.hbm_to_vmem [thread:$0]  %s5878_s0, 16384, %s33_s28, [#allocation3], %s4962_s6, %s4962_s6, %s4963_s16  }
  0x32   :  { %s4964_s20 = smov [#allocation7]   ;;  %s4965_s22 = smov [#allocation10]  }
  0x33   :  { %s59_s21 = sshll.u32 %s4964_s20, 4  ;;  %s80_s8 = sshll.u32 %s4965_s22, 4  ;;  %s60_s21 = int_to_ptr.vmem [resolvable:$true] %s59_s21  ;;  %s81_s8 = int_to_ptr.vmem [resolvable:$true] %s80_s8 }
  0x34   :  { %s4832_s23 = scalar_lea.vmem %s60_s21, 16  ;;  %s4836_s24 = scalar_lea.vmem %s60_s21, 32 }
  0x35   :  { %p4833_p6 = scmp.ne.s32.totalorder %s60_s21, %s4832_s23  ;;  %p4837_p7 = scmp.lt.s32.totalorder %s60_s21, %s60_s21 }
  0x36   :  { %p4838_p8 = scmp.lt.s32.totalorder %s4836_s24, %s4832_s23 }
  0x38   :  { %p4839_p9 = por %p4838_p8, %p4837_p7 }
  0x3a   :  { %p4840_p10 = pnand %p4839_p9, %p4833_p6 }
  0x3c   :  { %4843 = shalt.err (!%p4840_p10)
}
  0x3d   :  { %62 = dma.hbm_to_vmem [thread:$0]  %s5882_s4, 16, %s60_s21, [#allocation6]  }
  0x3e   :  { %s4852_s27 = scalar_lea.vmem %s81_s8, 256  ;;  %p4857_p12 = scmp.lt.s32.totalorder %s81_s8, %s81_s8 }
  0x3f   :  { %p4853_p11 = scmp.ne.s32.totalorder %s81_s8, %s4852_s27  ;;  %p4858_p13 = scmp.lt.s32.totalorder %s4852_s27, %s4852_s27 }
  0x41   :  { %p4859_p0 = por %p4858_p13, %p4857_p12 }
  0x43   :  { %p4860_p1 = pnand %p4859_p0, %p4853_p11 }
  0x45   :  { %4863 = shalt.err (!%p4860_p1)
}
  0x46   :  { %s4966_s0 = smov 64   ;;  %s4967_s28 = smov 4  }
  0x47   :  { %86 = dma.hbm_to_vmem [thread:$0]  %s5885_s7, 256, %s81_s8, [#allocation9], %s4966_s0, %s4966_s0, %s4967_s28  }
  0x48   :  { %s4968_s30 = smov [#allocation13]   ;;  %s4969_s17 = smov [#allocation14]  }
  0x49   :  { %s105_s15 = sshll.u32 %s4968_s30, 4  ;;  %s114_s18 = sshll.u32 %s4969_s17, 4  ;;  %s106_s15 = int_to_ptr.vmem [resolvable:$true] %s105_s15  ;;  %s115_s18 = int_to_ptr.vmem [resolvable:$true] %s114_s18 }
  0x4a   :  { %s4872_s4 = scalar_lea.vmem %s106_s15, 16  ;;  %s4876_s19 = scalar_lea.vmem %s106_s15, 32 }
  0x4b   :  { %p4873_p2 = scmp.ne.s32.totalorder %s106_s15, %s4872_s4  ;;  %p4877_p3 = scmp.lt.s32.totalorder %s106_s15, %s106_s15 }
  0x4c   :  { %p4878_p4 = scmp.lt.s32.totalorder %s4876_s19, %s4872_s4 }
  0x4e   :  { %p4879_p5 = por %p4878_p4, %p4877_p3 }
  0x50   :  { %p4880_p6 = pnand %p4879_p5, %p4873_p2 }
  0x52   :  { %4883 = shalt.err (!%p4880_p6)
}
  0x53   :  { %108 = dma.hbm_to_vmem [thread:$0]  %s5888_s10, 16, %s106_s15, [#allocation12]  }
  0x54   :  { %s4892_s22 = scalar_lea.vmem %s115_s18, 2048  ;;  %p4897_p8 = scmp.lt.s32.totalorder %s115_s18, %s115_s18 }
  0x55   :  { %p4893_p7 = scmp.ne.s32.totalorder %s115_s18, %s4892_s22  ;;  %p4898_p9 = scmp.lt.s32.totalorder %s4892_s22, %s4892_s22 }
  0x57   :  { %p4899_p10 = por %p4898_p9, %p4897_p8 }
  0x59   :  { %p4900_p11 = pnand %p4899_p10, %p4893_p7 }
  0x5b   :  { %4903 = shalt.err (!%p4900_p11)
}
  0x5c   :  { %s4970_s7 = smov 128   ;;  %s4971_s8 = smov 8  }
  0x5d   :  { %120 = dma.hbm_to_vmem [thread:$0]  %s5889_s11, 2048, %s115_s18, [#allocation15], %s4970_s7, %s4970_s7, %s4971_s8  }
  0x5e   :  { %4944 = dma.done.wait [#allocation3], 16384  }
  0x5f   :  { %4945 = vsyncadd [#allocation3], 4294950912 }
  0x60   :  { %4946 = dma.done.wait [#allocation6], 32  }
  0x61   :  { %4947 = vsyncadd [#allocation6], 4294967264 }
  0x62   :  { %4948 = dma.done.wait [#allocation9], 272  }
  0x63   :  { %4949 = vsyncadd [#allocation9], 4294967024 }
  0x64   :  { %4950 = dma.done.wait [#allocation12], 32  }
  0x65   :  { %4951 = vsyncadd [#allocation12], 4294967264 }
  0x66   :  { %4952 = dma.done.wait [#allocation15], 2048  }
  0x67   :  { %4953 = vsyncadd [#allocation15], 4294965248  ;;  %v4972_v0 = vmov 0   ;;  %v4174_v1 = vld [vmem:[%s5879_s1 + $0x38] sm:$0xff]   ;;  %v4175_v2 = vld [vmem:[%s5879_s1 + $0x30] sm:$0xff]   ;;  %vm1355_vm0 = vcmask 523264  }
  0x68   :  { %475 = vmatprep.subr.bf16.mxu0 %v4972_v0  ;;  %v4176_v3 = vld [vmem:[%s5879_s1 + $0x28] sm:$0xff]   ;;  %v4177_v4 = vld [vmem:[%s5879_s1 + $0x20] sm:$0xff]   ;;  %v4178_v5 = vld [vmem:[%s5879_s1 + $0x18] sm:$0xff]   ;;  %vm1796_vm1 = vcmask 261120  }
  0x69   :  { %476 = vmatpush1.bf16.msra.mxu0 %v4174_v1  ;;  %v149_v6 = vld [vmem:[#allocation2 + $0x8] sm:$0xff]  ;;  %v151_v7 = vld [vmem:[#allocation2 + $0x18] sm:$0xff]  ;;  %v4179_v9 = vld [vmem:[%s5879_s1 + $0x10] sm:$0xff]  }
  0x6a   :  { %477 = vmatprep.subr.bf16.mxu0 %v4972_v0  ;;  %v277_v8 = vpack.c.bf16 %v151_v7, %v149_v6  ;;  %v4190_v10 = vld [vmem:[%s5881_s3 + $0x38] sm:$0xff]   ;;  %v4180_v11 = vld [vmem:[%s5879_s1 + $0x8] sm:$0xff]   ;;  %v4191_v12 = vld [vmem:[%s5881_s3 + $0x30] sm:$0xff]  }
  0x6b   :  { %4141 = vmatprep.subr.bf16.mxu1 %v4190_v10  ;;  %v4181_v13 = vld [vmem:[%s5879_s1] sm:$0xff]   ;;  %v4182_v14 = vld [vmem:[%s5879_s1 + $0x78] sm:$0xff]   ;;  %v4192_v15 = vld [vmem:[%s5881_s3 + $0x28] sm:$0xff]  }
  0x6c   :  { %507 = vmatprep.mubr.bf16.mxu0 %v277_v8  ;;  %4149 = vmatpush3.bf16.msra.mxu1 %v4190_v10  ;;  %v4183_v16 = vld [vmem:[%s5879_s1 + $0x70] sm:$0xff]   ;;  %v4184_v17 = vld [vmem:[%s5879_s1 + $0x68] sm:$0xff]   ;;  %v4193_v18 = vld [vmem:[%s5881_s3 + $0x20] sm:$0xff]  }
  0x6d   :  { %478 = vmatpush1.bf16.msra.mxu0 %v4175_v2  ;;  %4142 = vmatprep.subr.bf16.mxu1 %v4191_v12  ;;  %v4185_v19 = vld [vmem:[%s5879_s1 + $0x60] sm:$0xff]   ;;  %v4186_v20 = vld [vmem:[%s5879_s1 + $0x58] sm:$0xff]   ;;  %v4187_v21 = vld [vmem:[%s5879_s1 + $0x50] sm:$0xff]  }
  0x6e   :  { %479 = vmatprep.subr.bf16.mxu0 %v4972_v0  ;;  %v4188_v22 = vld [vmem:[%s5879_s1 + $0x48] sm:$0xff]   ;;  %v4189_v23 = vld [vmem:[%s5879_s1 + $0x40] sm:$0xff]   ;;  %v150_v25 = vld [vmem:[#allocation2 + $0x10] sm:$0xff] }
  0x6f   :  { %v148_v24 = vld [vmem:[#allocation2] sm:$0xff]  ;;  %v153_v26 = vld [vmem:[#allocation2 + $0x28] sm:$0xff]  ;;  %v155_v27 = vld [vmem:[#allocation2 + $0x38] sm:$0xff] }
  0x70   :  { %4150 = vmatpush3.bf16.msra.mxu1 %v4191_v12  ;;  %v276_v28 = vpack.c.bf16 %v150_v25, %v148_v24  ;;  %v279_v29 = vpack.c.bf16 %v155_v27, %v153_v26  ;;  %v152_v30 = vld [vmem:[#allocation2 + $0x20] sm:$0xff]  ;;  %v154_v31 = vld [vmem:[#allocation2 + $0x30] sm:$0xff]  ;;  %v157_v32 = vld [vmem:[#allocation2 + $0x48] sm:$0xff] }
  0x71   :  { %480 = vmatpush1.bf16.msra.mxu0 %v4176_v3  ;;  %4143 = vmatprep.subr.bf16.mxu1 %v4192_v15  ;;  %v159_v33 = vld [vmem:[#allocation2 + $0x58] sm:$0xff]  ;;  %v278_v34 = vpack.c.bf16 %v154_v31, %v152_v30  ;;  %v156_v37 = vld [vmem:[#allocation2 + $0x40] sm:$0xff]  ;;  %v158_v38 = vld [vmem:[#allocation2 + $0x50] sm:$0xff] }
  0x72   :  { %481 = vmatprep.subr.bf16.mxu0 %v4972_v0  ;;  %v281_v35 = vpack.c.bf16 %v159_v33, %v157_v32  ;;  %v4194_v36 = vld [vmem:[%s5881_s3 + $0x18] sm:$0xff]   ;;  %v161_v39 = vld [vmem:[#allocation2 + $0x68] sm:$0xff]  ;;  %v280_v41 = vpack.c.bf16 %v158_v38, %v156_v37  ;;  %v160_v43 = vld [vmem:[#allocation2 + $0x60] sm:$0xff] }
  0x73   :  { %v163_v40 = vld [vmem:[#allocation2 + $0x78] sm:$0xff]  ;;  %v162_v44 = vld [vmem:[#allocation2 + $0x70] sm:$0xff]  ;;  %v165_v45 = vld [vmem:[#allocation2 + $0x88] sm:$0xff] }
  0x74   :  { %4151 = vmatpush3.bf16.msra.mxu1 %v4192_v15  ;;  %v283_v42 = vpack.c.bf16 %v163_v40, %v161_v39  ;;  %v167_v46 = vld [vmem:[#allocation2 + $0x98] sm:$0xff]  ;;  %v282_v47 = vpack.c.bf16 %v162_v44, %v160_v43  ;;  %v164_v49 = vld [vmem:[#allocation2 + $0x80] sm:$0xff]  ;;  %v166_v50 = vld [vmem:[#allocation2 + $0x90] sm:$0xff] }
  0x75   :  { %482 = vmatpush1.bf16.msra.mxu0 %v4177_v4  ;;  %4144 = vmatprep.subr.bf16.mxu1 %v4193_v18  ;;  %v285_v48 = vpack.c.bf16 %v167_v46, %v165_v45  ;;  %v169_v51 = vld [vmem:[#allocation2 + $0xa8] sm:$0xff]  ;;  %v171_v52 = vld [vmem:[#allocation2 + $0xb8] sm:$0xff]  ;;  %v284_v53 = vpack.c.bf16 %v166_v50, %v164_v49  ;;  %v168_v55 = vld [vmem:[#allocation2 + $0xa0] sm:$0xff] }
  0x76   :  { %483 = vmatprep.subr.bf16.mxu0 %v4972_v0  ;;  %v287_v54 = vpack.c.bf16 %v171_v52, %v169_v51  ;;  %v170_v56 = vld [vmem:[#allocation2 + $0xb0] sm:$0xff]  ;;  %v173_v57 = vld [vmem:[#allocation2 + $0xc8] sm:$0xff]  ;;  %v175_v58 = vld [vmem:[#allocation2 + $0xd8] sm:$0xff] }
  0x77   :  { %v286_v59 = vpack.c.bf16 %v170_v56, %v168_v55  ;;  %v289_v60 = vpack.c.bf16 %v175_v58, %v173_v57  ;;  %v4195_v61 = vld [vmem:[%s5881_s3 + $0x10] sm:$0xff]   ;;  %v172_v62 = vld [vmem:[#allocation2 + $0xc0] sm:$0xff]  ;;  %v177_v1 = vld [vmem:[#allocation2 + $0xe8] sm:$0xff] }
  0x78   :  { %4152 = vmatpush3.bf16.msra.mxu1 %v4193_v18  ;;  %v174_v63 = vld [vmem:[#allocation2 + $0xd0] sm:$0xff]  ;;  %v179_v2 = vld [vmem:[#allocation2 + $0xf8] sm:$0xff]  ;;  %v181_v7 = vld [vmem:[#allocation2 + $0x108] sm:$0xff] }
  0x79   :  { %484 = vmatpush1.bf16.msra.mxu0 %v4178_v5  ;;  %4145 = vmatprep.subr.bf16.mxu1 %v4194_v36  ;;  %v288_v3 = vpack.c.bf16 %v174_v63, %v172_v62  ;;  %v291_v4 = vpack.c.bf16 %v179_v2, %v177_v1  ;;  %v176_v5 = vld [vmem:[#allocation2 + $0xe0] sm:$0xff]  ;;  %v178_v6 = vld [vmem:[#allocation2 + $0xf0] sm:$0xff]  ;;  %v183_v8 = vld [vmem:[#allocation2 + $0x118] sm:$0xff] }
  0x7a   :  { %485 = vmatprep.subr.bf16.mxu0 %v4972_v0  ;;  %v190_v24 = vld [vmem:[#allocation2 + $0x150] sm:$0xff]  ;;  %v193_v25 = vld [vmem:[#allocation2 + $0x168] sm:$0xff]  ;;  %v195_v26 = vld [vmem:[#allocation2 + $0x178] sm:$0xff] }
  0x7b   :  { %v4196_v27 = vld [vmem:[%s5881_s3 + $0x8] sm:$0xff]   ;;  %v192_v30 = vld [vmem:[#allocation2 + $0x160] sm:$0xff]  ;;  %v194_v31 = vld [vmem:[#allocation2 + $0x170] sm:$0xff] }
  0x7c   :  { %4153 = vmatpush3.bf16.msra.mxu1 %v4194_v36  ;;  %v197_v32 = vld [vmem:[#allocation2 + $0x188] sm:$0xff]  ;;  %v199_v33 = vld [vmem:[#allocation2 + $0x198] sm:$0xff]  ;;  %v198_v37 = vld [vmem:[#allocation2 + $0x190] sm:$0xff] }
  0x7d   :  { %486 = vmatpush1.bf16.msra.mxu0 %v4179_v9  ;;  %4146 = vmatprep.subr.bf16.mxu1 %v4195_v61  ;;  %v290_v9 = vpack.c.bf16 %v178_v6, %v176_v5  ;;  %v201_v38 = vld [vmem:[#allocation2 + $0x1a8] sm:$0xff]  ;;  %v203_v39 = vld [vmem:[#allocation2 + $0x1b8] sm:$0xff]  ;;  %v202_v43 = vld [vmem:[#allocation2 + $0x1b0] sm:$0xff] }
  0x7e   :  { %487 = vmatprep.subr.bf16.mxu0 %v4972_v0  ;;  %v205_v44 = vld [vmem:[#allocation2 + $0x1c8] sm:$0xff]  ;;  %v207_v45 = vld [vmem:[#allocation2 + $0x1d8] sm:$0xff]  ;;  %v206_v49 = vld [vmem:[#allocation2 + $0x1d0] sm:$0xff] }
  0x7f   :  { %v209_v50 = vld [vmem:[#allocation2 + $0x1e8] sm:$0xff]  ;;  %v211_v51 = vld [vmem:[#allocation2 + $0x1f8] sm:$0xff]  ;;  %v4197_v52 = vld [vmem:[%s5881_s3] sm:$0xff]  }
  0x80   :  { %4154 = vmatpush3.bf16.msra.mxu1 %v4195_v61  ;;  %v208_v55 = vld [vmem:[#allocation2 + $0x1e0] sm:$0xff]  ;;  %v210_v56 = vld [vmem:[#allocation2 + $0x1f0] sm:$0xff]  ;;  %v213_v57 = vld [vmem:[#allocation2 + $0x208] sm:$0xff] }
  0x81   :  { %488 = vmatpush1.bf16.msra.mxu0 %v4180_v11  ;;  %v180_v11 = vld [vmem:[#allocation2 + $0x100] sm:$0xff]  ;;  %4147 = vmatprep.subr.bf16.mxu1 %v4196_v27  ;;  %v215_v58 = vld [vmem:[#allocation2 + $0x218] sm:$0xff]  ;;  %v214_v62 = vld [vmem:[#allocation2 + $0x210] sm:$0xff] }
  0x82   :  { %489 = vmatprep.subr.bf16.mxu0 %v4972_v0  ;;  %v217_v63 = vld [vmem:[#allocation2 + $0x228] sm:$0xff]  ;;  %v219_v1 = vld [vmem:[#allocation2 + $0x238] sm:$0xff]  ;;  %v218_v5 = vld [vmem:[#allocation2 + $0x230] sm:$0xff] }
  0x83   :  { %v221_v6 = vld [vmem:[#allocation2 + $0x248] sm:$0xff] }
  0x84   :  { %4155 = vmatpush3.bf16.msra.mxu1 %v4196_v27 }
  0x85   :  { %490 = vmatpush1.bf16.msra.mxu0 %v4181_v13  ;;  %v185_v13 = vld [vmem:[#allocation2 + $0x128] sm:$0xff]  ;;  %4148 = vmatprep.subr.bf16.mxu1 %v4197_v52 }
  0x86   :  { %491 = vmatprep.subr.bf16.mxu0 %v4972_v0 }
  0x88   :  { %4156 = vmatpush3.bf16.msra.mxu1 %v4197_v52 }
  0x89   :  { %492 = vmatpush2.bf16.msra.mxu0 %v4182_v14  ;;  %v187_v14 = vld [vmem:[#allocation2 + $0x138] sm:$0xff] }
  0x8a   :  { %493 = vmatprep.subr.bf16.mxu0 %v4972_v0 }
  0x8d   :  { %494 = vmatpush2.bf16.msra.mxu0 %v4183_v16  ;;  %v295_v16 = vpack.c.bf16 %v187_v14, %v185_v13  ;;  %v227_v13 = vld [vmem:[#allocation2 + $0x278] sm:$0xff] }
  0x8e   :  { %495 = vmatprep.subr.bf16.mxu0 %v4972_v0 }
  0x91   :  { %496 = vmatpush2.bf16.msra.mxu0 %v4184_v17  ;;  %v184_v17 = vld [vmem:[#allocation2 + $0x120] sm:$0xff] }
  0x92   :  { %497 = vmatprep.subr.bf16.mxu0 %v4972_v0 }
  0x95   :  { %498 = vmatpush2.bf16.msra.mxu0 %v4185_v19  ;;  %v189_v19 = vld [vmem:[#allocation2 + $0x148] sm:$0xff] }
  0x96   :  { %499 = vmatprep.subr.bf16.mxu0 %v4972_v0 }
  0x99   :  { %500 = vmatpush2.bf16.msra.mxu0 %v4186_v20  ;;  %v191_v20 = vld [vmem:[#allocation2 + $0x158] sm:$0xff] }
  0x9a   :  { %501 = vmatprep.subr.bf16.mxu0 %v4972_v0 }
  0x9d   :  { %502 = vmatpush2.bf16.msra.mxu0 %v4187_v21 }
  0x9e   :  { %503 = vmatprep.subr.bf16.mxu0 %v4972_v0 }
  0xa1   :  { %504 = vmatpush2.bf16.msra.mxu0 %v4188_v22  ;;  %v297_v22 = vpack.c.bf16 %v191_v20, %v189_v19  ;;  %v231_v19 = vld [vmem:[#allocation2 + $0x298] sm:$0xff] }
  0xa2   :  { %505 = vmatprep.subr.bf16.mxu0 %v4972_v0 }
  0xa5   :  { %506 = vmatpush2.bf16.msra.mxu0 %v4189_v23  ;;  %v188_v23 = vld [vmem:[#allocation2 + $0x140] sm:$0xff] }
  0xa6   :  { %3849 = vmatprep.subr.bf16.mxu0 %v4190_v10 }
  0xa8   :  { %508 = vmatmul.mubr.bf16.vlgmr.msra.gmra.mxu0 %v276_v28  ;;  %v296_v28 = vpack.c.bf16 %v190_v24, %v188_v23  ;;  %v230_v23 = vld [vmem:[#allocation2 + $0x290] sm:$0xff]  ;;  %v233_v24 = vld [vmem:[#allocation2 + $0x2a8] sm:$0xff] }
  0xa9   :  { %515 = vmatprep.mubr.bf16.mxu0 %v279_v29  ;;  %3850 = vmatpush3.bf16.msra.mxu0 %v4190_v10  ;;  %v293_v10 = vpack.c.bf16 %v183_v8, %v181_v7  ;;  %v299_v29 = vpack.c.bf16 %v195_v26, %v193_v25  ;;  %v223_v7 = vld [vmem:[#allocation2 + $0x258] sm:$0xff] }
  0xaa   :  { %3851 = vmatprep.subr.bf16.mxu0 %v4191_v12  ;;  %v235_v25 = vld [vmem:[#allocation2 + $0x2b8] sm:$0xff] }
  0xad   :  { %3852 = vmatpush3.bf16.msra.mxu0 %v4191_v12  ;;  %v182_v12 = vld [vmem:[#allocation2 + $0x110] sm:$0xff] }
  0xae   :  { %3853 = vmatprep.subr.bf16.mxu0 %v4192_v15 }
  0xb0   :  { %516 = vmatmul.mubr.bf16.gmra.mxu0 %v278_v34  ;;  %v298_v34 = vpack.c.bf16 %v194_v31, %v192_v30  ;;  %v237_v30 = vld [vmem:[#allocation2 + $0x2c8] sm:$0xff]  ;;  %v239_v31 = vld [vmem:[#allocation2 + $0x2d8] sm:$0xff] }
  0xb1   :  { %523 = vmatprep.mubr.bf16.mxu0 %v281_v35  ;;  %3854 = vmatpush3.bf16.msra.mxu0 %v4192_v15  ;;  %v292_v15 = vpack.c.bf16 %v182_v12, %v180_v11  ;;  %v301_v35 = vpack.c.bf16 %v199_v33, %v197_v32  ;;  %v222_v11 = vld [vmem:[#allocation2 + $0x250] sm:$0xff]  ;;  %v225_v12 = vld [vmem:[#allocation2 + $0x268] sm:$0xff]  ;;  %v321_v33 = vpack.c.bf16 %v239_v31, %v237_v30  ;;  %v264_v30 = vld [vmem:[#allocation2 + $0x3a0] sm:$0xff] }
  0xb2   :  { %3855 = vmatprep.subr.bf16.mxu0 %v4193_v18  ;;  %v266_v31 = vld [vmem:[#allocation2 + $0x3b0] sm:$0xff] }
  0xb5   :  { %3856 = vmatpush3.bf16.msra.mxu0 %v4193_v18  ;;  %v186_v18 = vld [vmem:[#allocation2 + $0x130] sm:$0xff] }
  0xb6   :  { %3857 = vmatprep.subr.bf16.mxu0 %v4194_v36  ;;  %v294_v21 = vpack.c.bf16 %v186_v18, %v184_v17  ;;  %v226_v17 = vld [vmem:[#allocation2 + $0x270] sm:$0xff]  ;;  %v229_v18 = vld [vmem:[#allocation2 + $0x288] sm:$0xff] }
  0xb8   :  { %524 = vmatmul.mubr.bf16.gmra.mxu0 %v280_v41  ;;  %v303_v41 = vpack.c.bf16 %v203_v39, %v201_v38 }
  0xb9   :  { %531 = vmatprep.mubr.bf16.mxu0 %v283_v42  ;;  %3858 = vmatpush3.bf16.msra.mxu0 %v4194_v36  ;;  %v196_v36 = vld [vmem:[#allocation2 + $0x180] sm:$0xff] }
  0xba   :  { %3859 = vmatprep.subr.bf16.mxu0 %v4195_v61  ;;  %v300_v40 = vpack.c.bf16 %v198_v37, %v196_v36  ;;  %v200_v42 = vld [vmem:[#allocation2 + $0x1a0] sm:$0xff]  ;;  %v241_v36 = vld [vmem:[#allocation2 + $0x2e8] sm:$0xff]  ;;  %v243_v37 = vld [vmem:[#allocation2 + $0x2f8] sm:$0xff] }
  0xbb   :  { %v302_v46 = vpack.c.bf16 %v202_v43, %v200_v42  ;;  %v323_v39 = vpack.c.bf16 %v243_v37, %v241_v36  ;;  %v245_v42 = vld [vmem:[#allocation2 + $0x308] sm:$0xff]  ;;  %v247_v43 = vld [vmem:[#allocation2 + $0x318] sm:$0xff] }
  0xbd   :  { %3860 = vmatpush3.bf16.msra.mxu0 %v4195_v61  ;;  %v212_v61 = vld [vmem:[#allocation2 + $0x200] sm:$0xff] }
  0xbe   :  { %3861 = vmatprep.subr.bf16.mxu0 %v4196_v27  ;;  %v308_v2 = vpack.c.bf16 %v214_v62, %v212_v61 }
  0xc0   :  { %532 = vmatmul.mubr.bf16.gmra.mxu0 %v282_v47  ;;  %v305_v47 = vpack.c.bf16 %v207_v45, %v205_v44  ;;  %v325_v45 = vpack.c.bf16 %v247_v43, %v245_v42  ;;  %v268_v43 = vld [vmem:[#allocation2 + $0x3c0] sm:$0xff] }
  0xc1   :  { %539 = vmatprep.mubr.bf16.mxu0 %v285_v48  ;;  %3862 = vmatpush3.bf16.msra.mxu0 %v4196_v27  ;;  %v204_v48 = vld [vmem:[#allocation2 + $0x1c0] sm:$0xff]  ;;  %v319_v27 = vpack.c.bf16 %v235_v25, %v233_v24  ;;  %v267_v24 = vld [vmem:[#allocation2 + $0x3b8] sm:$0xff] }
  0xc2   :  { %3863 = vmatprep.subr.bf16.mxu0 %v4197_v52 }
  0xc5   :  { %3864 = vmatpush3.bf16.msra.mxu0 %v4197_v52 }
  0xc8   :  { %540 = vmatmul.mubr.bf16.gmra.mxu0 %v284_v53  ;;  %v304_v53 = vpack.c.bf16 %v206_v49, %v204_v48  ;;  %v249_v48 = vld [vmem:[#allocation2 + $0x328] sm:$0xff]  ;;  %v251_v49 = vld [vmem:[#allocation2 + $0x338] sm:$0xff] }
  0xc9   :  { %547 = vmatprep.mubr.bf16.mxu0 %v287_v54  ;;  %v307_v54 = vpack.c.bf16 %v211_v51, %v209_v50  ;;  %v327_v51 = vpack.c.bf16 %v251_v49, %v249_v48  ;;  %v275_v48 = vld [vmem:[#allocation2 + $0x3f8] sm:$0xff] }
  0xd0   :  { %548 = vmatmul.mubr.bf16.gmra.mxu0 %v286_v59  ;;  %v306_v59 = vpack.c.bf16 %v210_v56, %v208_v55  ;;  %v253_v56 = vld [vmem:[#allocation2 + $0x348] sm:$0xff] }
  0xd1   :  { %555 = vmatprep.mubr.bf16.mxu0 %v289_v60  ;;  %v309_v60 = vpack.c.bf16 %v215_v58, %v213_v57  ;;  %v255_v57 = vld [vmem:[#allocation2 + $0x358] sm:$0xff] }
  0xd8   :  { %556 = vmatmul.mubr.bf16.gmra.mxu0 %v288_v3  ;;  %v311_v3 = vpack.c.bf16 %v219_v1, %v217_v63  ;;  %v252_v63 = vld [vmem:[#allocation2 + $0x340] sm:$0xff]  ;;  %v254_v1 = vld [vmem:[#allocation2 + $0x350] sm:$0xff] }
  0xd9   :  { %563 = vmatprep.mubr.bf16.mxu0 %v291_v4  ;;  %v216_v4 = vld [vmem:[#allocation2 + $0x220] sm:$0xff] }
  0xda   :  { %v310_v8 = vpack.c.bf16 %v218_v5, %v216_v4  ;;  %v259_v4 = vld [vmem:[#allocation2 + $0x378] sm:$0xff] }
  0xe0   :  { %564 = vmatmul.mubr.bf16.gmra.mxu0 %v290_v9  ;;  %v313_v9 = vpack.c.bf16 %v223_v7, %v221_v6  ;;  %v328_v6 = vpack.c.bf16 %v254_v1, %v252_v63 }
  0xe1   :  { %571 = vmatprep.mubr.bf16.mxu0 %v293_v10  ;;  %v220_v10 = vld [vmem:[#allocation2 + $0x240] sm:$0xff] }
  0xe2   :  { %v312_v14 = vpack.c.bf16 %v222_v11, %v220_v10  ;;  %v256_v10 = vld [vmem:[#allocation2 + $0x360] sm:$0xff]  ;;  %v258_v11 = vld [vmem:[#allocation2 + $0x370] sm:$0xff] }
  0xe8   :  { %572 = vmatmul.mubr.bf16.gmra.mxu0 %v292_v15  ;;  %v315_v15 = vpack.c.bf16 %v227_v13, %v225_v12  ;;  %v261_v13 = vld [vmem:[#allocation2 + $0x388] sm:$0xff] }
  0xe9   :  { %579 = vmatprep.mubr.bf16.mxu0 %v295_v16  ;;  %v224_v16 = vld [vmem:[#allocation2 + $0x260] sm:$0xff] }
  0xea   :  { %v314_v20 = vpack.c.bf16 %v226_v17, %v224_v16  ;;  %v330_v16 = vpack.c.bf16 %v258_v11, %v256_v10 }
  0xf0   :  { %580 = vmatmul.mubr.bf16.gmra.mxu0 %v294_v21  ;;  %v317_v21 = vpack.c.bf16 %v231_v19, %v229_v18 }
  0xf1   :  { %587 = vmatprep.mubr.bf16.mxu0 %v297_v22  ;;  %v228_v22 = vld [vmem:[#allocation2 + $0x280] sm:$0xff] }
  0xf2   :  { %v316_v26 = vpack.c.bf16 %v230_v23, %v228_v22  ;;  %v265_v23 = vld [vmem:[#allocation2 + $0x3a8] sm:$0xff] }
  0xf8   :  { %588 = vmatmul.mubr.bf16.gmra.mxu0 %v296_v28  ;;  %v232_v28 = vld [vmem:[#allocation2 + $0x2a0] sm:$0xff] }
  0xf9   :  { %595 = vmatprep.mubr.bf16.mxu0 %v299_v29  ;;  %v234_v29 = vld [vmem:[#allocation2 + $0x2b0] sm:$0xff] }
  0xfa   :  { %v318_v32 = vpack.c.bf16 %v234_v29, %v232_v28 }
 0x100   :  { %596 = vmatmul.mubr.bf16.gmra.mxu0 %v298_v34  ;;  %v236_v34 = vld [vmem:[#allocation2 + $0x2c0] sm:$0xff] }
 0x101   :  { %603 = vmatprep.mubr.bf16.mxu0 %v301_v35  ;;  %v238_v35 = vld [vmem:[#allocation2 + $0x2d0] sm:$0xff] }
 0x102   :  { %v320_v38 = vpack.c.bf16 %v238_v35, %v236_v34  ;;  %v269_v34 = vld [vmem:[#allocation2 + $0x3c8] sm:$0xff]  ;;  %v271_v35 = vld [vmem:[#allocation2 + $0x3d8] sm:$0xff] }
 0x108   :  { %604 = vmatmul.mubr.bf16.gmra.mxu0 %v300_v40  ;;  %v240_v40 = vld [vmem:[#allocation2 + $0x2e0] sm:$0xff] }
 0x109   :  { %611 = vmatprep.mubr.bf16.mxu0 %v303_v41  ;;  %v242_v41 = vld [vmem:[#allocation2 + $0x2f0] sm:$0xff] }
 0x10a   :  { %v322_v44 = vpack.c.bf16 %v242_v41, %v240_v40  ;;  %v337_v40 = vpack.c.bf16 %v271_v35, %v269_v34 }
 0x110   :  { %612 = vmatmul.mubr.bf16.gmra.mxu0 %v302_v46  ;;  %v244_v46 = vld [vmem:[#allocation2 + $0x300] sm:$0xff] }
 0x111   :  { %619 = vmatprep.mubr.bf16.mxu0 %v305_v47  ;;  %v246_v47 = vld [vmem:[#allocation2 + $0x310] sm:$0xff] }
 0x112   :  { %v324_v50 = vpack.c.bf16 %v246_v47, %v244_v46  ;;  %v273_v47 = vld [vmem:[#allocation2 + $0x3e8] sm:$0xff] }
 0x118   :  { %620 = vmatmul.mubr.bf16.gmra.mxu0 %v304_v53  ;;  %v248_v53 = vld [vmem:[#allocation2 + $0x320] sm:$0xff] }
 0x119   :  { %627 = vmatprep.mubr.bf16.mxu0 %v307_v54  ;;  %v250_v54 = vld [vmem:[#allocation2 + $0x330] sm:$0xff] }
 0x120   :  { %628 = vmatmul.mubr.bf16.gmra.mxu0 %v306_v59  ;;  %v326_v59 = vpack.c.bf16 %v250_v54, %v248_v53  ;;  %v339_v54 = vpack.c.bf16 %v275_v48, %v273_v47 }
 0x121   :  { %635 = vmatprep.mubr.bf16.mxu0 %v309_v60  ;;  %v329_v60 = vpack.c.bf16 %v255_v57, %v253_v56  ;;  %v272_v57 = vld [vmem:[#allocation2 + $0x3e0] sm:$0xff] }
 0x128   :  { %636 = vmatmul.mubr.bf16.gmra.mxu0 %v308_v2 }
 0x129   :  { %643 = vmatprep.mubr.bf16.mxu0 %v311_v3  ;;  %v257_v3 = vld [vmem:[#allocation2 + $0x368] sm:$0xff] }
 0x12a   :  { %v331_v7 = vpack.c.bf16 %v259_v4, %v257_v3 }
 0x130   :  { %644 = vmatmul.mubr.bf16.gmra.mxu0 %v310_v8 }
 0x131   :  { %651 = vmatprep.mubr.bf16.mxu0 %v313_v9 }
 0x138   :  { %652 = vmatmul.mubr.bf16.gmra.mxu0 %v312_v14  ;;  %v263_v14 = vld [vmem:[#allocation2 + $0x398] sm:$0xff] }
 0x139   :  { %659 = vmatprep.mubr.bf16.mxu0 %v315_v15  ;;  %v333_v17 = vpack.c.bf16 %v263_v14, %v261_v13 }
 0x140   :  { %660 = vmatmul.mubr.bf16.gmra.mxu0 %v314_v20  ;;  %v260_v20 = vld [vmem:[#allocation2 + $0x380] sm:$0xff] }
 0x141   :  { %667 = vmatprep.mubr.bf16.mxu0 %v317_v21  ;;  %v262_v21 = vld [vmem:[#allocation2 + $0x390] sm:$0xff] }
 0x148   :  { %668 = vmatmul.mubr.bf16.gmra.mxu0 %v316_v26  ;;  %v332_v26 = vpack.c.bf16 %v262_v21, %v260_v20 }
 0x149   :  { %675 = vmatprep.mubr.bf16.mxu0 %v319_v27  ;;  %v335_v27 = vpack.c.bf16 %v267_v24, %v265_v23 }
 0x150   :  { %676 = vmatmul.mubr.bf16.gmra.mxu0 %v318_v32  ;;  %v5170_v32 = vld [vmem:[#allocation5] ss:$0 sm:$0xff] }
 0x151   :  { %683 = vmatprep.mubr.bf16.mxu0 %v321_v33 }
 0x158   :  { %684 = vmatmul.mubr.bf16.gmra.mxu0 %v320_v38  ;;  %v334_v38 = vpack.c.bf16 %v266_v31, %v264_v30 }
 0x159   :  { %691 = vmatprep.mubr.bf16.mxu0 %v323_v39 }
 0x160   :  { %692 = vmatmul.mubr.bf16.gmra.mxu0 %v322_v44  ;;  %v270_v44 = vld [vmem:[#allocation2 + $0x3d0] sm:$0xff] }
 0x161   :  { %699 = vmatprep.mubr.bf16.mxu0 %v325_v45 }
 0x168   :  { %v509_v52 = vpop.f32.mrf.mxu0  ;;  %700 = vmatmul.mubr.bf16.gmra.mxu0 %v324_v50 }
 0x169   :  { %707 = vmatprep.mubr.bf16.mxu0 %v327_v51  ;;  %v510_v39 = vadd.f32 %v5170_v32, %v509_v52  ;;  %v336_v52 = vpack.c.bf16 %v270_v44, %v268_v43 }
 0x16a   :  { %v511_v55 = vpop.f32.mrf.mxu0 }
 0x16c   :  { %v512_v58 = vpop.f32.mrf.mxu0 }
 0x16d   :  { %v513_v36 = vadd.f32 %v5170_v32, %v512_v58  ;;  %v274_v58 = vld [vmem:[#allocation2 + $0x3f0] sm:$0xff] }
 0x16e   :  { %v514_v61 = vpop.f32.mrf.mxu0 }
 0x16f   :  { %4232 = vtanh.f32 %v513_v36 }
 0x170   :  { %v5168_v62 = vpop.f32.mrf.mxu0  ;;  %708 = vmatmul.mubr.bf16.gmra.mxu0 %v326_v59  ;;  %4234 = vtanh.f32 %v510_v39 }
 0x171   :  { %715 = vmatprep.mubr.bf16.mxu0 %v329_v60  ;;  %v518_v50 = vadd.f32 %v5170_v32, %v5168_v62 }
 0x172   :  { %v519_v2 = vpop.f32.mrf.mxu0 }
 0x173   :  { %v338_v2 = vpack.c.bf16 %v274_v58, %v272_v57 }
 0x174   :  { %v520_v5 = vpop.f32.mrf.mxu0 }
 0x175   :  { %v521_v45 = vadd.f32 %v5170_v32, %v520_v5 }
 0x176   :  { %v522_v8 = vpop.f32.mrf.mxu0 }
 0x177   :  { %4236 = vtanh.f32 %v521_v45 }
 0x178   :  { %v525_v9 = vpop.f32.mrf.mxu0  ;;  %716 = vmatmul.mubr.bf16.gmra.mxu0 %v328_v6 }
 0x179   :  { %723 = vmatprep.mubr.bf16.mxu0 %v331_v7  ;;  %v526_v53 = vadd.f32 %v5170_v32, %v525_v9 }
 0x17a   :  { %v527_v12 = vpop.f32.mrf.mxu0 }
 0x17c   :  { %v528_v15 = vpop.f32.mrf.mxu0  ;;  %v4233_v62 = vpop.eup %4232 }
 0x17d   :  { %v529_v49 = vadd.f32 %v5170_v32, %v528_v15  ;;  %v4235_v4 = vpop.eup %4234 }
 0x17e   :  { %v530_v18 = vpop.f32.mrf.mxu0  ;;  %v828_v6 = vpack.c.bf16 %v4233_v62, %v4235_v4 }
 0x17f   :  { %4238 = vtanh.f32 %v529_v49 }
 0x180   :  { %v533_v19 = vpop.f32.mrf.mxu0  ;;  %724 = vmatmul.mubr.bf16.gmra.mxu0 %v330_v16  ;;  %4240 = vtanh.f32 %v518_v50 }
 0x181   :  { %731 = vmatprep.mubr.bf16.mxu0 %v333_v17  ;;  %4242 = vtanh.f32 %v526_v53  ;;  %v534_v63 = vadd.f32 %v5170_v32, %v533_v19 }
 0x182   :  { %v535_v22 = vpop.f32.mrf.mxu0 }
 0x184   :  { %v536_v25 = vpop.f32.mrf.mxu0  ;;  %v4237_v10 = vpop.eup %4236 }
 0x185   :  { %v537_v59 = vadd.f32 %v5170_v32, %v536_v25 }
 0x186   :  { %v538_v28 = vpop.f32.mrf.mxu0 }
 0x187   :  { %4244 = vtanh.f32 %v537_v59 }
 0x188   :  { %v541_v29 = vpop.f32.mrf.mxu0  ;;  %732 = vmatmul.mubr.bf16.gmra.mxu0 %v332_v26 }
 0x189   :  { %739 = vmatprep.mubr.bf16.mxu0 %v335_v27  ;;  %v542_v3 = vadd.f32 %v5170_v32, %v541_v29 }
 0x18a   :  { %v543_v33 = vpop.f32.mrf.mxu0 }
 0x18c   :  { %v544_v37 = vpop.f32.mrf.mxu0  ;;  %v4239_v12 = vpop.eup %4238 }
 0x18d   :  { %v545_v61 = vadd.f32 %v5170_v32, %v544_v37  ;;  %v4241_v15 = vpop.eup %4240 }
 0x18e   :  { %v546_v41 = vpop.f32.mrf.mxu0  ;;  %v4243_v17 = vpop.eup %4242  ;;  %v829_v18 = vpack.c.bf16 %v4237_v10, %v4241_v15 }
 0x18f   :  { %4246 = vtanh.f32 %v545_v61  ;;  %v830_v20 = vpack.c.bf16 %v4239_v12, %v4243_v17 }
 0x190   :  { %v549_v42 = vpop.f32.mrf.mxu0  ;;  %740 = vmatmul.mubr.bf16.gmra.mxu0 %v334_v38  ;;  %4248 = vtanh.f32 %v534_v63 }
 0x191   :  { %747 = vmatprep.mubr.bf16.mxu0 %v337_v40  ;;  %4250 = vtanh.f32 %v542_v3  ;;  %v550_v13 = vadd.f32 %v5170_v32, %v549_v42 }
 0x192   :  { %v551_v46 = vpop.f32.mrf.mxu0 }
 0x194   :  { %v552_v51 = vpop.f32.mrf.mxu0  ;;  %v4245_v24 = vpop.eup %4244 }
 0x195   :  { %v553_v8 = vadd.f32 %v5170_v32, %v552_v51 }
 0x196   :  { %v554_v55 = vpop.f32.mrf.mxu0 }
 0x197   :  { %4252 = vtanh.f32 %v553_v8 }
 0x198   :  { %v557_v56 = vpop.f32.mrf.mxu0  ;;  %748 = vmatmul.mubr.bf16.gmra.mxu0 %v336_v52 }
 0x199   :  { %755 = vmatprep.mubr.bf16.mxu0 %v339_v54  ;;  %v558_v16 = vadd.f32 %v5170_v32, %v557_v56 }
 0x19a   :  { %v559_v60 = vpop.f32.mrf.mxu0 }
 0x19c   :  { %v560_v1 = vpop.f32.mrf.mxu0  ;;  %v4247_v25 = vpop.eup %4246 }
 0x19d   :  { %v561_v11 = vadd.f32 %v5170_v32, %v560_v1  ;;  %v4249_v28 = vpop.eup %4248 }
 0x19e   :  { %v562_v5 = vpop.f32.mrf.mxu0  ;;  %v4251_v31 = vpop.eup %4250  ;;  %v831_v34 = vpack.c.bf16 %v4245_v24, %v4249_v28 }
 0x19f   :  { %4254 = vtanh.f32 %v561_v11  ;;  %v832_v35 = vpack.c.bf16 %v4247_v25, %v4251_v31 }
 0x1a0   :  { %v565_v7 = vpop.f32.mrf.mxu0  ;;  %756 = vmatmul.mubr.bf16.gmra.mxu0 %v338_v2  ;;  %4256 = vtanh.f32 %v550_v13 }
 0x1a1   :  { %3865 = vmatprep.mubr.bf16.mxu0 %v828_v6  ;;  %4258 = vtanh.f32 %v558_v16  ;;  %v566_v26 = vadd.f32 %v5170_v32, %v565_v7 }
 0x1a2   :  { %v567_v9 = vpop.f32.mrf.mxu0 }
 0x1a4   :  { %v568_v14 = vpop.f32.mrf.mxu0  ;;  %v4253_v39 = vpop.eup %4252 }
 0x1a5   :  { %v569_v22 = vadd.f32 %v5170_v32, %v568_v14 }
 0x1a6   :  { %v570_v19 = vpop.f32.mrf.mxu0 }
 0x1a7   :  { %4260 = vtanh.f32 %v569_v22 }
 0x1a8   :  { %v573_v21 = vpop.f32.mrf.mxu0  ;;  %3866 = vmatmul.mubr.bf16.vlgmr.msra.gmra.mxu0 %v829_v18 }
 0x1a9   :  { %3869 = vmatprep.mubr.bf16.mxu0 %v830_v20  ;;  %v574_v29 = vadd.f32 %v5170_v32, %v573_v21 }
 0x1aa   :  { %v575_v23 = vpop.f32.mrf.mxu0 }
 0x1ac   :  { %v576_v27 = vpop.f32.mrf.mxu0  ;;  %v4255_v40 = vpop.eup %4254 }
 0x1ad   :  { %v577_v30 = vadd.f32 %v5170_v32, %v576_v27  ;;  %v4257_v42 = vpop.eup %4256 }
 0x1ae   :  { %v578_v33 = vpop.f32.mrf.mxu0  ;;  %v4259_v44 = vpop.eup %4258  ;;  %v833_v46 = vpack.c.bf16 %v4253_v39, %v4257_v42 }
 0x1af   :  { %4262 = vtanh.f32 %v577_v30  ;;  %v834_v47 = vpack.c.bf16 %v4255_v40, %v4259_v44 }
 0x1b0   :  { %4264 = vtanh.f32 %v566_v26  ;;  %v581_v36 = vpop.f32.mrf.mxu0  ;;  %3870 = vmatmul.mubr.bf16.gmra.mxu0 %v831_v34 }
 0x1b1   :  { %4266 = vtanh.f32 %v574_v29  ;;  %3873 = vmatprep.mubr.bf16.mxu0 %v832_v35  ;;  %v582_v37 = vadd.f32 %v5170_v32, %v581_v36 }
 0x1b2   :  { %v583_v38 = vpop.f32.mrf.mxu0 }
 0x1b3   :  { %4268 = vtanh.f32 %v582_v37 }
 0x1b4   :  { %v584_v41 = vpop.f32.mrf.mxu0  ;;  %v4261_v51 = vpop.eup %4260 }
 0x1b5   :  { %v585_v43 = vadd.f32 %v5170_v32, %v584_v41 }
 0x1b6   :  { %v586_v45 = vpop.f32.mrf.mxu0 }
 0x1b7   :  { %4270 = vtanh.f32 %v585_v43 }
 0x1b8   :  { %v589_v48 = vpop.f32.mrf.mxu0  ;;  %3874 = vmatmul.mubr.bf16.gmra.mxu0 %v833_v46 }
 0x1b9   :  { %3877 = vmatprep.mubr.bf16.mxu0 %v834_v47  ;;  %v590_v49 = vadd.f32 %v5170_v32, %v589_v48 }
 0x1ba   :  { %v591_v50 = vpop.f32.mrf.mxu0 }
 0x1bb   :  { %4272 = vtanh.f32 %v590_v49 }
 0x1bc   :  { %v4263_v52 = vpop.eup %4262  ;;  %v592_v53 = vpop.f32.mrf.mxu0 }
 0x1bd   :  { %v4265_v54 = vpop.eup %4264  ;;  %v593_v55 = vadd.f32 %v5170_v32, %v592_v53  ;;  %v5210_v53 = vld [vmem:[%s5883_s5 + $0x18] sm:$0xff]  }
 0x1be   :  { %v4267_v56 = vpop.eup %4266  ;;  %v594_v57 = vpop.f32.mrf.mxu0  ;;  %v835_v58 = vpack.c.bf16 %v4261_v51, %v4265_v54  ;;  %3929 = vmatprep.subr.bf16.mxu1 %v5210_v53 }
 0x1bf   :  { %4274 = vtanh.f32 %v593_v55  ;;  %v836_v59 = vpack.c.bf16 %v4263_v52, %v4267_v56 }
 0x1c0   :  { %v597_v60 = vpop.f32.mrf.mxu0  ;;  %3878 = vmatmul.mubr.bf16.gmra.mxu0 %v835_v58  ;;  %v4269_v63 = vpop.eup %4268 }
 0x1c1   :  { %3881 = vmatprep.mubr.bf16.mxu0 %v836_v59  ;;  %v598_v61 = vadd.f32 %v5170_v32, %v597_v60 }
 0x1c2   :  { %v599_v62 = vpop.f32.mrf.mxu0 }
 0x1c3   :  { %4276 = vtanh.f32 %v598_v61 }
 0x1c4   :  { %v4271_v1 = vpop.eup %4270  ;;  %v600_v2 = vpop.f32.mrf.mxu0 }
 0x1c5   :  { %v601_v3 = vadd.f32 %v5170_v32, %v600_v2  ;;  %v837_v4 = vpack.c.bf16 %v4271_v1, %v4269_v63 }
 0x1c6   :  { %v602_v5 = vpop.f32.mrf.mxu0 }
 0x1c7   :  { %4278 = vtanh.f32 %v601_v3 }
 0x1c8   :  { %v605_v6 = vpop.f32.mrf.mxu0  ;;  %3882 = vmatmul.mubr.bf16.gmra.mxu0 %v837_v4  ;;  %v4273_v9 = vpop.eup %4272 }
 0x1c9   :  { %v606_v7 = vadd.f32 %v5170_v32, %v605_v6 }
 0x1ca   :  { %v607_v8 = vpop.f32.mrf.mxu0 }
 0x1cb   :  { %4280 = vtanh.f32 %v606_v7 }
 0x1cc   :  { %v4275_v10 = vpop.eup %4274  ;;  %v608_v11 = vpop.f32.mrf.mxu0 }
 0x1cd   :  { %v609_v12 = vadd.f32 %v5170_v32, %v608_v11  ;;  %v838_v13 = vpack.c.bf16 %v4275_v10, %v4273_v9 }
 0x1ce   :  { %v610_v14 = vpop.f32.mrf.mxu0 }
 0x1cf   :  { %4282 = vtanh.f32 %v609_v12  ;;  %3885 = vmatprep.mubr.bf16.mxu0 %v838_v13 }
 0x1d0   :  { %v613_v15 = vpop.f32.mrf.mxu0  ;;  %v4277_v18 = vpop.eup %4276 }
 0x1d1   :  { %v614_v16 = vadd.f32 %v5170_v32, %v613_v15 }
 0x1d2   :  { %v615_v17 = vpop.f32.mrf.mxu0 }
 0x1d3   :  { %4284 = vtanh.f32 %v614_v16 }
 0x1d4   :  { %v4279_v19 = vpop.eup %4278  ;;  %v616_v20 = vpop.f32.mrf.mxu0 }
 0x1d5   :  { %v617_v21 = vadd.f32 %v5170_v32, %v616_v20  ;;  %v839_v22 = vpack.c.bf16 %v4279_v19, %v4277_v18 }
 0x1d6   :  { %v618_v23 = vpop.f32.mrf.mxu0 }
 0x1d7   :  { %4286 = vtanh.f32 %v617_v21  ;;  %3886 = vmatmul.mubr.bf16.gmra.mxu0 %v839_v22 }
 0x1d8   :  { %v621_v24 = vpop.f32.mrf.mxu0  ;;  %v4281_v27 = vpop.eup %4280 }
 0x1d9   :  { %v622_v25 = vadd.f32 %v5170_v32, %v621_v24 }
 0x1da   :  { %v623_v26 = vpop.f32.mrf.mxu0 }
 0x1db   :  { %4288 = vtanh.f32 %v622_v25 }
 0x1dc   :  { %v4283_v28 = vpop.eup %4282  ;;  %v624_v29 = vpop.f32.mrf.mxu0 }
 0x1dd   :  { %v625_v30 = vadd.f32 %v5170_v32, %v624_v29  ;;  %v840_v31 = vpack.c.bf16 %v4283_v28, %v4281_v27 }
 0x1de   :  { %v626_v33 = vpop.f32.mrf.mxu0 }
 0x1df   :  { %4290 = vtanh.f32 %v625_v30  ;;  %3889 = vmatprep.mubr.bf16.mxu0 %v840_v31 }
 0x1e0   :  { %v629_v34 = vpop.f32.mrf.mxu0  ;;  %v4285_v37 = vpop.eup %4284 }
 0x1e1   :  { %v630_v35 = vadd.f32 %v5170_v32, %v629_v34 }
 0x1e2   :  { %v631_v36 = vpop.f32.mrf.mxu0 }
 0x1e3   :  { %4292 = vtanh.f32 %v630_v35 }
 0x1e4   :  { %v4287_v38 = vpop.eup %4286  ;;  %v632_v39 = vpop.f32.mrf.mxu0 }
 0x1e5   :  { %v633_v40 = vadd.f32 %v5170_v32, %v632_v39  ;;  %v841_v41 = vpack.c.bf16 %v4287_v38, %v4285_v37 }
 0x1e6   :  { %v634_v42 = vpop.f32.mrf.mxu0 }
 0x1e7   :  { %4294 = vtanh.f32 %v633_v40  ;;  %3890 = vmatmul.mubr.bf16.gmra.mxu0 %v841_v41 }
 0x1e8   :  { %v637_v43 = vpop.f32.mrf.mxu0  ;;  %v4289_v46 = vpop.eup %4288 }
 0x1e9   :  { %v638_v44 = vadd.f32 %v5170_v32, %v637_v43 }
 0x1ea   :  { %v639_v45 = vpop.f32.mrf.mxu0 }
 0x1eb   :  { %4296 = vtanh.f32 %v638_v44 }
 0x1ec   :  { %v4291_v47 = vpop.eup %4290  ;;  %v640_v48 = vpop.f32.mrf.mxu0 }
 0x1ed   :  { %v641_v49 = vadd.f32 %v5170_v32, %v640_v48  ;;  %v842_v50 = vpack.c.bf16 %v4291_v47, %v4289_v46 }
 0x1ee   :  { %v642_v51 = vpop.f32.mrf.mxu0 }
 0x1ef   :  { %4298 = vtanh.f32 %v641_v49  ;;  %3893 = vmatprep.mubr.bf16.mxu0 %v842_v50 }
 0x1f0   :  { %v645_v52 = vpop.f32.mrf.mxu0  ;;  %v4293_v56 = vpop.eup %4292 }
 0x1f1   :  { %v646_v54 = vadd.f32 %v5170_v32, %v645_v52 }
 0x1f2   :  { %v647_v55 = vpop.f32.mrf.mxu0 }
 0x1f3   :  { %4300 = vtanh.f32 %v646_v54 }
 0x1f4   :  { %v4295_v57 = vpop.eup %4294  ;;  %v648_v58 = vpop.f32.mrf.mxu0 }
 0x1f5   :  { %v649_v59 = vadd.f32 %v5170_v32, %v648_v58  ;;  %v843_v60 = vpack.c.bf16 %v4295_v57, %v4293_v56 }
 0x1f6   :  { %v650_v61 = vpop.f32.mrf.mxu0 }
 0x1f7   :  { %4302 = vtanh.f32 %v649_v59  ;;  %3894 = vmatmul.mubr.bf16.gmra.mxu0 %v843_v60 }
 0x1f8   :  { %v653_v62 = vpop.f32.mrf.mxu0  ;;  %v4297_v2 = vpop.eup %4296 }
 0x1f9   :  { %v654_v63 = vadd.f32 %v5170_v32, %v653_v62 }
 0x1fa   :  { %v655_v1 = vpop.f32.mrf.mxu0 }
 0x1fb   :  { %4304 = vtanh.f32 %v654_v63 }
 0x1fc   :  { %v4299_v3 = vpop.eup %4298  ;;  %v656_v4 = vpop.f32.mrf.mxu0 }
 0x1fd   :  { %v657_v5 = vadd.f32 %v5170_v32, %v656_v4  ;;  %v844_v6 = vpack.c.bf16 %v4299_v3, %v4297_v2 }
 0x1fe   :  { %v658_v7 = vpop.f32.mrf.mxu0 }
 0x1ff   :  { %4306 = vtanh.f32 %v657_v5  ;;  %3897 = vmatprep.mubr.bf16.mxu0 %v844_v6 }
 0x200   :  { %v661_v8 = vpop.f32.mrf.mxu0  ;;  %v4301_v11 = vpop.eup %4300 }
 0x201   :  { %v662_v9 = vadd.f32 %v5170_v32, %v661_v8 }
 0x202   :  { %v663_v10 = vpop.f32.mrf.mxu0 }
 0x203   :  { %4308 = vtanh.f32 %v662_v9 }
 0x204   :  { %v4303_v12 = vpop.eup %4302  ;;  %v664_v13 = vpop.f32.mrf.mxu0 }
 0x205   :  { %v665_v14 = vadd.f32 %v5170_v32, %v664_v13  ;;  %v845_v15 = vpack.c.bf16 %v4303_v12, %v4301_v11 }
 0x206   :  { %v666_v16 = vpop.f32.mrf.mxu0 }
 0x207   :  { %4310 = vtanh.f32 %v665_v14  ;;  %3898 = vmatmul.mubr.bf16.gmra.mxu0 %v845_v15 }
 0x208   :  { %v669_v17 = vpop.f32.mrf.mxu0  ;;  %v4305_v20 = vpop.eup %4304 }
 0x209   :  { %v670_v18 = vadd.f32 %v5170_v32, %v669_v17 }
 0x20a   :  { %v671_v19 = vpop.f32.mrf.mxu0 }
 0x20b   :  { %4312 = vtanh.f32 %v670_v18 }
 0x20c   :  { %v4307_v21 = vpop.eup %4306  ;;  %v672_v22 = vpop.f32.mrf.mxu0 }
 0x20d   :  { %v673_v23 = vadd.f32 %v5170_v32, %v672_v22  ;;  %v846_v24 = vpack.c.bf16 %v4307_v21, %v4305_v20 }
 0x20e   :  { %v674_v25 = vpop.f32.mrf.mxu0 }
 0x20f   :  { %4314 = vtanh.f32 %v673_v23  ;;  %3901 = vmatprep.mubr.bf16.mxu0 %v846_v24 }
 0x210   :  { %v677_v26 = vpop.f32.mrf.mxu0  ;;  %v4309_v29 = vpop.eup %4308 }
 0x211   :  { %v678_v27 = vadd.f32 %v5170_v32, %v677_v26 }
 0x212   :  { %v679_v28 = vpop.f32.mrf.mxu0 }
 0x213   :  { %4316 = vtanh.f32 %v678_v27 }
 0x214   :  { %v4311_v30 = vpop.eup %4310  ;;  %v680_v31 = vpop.f32.mrf.mxu0 }
 0x215   :  { %v681_v33 = vadd.f32 %v5170_v32, %v680_v31  ;;  %v847_v34 = vpack.c.bf16 %v4311_v30, %v4309_v29 }
 0x216   :  { %v682_v35 = vpop.f32.mrf.mxu0 }
 0x217   :  { %4318 = vtanh.f32 %v681_v33  ;;  %3902 = vmatmul.mubr.bf16.gmra.mxu0 %v847_v34 }
 0x218   :  { %v685_v36 = vpop.f32.mrf.mxu0  ;;  %v4313_v39 = vpop.eup %4312 }
 0x219   :  { %v686_v37 = vadd.f32 %v5170_v32, %v685_v36 }
 0x21a   :  { %v687_v38 = vpop.f32.mrf.mxu0 }
 0x21b   :  { %4320 = vtanh.f32 %v686_v37 }
 0x21c   :  { %v4315_v40 = vpop.eup %4314  ;;  %v688_v41 = vpop.f32.mrf.mxu0 }
 0x21d   :  { %v689_v42 = vadd.f32 %v5170_v32, %v688_v41  ;;  %v848_v43 = vpack.c.bf16 %v4315_v40, %v4313_v39 }
 0x21e   :  { %v690_v44 = vpop.f32.mrf.mxu0 }
 0x21f   :  { %4322 = vtanh.f32 %v689_v42  ;;  %3905 = vmatprep.mubr.bf16.mxu0 %v848_v43 }
 0x220   :  { %v693_v45 = vpop.f32.mrf.mxu0  ;;  %v4317_v48 = vpop.eup %4316 }
 0x221   :  { %v694_v46 = vadd.f32 %v5170_v32, %v693_v45 }
 0x222   :  { %v695_v47 = vpop.f32.mrf.mxu0 }
 0x223   :  { %4324 = vtanh.f32 %v694_v46 }
 0x224   :  { %v4319_v49 = vpop.eup %4318  ;;  %v696_v50 = vpop.f32.mrf.mxu0 }
 0x225   :  { %v697_v51 = vadd.f32 %v5170_v32, %v696_v50  ;;  %v849_v52 = vpack.c.bf16 %v4319_v49, %v4317_v48 }
 0x226   :  { %v698_v54 = vpop.f32.mrf.mxu0 }
 0x227   :  { %4326 = vtanh.f32 %v697_v51  ;;  %3906 = vmatmul.mubr.bf16.gmra.mxu0 %v849_v52 }
 0x228   :  { %v701_v55 = vpop.f32.mrf.mxu0  ;;  %v4321_v58 = vpop.eup %4320 }
 0x229   :  { %v702_v56 = vadd.f32 %v5170_v32, %v701_v55 }
 0x22a   :  { %v703_v57 = vpop.f32.mrf.mxu0 }
 0x22b   :  { %4328 = vtanh.f32 %v702_v56 }
 0x22c   :  { %v4323_v59 = vpop.eup %4322  ;;  %v704_v60 = vpop.f32.mrf.mxu0 }
 0x22d   :  { %v705_v61 = vadd.f32 %v5170_v32, %v704_v60  ;;  %v850_v62 = vpack.c.bf16 %v4323_v59, %v4321_v58 }
 0x22e   :  { %v706_v63 = vpop.f32.mrf.mxu0 }
 0x22f   :  { %4330 = vtanh.f32 %v705_v61  ;;  %3909 = vmatprep.mubr.bf16.mxu0 %v850_v62 }
 0x230   :  { %v709_v1 = vpop.f32.mrf.mxu0  ;;  %v4325_v4 = vpop.eup %4324 }
 0x231   :  { %v710_v2 = vadd.f32 %v5170_v32, %v709_v1 }
 0x232   :  { %v711_v3 = vpop.f32.mrf.mxu0 }
 0x233   :  { %4332 = vtanh.f32 %v710_v2  ;;  %v4199_v2 = vld [vmem:[%s5883_s5 + $0x10] sm:$0xff]  }
 0x234   :  { %v4327_v5 = vpop.eup %4326  ;;  %v712_v6 = vpop.f32.mrf.mxu0 }
 0x235   :  { %v713_v7 = vadd.f32 %v5170_v32, %v712_v6  ;;  %v851_v8 = vpack.c.bf16 %v4327_v5, %v4325_v4  ;;  %v4200_v5 = vld [vmem:[%s5883_s5 + $0x8] sm:$0xff]   ;;  %v5250_v6 = vld [vmem:[#allocation7] ss:$0 sm:$0xff] }
 0x236   :  { %v714_v9 = vpop.f32.mrf.mxu0 }
 0x237   :  { %4334 = vtanh.f32 %v713_v7  ;;  %3910 = vmatmul.mubr.bf16.gmra.mxu0 %v851_v8 }
 0x238   :  { %v717_v10 = vpop.f32.mrf.mxu0  ;;  %v4329_v13 = vpop.eup %4328 }
 0x239   :  { %v718_v11 = vadd.f32 %v5170_v32, %v717_v10 }
 0x23a   :  { %v719_v12 = vpop.f32.mrf.mxu0 }
 0x23b   :  { %4336 = vtanh.f32 %v718_v11 }
 0x23c   :  { %v4331_v14 = vpop.eup %4330  ;;  %v720_v15 = vpop.f32.mrf.mxu0 }
 0x23d   :  { %v721_v16 = vadd.f32 %v5170_v32, %v720_v15  ;;  %v852_v17 = vpack.c.bf16 %v4331_v14, %v4329_v13 }
 0x23e   :  { %v722_v18 = vpop.f32.mrf.mxu0 }
 0x23f   :  { %4338 = vtanh.f32 %v721_v16  ;;  %3913 = vmatprep.mubr.bf16.mxu0 %v852_v17  ;;  %v4202_v17 = vld [vmem:[#allocation10 + $0x8] sm:$0xff]  }
 0x240   :  { %v725_v19 = vpop.f32.mrf.mxu0  ;;  %v4333_v22 = vpop.eup %4332 }
 0x241   :  { %v726_v20 = vadd.f32 %v5170_v32, %v725_v19 }
 0x242   :  { %v727_v21 = vpop.f32.mrf.mxu0 }
 0x243   :  { %4340 = vtanh.f32 %v726_v20 }
 0x244   :  { %v4335_v23 = vpop.eup %4334  ;;  %v728_v24 = vpop.f32.mrf.mxu0 }
 0x245   :  { %v729_v25 = vadd.f32 %v5170_v32, %v728_v24  ;;  %v853_v26 = vpack.c.bf16 %v4335_v23, %v4333_v22 }
 0x246   :  { %v730_v27 = vpop.f32.mrf.mxu0 }
 0x247   :  { %4342 = vtanh.f32 %v729_v25  ;;  %3914 = vmatmul.mubr.bf16.gmra.mxu0 %v853_v26 }
 0x248   :  { %v733_v28 = vpop.f32.mrf.mxu0  ;;  %v4337_v31 = vpop.eup %4336 }
 0x249   :  { %v734_v29 = vadd.f32 %v5170_v32, %v733_v28 }
 0x24a   :  { %v735_v30 = vpop.f32.mrf.mxu0 }
 0x24b   :  { %4344 = vtanh.f32 %v734_v29 }
 0x24c   :  { %v4339_v33 = vpop.eup %4338  ;;  %v736_v34 = vpop.f32.mrf.mxu0 }
 0x24d   :  { %v737_v35 = vadd.f32 %v5170_v32, %v736_v34  ;;  %v854_v36 = vpack.c.bf16 %v4339_v33, %v4337_v31 }
 0x24e   :  { %v738_v37 = vpop.f32.mrf.mxu0 }
 0x24f   :  { %4346 = vtanh.f32 %v737_v35  ;;  %3917 = vmatprep.mubr.bf16.mxu0 %v854_v36 }
 0x250   :  { %v741_v38 = vpop.f32.mrf.mxu0  ;;  %v4341_v41 = vpop.eup %4340 }
 0x251   :  { %v742_v39 = vadd.f32 %v5170_v32, %v741_v38 }
 0x252   :  { %v743_v40 = vpop.f32.mrf.mxu0 }
 0x253   :  { %4348 = vtanh.f32 %v742_v39 }
 0x254   :  { %v4343_v42 = vpop.eup %4342  ;;  %v744_v43 = vpop.f32.mrf.mxu0 }
 0x255   :  { %v745_v44 = vadd.f32 %v5170_v32, %v744_v43  ;;  %v855_v45 = vpack.c.bf16 %v4343_v42, %v4341_v41 }
 0x256   :  { %v746_v46 = vpop.f32.mrf.mxu0 }
 0x257   :  { %4350 = vtanh.f32 %v745_v44  ;;  %3918 = vmatmul.mubr.bf16.gmra.mxu0 %v855_v45 }
 0x258   :  { %v749_v47 = vpop.f32.mrf.mxu0  ;;  %v4345_v50 = vpop.eup %4344 }
 0x259   :  { %v750_v48 = vadd.f32 %v5170_v32, %v749_v47 }
 0x25a   :  { %v751_v49 = vpop.f32.mrf.mxu0 }
 0x25b   :  { %4352 = vtanh.f32 %v750_v48 }
 0x25c   :  { %v4347_v51 = vpop.eup %4346  ;;  %v752_v52 = vpop.f32.mrf.mxu0 }
 0x25d   :  { %v753_v54 = vadd.f32 %v5170_v32, %v752_v52  ;;  %v856_v55 = vpack.c.bf16 %v4347_v51, %v4345_v50 }
 0x25e   :  { %v754_v56 = vpop.f32.mrf.mxu0 }
 0x25f   :  { %4354 = vtanh.f32 %v753_v54  ;;  %3921 = vmatprep.mubr.bf16.mxu1 %v856_v55 }
 0x260   :  { %v757_v57 = vpop.f32.mrf.mxu0  ;;  %v4349_v60 = vpop.eup %4348 }
 0x261   :  { %v758_v58 = vadd.f32 %v5170_v32, %v757_v57 }
 0x262   :  { %v759_v59 = vpop.f32.mrf.mxu0 }
 0x263   :  { %4356 = vtanh.f32 %v758_v58 }
 0x264   :  { %v4351_v61 = vpop.eup %4350  ;;  %v760_v62 = vpop.f32.mrf.mxu0 }
 0x265   :  { %v761_v63 = vadd.f32 %v5170_v32, %v760_v62  ;;  %v857_v1 = vpack.c.bf16 %v4351_v61, %v4349_v60 }
 0x266   :  { %v762_v3 = vpop.f32.mrf.mxu0 }
 0x267   :  { %4358 = vtanh.f32 %v761_v63  ;;  %3922 = vmatmul.mubr.bf16.vlgmr.msra.gmra.mxu1 %v857_v1 }
 0x268   :  { %v3867_v4 = vpop.f32.mrf.mxu0  ;;  %3930 = vmatpush3.bf16.msra.mxu1 %v5210_v53  ;;  %v4353_v7 = vpop.eup %4352  ;;  %v4201_v53 = vld [vmem:[%s5883_s5] sm:$0xff]  }
 0x269   :  { %3931 = vmatprep.subr.bf16.mxu1 %v4199_v2  ;;  %v974_v13 = vadd.f32 %v3867_v4, %v5250_v6 }
 0x26a   :  { %v965_v32 = vpop.f32.mrf.mxu0 }
 0x26b   :  { %v966_v8 = vadd.f32 %v5250_v6, %v965_v32 }
 0x26c   :  { %v4355_v9 = vpop.eup %4354  ;;  %v3868_v10 = vpop.f32.mrf.mxu0  ;;  %3932 = vmatpush3.bf16.msra.mxu1 %v4199_v2 }
 0x26d   :  { %v977_v11 = vadd.f32 %v3868_v10, %v5250_v6  ;;  %v858_v12 = vpack.c.bf16 %v4355_v9, %v4353_v7  ;;  %3933 = vmatprep.subr.bf16.mxu1 %v4200_v5  ;;  %4360 = vtanh.f32 %v966_v8 }
 0x26e   :  { %v968_v14 = vpop.f32.mrf.mxu0 }
 0x26f   :  { %v969_v15 = vadd.f32 %v5250_v6, %v968_v14  ;;  %3925 = vmatprep.mubr.bf16.mxu1 %v858_v12  ;;  %4362 = vtanh.f32 %v977_v11 }
 0x270   :  { %v3871_v16 = vpop.f32.mrf.mxu0  ;;  %3934 = vmatpush3.bf16.msra.mxu1 %v4200_v5  ;;  %v4357_v19 = vpop.eup %4356 }
 0x271   :  { %4364 = vtanh.f32 %v969_v15  ;;  %3935 = vmatprep.subr.bf16.mxu1 %v4201_v53  ;;  %v990_v25 = vadd.f32 %v3871_v16, %v5250_v6 }
 0x272   :  { %4366 = vtanh.f32 %v974_v13  ;;  %v981_v18 = vpop.f32.mrf.mxu0 }
 0x273   :  { %v982_v20 = vadd.f32 %v5250_v6, %v981_v18 }
 0x274   :  { %v4359_v21 = vpop.eup %4358  ;;  %v3872_v22 = vpop.f32.mrf.mxu0  ;;  %3936 = vmatpush3.bf16.msra.mxu1 %v4201_v53 }
 0x275   :  { %v993_v23 = vadd.f32 %v3872_v22, %v5250_v6  ;;  %v859_v24 = vpack.c.bf16 %v4359_v21, %v4357_v19  ;;  %4001 = vmatprep.subr.bf16.mxu1 %v4202_v17  ;;  %4368 = vtanh.f32 %v982_v20 }
 0x276   :  { %v984_v26 = vpop.f32.mrf.mxu0 }
 0x277   :  { %v985_v27 = vadd.f32 %v5250_v6, %v984_v26  ;;  %3926 = vmatmul.mubr.bf16.gmra.mxu1 %v859_v24  ;;  %4370 = vtanh.f32 %v993_v23 }
 0x278   :  { %v3875_v28 = vpop.f32.mrf.mxu0 }
 0x279   :  { %4372 = vtanh.f32 %v985_v27  ;;  %v1006_v37 = vadd.f32 %v3875_v28, %v5250_v6 }
 0x27a   :  { %4374 = vtanh.f32 %v990_v25  ;;  %v997_v29 = vpop.f32.mrf.mxu0  ;;  %v4361_v31 = vpop.eup %4360 }
 0x27b   :  { %v998_v30 = vadd.f32 %v5250_v6, %v997_v29 }
 0x27c   :  { %v3876_v33 = vpop.f32.mrf.mxu0  ;;  %v4363_v34 = vpop.eup %4362 }
 0x27d   :  { %v1009_v35 = vadd.f32 %v3876_v33, %v5250_v6  ;;  %4376 = vtanh.f32 %v998_v30 }
 0x27e   :  { %v4365_v36 = vpop.eup %4364  ;;  %v1000_v38 = vpop.f32.mrf.mxu0 }
 0x27f   :  { %v4367_v39 = vpop.eup %4366  ;;  %v1001_v40 = vadd.f32 %v5250_v6, %v1000_v38  ;;  %v1284_v41 = vpack.c.bf16 %v4365_v36, %v4361_v31  ;;  %4378 = vtanh.f32 %v1009_v35 }
 0x280   :  { %v1285_v42 = vpack.c.bf16 %v4363_v34, %v4367_v39  ;;  %v3879_v43 = vpop.f32.mrf.mxu0 }
 0x281   :  { %4380 = vtanh.f32 %v1001_v40  ;;  %3937 = vmatprep.mubr.msk.bf16.mxu1 %vm1355_vm0, %v1284_v41  ;;  %v1022_v51 = vadd.f32 %v3879_v43, %v5250_v6 }
 0x282   :  { %4382 = vtanh.f32 %v1006_v37  ;;  %v1013_v44 = vpop.f32.mrf.mxu0  ;;  %3938 = vmatmul.mubr.msk.bf16.vlgmr.msra.gmra.mxu1 %vm1355_vm0, %v1285_v42  ;;  %v4369_v46 = vpop.eup %4368 }
 0x283   :  { %v1014_v45 = vadd.f32 %v5250_v6, %v1013_v44  ;;  %4002 = vmatpush3.bf16.msra.mxu1 %v4202_v17  ;;  %v4203_v17 = vld [vmem:[#allocation10] sm:$0xff]  }
 0x284   :  { %v3880_v47 = vpop.f32.mrf.mxu0  ;;  %v4371_v48 = vpop.eup %4370  ;;  %4003 = vmatprep.subr.bf16.mxu1 %v4203_v17 }
 0x285   :  { %v1025_v49 = vadd.f32 %v3880_v47, %v5250_v6  ;;  %4384 = vtanh.f32 %v1014_v45 }
 0x286   :  { %v4373_v50 = vpop.eup %4372  ;;  %v1016_v52 = vpop.f32.mrf.mxu0 }
 0x287   :  { %v4375_v54 = vpop.eup %4374  ;;  %v1017_v55 = vadd.f32 %v5250_v6, %v1016_v52  ;;  %v1286_v56 = vpack.c.bf16 %v4373_v50, %v4369_v46  ;;  %4386 = vtanh.f32 %v1025_v49  ;;  %4004 = vmatpush3.bf16.msra.mxu1 %v4203_v17 }
 0x288   :  { %v3883_v57 = vpop.f32.mrf.mxu0  ;;  %v1287_v58 = vpack.c.bf16 %v4371_v48, %v4375_v54 }
 0x289   :  { %4388 = vtanh.f32 %v1017_v55  ;;  %3941 = vmatprep.mubr.msk.bf16.mxu1 %vm1355_vm0, %v1286_v56  ;;  %v1038_v3 = vadd.f32 %v3883_v57, %v5250_v6 }
 0x28a   :  { %4390 = vtanh.f32 %v1022_v51  ;;  %v1029_v59 = vpop.f32.mrf.mxu0  ;;  %3942 = vmatmul.mubr.msk.bf16.gmra.mxu1 %vm1355_vm0, %v1287_v58  ;;  %v4377_v61 = vpop.eup %4376 }
 0x28b   :  { %v1030_v60 = vadd.f32 %v5250_v6, %v1029_v59 }
 0x28c   :  { %v3884_v62 = vpop.f32.mrf.mxu0  ;;  %v4379_v63 = vpop.eup %4378 }
 0x28d   :  { %v1041_v1 = vadd.f32 %v3884_v62, %v5250_v6  ;;  %4392 = vtanh.f32 %v1030_v60 }
 0x28e   :  { %v4381_v2 = vpop.eup %4380  ;;  %v1032_v4 = vpop.f32.mrf.mxu0 }
 0x28f   :  { %v4383_v5 = vpop.eup %4382  ;;  %v1033_v32 = vadd.f32 %v5250_v6, %v1032_v4  ;;  %v1288_v7 = vpack.c.bf16 %v4381_v2, %v4377_v61  ;;  %4394 = vtanh.f32 %v1041_v1 }
 0x290   :  { %v1289_v8 = vpack.c.bf16 %v4379_v63, %v4383_v5 }
 0x291   :  { %4396 = vtanh.f32 %v1033_v32  ;;  %3945 = vmatprep.mubr.msk.bf16.mxu1 %vm1355_vm0, %v1288_v7 }
 0x292   :  { %4398 = vtanh.f32 %v1038_v3  ;;  %3946 = vmatmul.mubr.msk.bf16.gmra.mxu1 %vm1355_vm0, %v1289_v8  ;;  %v4385_v9 = vpop.eup %4384 }
 0x294   :  { %v4387_v10 = vpop.eup %4386 }
 0x296   :  { %v4389_v11 = vpop.eup %4388 }
 0x297   :  { %v4391_v12 = vpop.eup %4390  ;;  %v3887_v53 = vpop.f32.mrf.mxu0  ;;  %v1290_v13 = vpack.c.bf16 %v4389_v11, %v4385_v9 }
 0x298   :  { %v1291_v14 = vpack.c.bf16 %v4387_v10, %v4391_v12  ;;  %v1054_v22 = vadd.f32 %v3887_v53, %v5250_v6 }
 0x299   :  { %v1045_v15 = vpop.f32.mrf.mxu0  ;;  %3949 = vmatprep.mubr.msk.bf16.mxu1 %vm1355_vm0, %v1290_v13 }
 0x29a   :  { %v1046_v16 = vadd.f32 %v5250_v6, %v1045_v15  ;;  %3950 = vmatmul.mubr.msk.bf16.gmra.mxu1 %vm1355_vm0, %v1291_v14  ;;  %v4393_v19 = vpop.eup %4392 }
 0x29b   :  { %v3888_v18 = vpop.f32.mrf.mxu0 }
 0x29c   :  { %v1057_v20 = vadd.f32 %v3888_v18, %v5250_v6  ;;  %v4395_v21 = vpop.eup %4394  ;;  %4400 = vtanh.f32 %v1046_v16 }
 0x29d   :  { %v1048_v23 = vpop.f32.mrf.mxu0 }
 0x29e   :  { %v4397_v24 = vpop.eup %4396  ;;  %v1049_v25 = vadd.f32 %v5250_v6, %v1048_v23  ;;  %4402 = vtanh.f32 %v1057_v20 }
 0x29f   :  { %v4399_v26 = vpop.eup %4398  ;;  %v1292_v27 = vpack.c.bf16 %v4397_v24, %v4393_v19 }
 0x2a0   :  { %4404 = vtanh.f32 %v1049_v25  ;;  %v1293_v28 = vpack.c.bf16 %v4395_v21, %v4399_v26 }
 0x2a1   :  { %4406 = vtanh.f32 %v1054_v22  ;;  %3953 = vmatprep.mubr.msk.bf16.mxu1 %vm1355_vm0, %v1292_v27 }
 0x2a2   :  { %3954 = vmatmul.mubr.msk.bf16.gmra.mxu1 %vm1355_vm0, %v1293_v28 }
 0x2a7   :  { %v3891_v29 = vpop.f32.mrf.mxu0 }
 0x2a8   :  { %v1070_v38 = vadd.f32 %v3891_v29, %v5250_v6 }
 0x2a9   :  { %v1061_v30 = vpop.f32.mrf.mxu0  ;;  %v4401_v33 = vpop.eup %4400 }
 0x2aa   :  { %v1062_v31 = vadd.f32 %v5250_v6, %v1061_v30 }
 0x2ab   :  { %v3892_v34 = vpop.f32.mrf.mxu0  ;;  %v4403_v35 = vpop.eup %4402 }
 0x2ac   :  { %v1073_v36 = vadd.f32 %v3892_v34, %v5250_v6  ;;  %4408 = vtanh.f32 %v1062_v31 }
 0x2ad   :  { %v4405_v37 = vpop.eup %4404  ;;  %v1064_v39 = vpop.f32.mrf.mxu0 }
 0x2ae   :  { %v4407_v40 = vpop.eup %4406  ;;  %v1065_v41 = vadd.f32 %v5250_v6, %v1064_v39  ;;  %v1294_v42 = vpack.c.bf16 %v4405_v37, %v4401_v33  ;;  %4410 = vtanh.f32 %v1073_v36 }
 0x2af   :  { %v1295_v43 = vpack.c.bf16 %v4403_v35, %v4407_v40 }
 0x2b0   :  { %4412 = vtanh.f32 %v1065_v41  ;;  %3957 = vmatprep.mubr.msk.bf16.mxu1 %vm1355_vm0, %v1294_v42 }
 0x2b1   :  { %4414 = vtanh.f32 %v1070_v38  ;;  %3958 = vmatmul.mubr.msk.bf16.gmra.mxu1 %vm1355_vm0, %v1295_v43 }
 0x2b7   :  { %v3895_v44 = vpop.f32.mrf.mxu0 }
 0x2b8   :  { %v1086_v52 = vadd.f32 %v3895_v44, %v5250_v6 }
 0x2b9   :  { %v1077_v45 = vpop.f32.mrf.mxu0  ;;  %v4409_v47 = vpop.eup %4408 }
 0x2ba   :  { %v1078_v46 = vadd.f32 %v5250_v6, %v1077_v45 }
 0x2bb   :  { %v3896_v48 = vpop.f32.mrf.mxu0  ;;  %v4411_v49 = vpop.eup %4410 }
 0x2bc   :  { %v1089_v50 = vadd.f32 %v3896_v48, %v5250_v6  ;;  %4416 = vtanh.f32 %v1078_v46 }
 0x2bd   :  { %v4413_v51 = vpop.eup %4412  ;;  %v1080_v54 = vpop.f32.mrf.mxu0 }
 0x2be   :  { %v4415_v55 = vpop.eup %4414  ;;  %v1081_v56 = vadd.f32 %v5250_v6, %v1080_v54  ;;  %v1296_v57 = vpack.c.bf16 %v4413_v51, %v4409_v47  ;;  %4418 = vtanh.f32 %v1089_v50 }
 0x2bf   :  { %v1297_v58 = vpack.c.bf16 %v4411_v49, %v4415_v55 }
 0x2c0   :  { %4420 = vtanh.f32 %v1081_v56  ;;  %3961 = vmatprep.mubr.msk.bf16.mxu1 %vm1355_vm0, %v1296_v57 }
 0x2c1   :  { %4422 = vtanh.f32 %v1086_v52  ;;  %3962 = vmatmul.mubr.msk.bf16.gmra.mxu1 %vm1355_vm0, %v1297_v58 }
 0x2c7   :  { %v3899_v59 = vpop.f32.mrf.mxu0 }
 0x2c8   :  { %v1102_v4 = vadd.f32 %v3899_v59, %v5250_v6 }
 0x2c9   :  { %v1093_v60 = vpop.f32.mrf.mxu0  ;;  %v4417_v62 = vpop.eup %4416 }
 0x2ca   :  { %v1094_v61 = vadd.f32 %v5250_v6, %v1093_v60 }
 0x2cb   :  { %v3900_v63 = vpop.f32.mrf.mxu0  ;;  %v4419_v1 = vpop.eup %4418 }
 0x2cc   :  { %v1105_v2 = vadd.f32 %v3900_v63, %v5250_v6  ;;  %4424 = vtanh.f32 %v1094_v61 }
 0x2cd   :  { %v4421_v3 = vpop.eup %4420  ;;  %v1096_v5 = vpop.f32.mrf.mxu0 }
 0x2ce   :  { %v4423_v32 = vpop.eup %4422  ;;  %v1097_v7 = vadd.f32 %v5250_v6, %v1096_v5  ;;  %v1298_v8 = vpack.c.bf16 %v4421_v3, %v4417_v62  ;;  %4426 = vtanh.f32 %v1105_v2 }
 0x2cf   :  { %v1299_v9 = vpack.c.bf16 %v4419_v1, %v4423_v32 }
 0x2d0   :  { %4428 = vtanh.f32 %v1097_v7  ;;  %3965 = vmatprep.mubr.msk.bf16.mxu1 %vm1355_vm0, %v1298_v8 }
 0x2d1   :  { %4430 = vtanh.f32 %v1102_v4  ;;  %3966 = vmatmul.mubr.msk.bf16.gmra.mxu1 %vm1355_vm0, %v1299_v9 }
 0x2d7   :  { %v3903_v10 = vpop.f32.mrf.mxu0 }
 0x2d8   :  { %v1118_v17 = vadd.f32 %v3903_v10, %v5250_v6 }
 0x2d9   :  { %v1109_v11 = vpop.f32.mrf.mxu0  ;;  %v4425_v53 = vpop.eup %4424 }
 0x2da   :  { %v1110_v12 = vadd.f32 %v5250_v6, %v1109_v11 }
 0x2db   :  { %v3904_v13 = vpop.f32.mrf.mxu0  ;;  %v4427_v14 = vpop.eup %4426 }
 0x2dc   :  { %v1121_v15 = vadd.f32 %v3904_v13, %v5250_v6  ;;  %4432 = vtanh.f32 %v1110_v12 }
 0x2dd   :  { %v4429_v16 = vpop.eup %4428  ;;  %v1112_v18 = vpop.f32.mrf.mxu0 }
 0x2de   :  { %v4431_v19 = vpop.eup %4430  ;;  %v1113_v20 = vadd.f32 %v5250_v6, %v1112_v18  ;;  %v1300_v21 = vpack.c.bf16 %v4429_v16, %v4425_v53  ;;  %4434 = vtanh.f32 %v1121_v15 }
 0x2df   :  { %v1301_v22 = vpack.c.bf16 %v4427_v14, %v4431_v19 }
 0x2e0   :  { %4436 = vtanh.f32 %v1113_v20  ;;  %3969 = vmatprep.mubr.msk.bf16.mxu1 %vm1355_vm0, %v1300_v21 }
 0x2e1   :  { %4438 = vtanh.f32 %v1118_v17  ;;  %3970 = vmatmul.mubr.msk.bf16.gmra.mxu1 %vm1355_vm0, %v1301_v22 }
 0x2e7   :  { %v3907_v23 = vpop.f32.mrf.mxu0 }
 0x2e8   :  { %v1134_v31 = vadd.f32 %v3907_v23, %v5250_v6 }
 0x2e9   :  { %v1125_v24 = vpop.f32.mrf.mxu0  ;;  %v4433_v26 = vpop.eup %4432 }
 0x2ea   :  { %v1126_v25 = vadd.f32 %v5250_v6, %v1125_v24 }
 0x2eb   :  { %v3908_v27 = vpop.f32.mrf.mxu0  ;;  %v4435_v28 = vpop.eup %4434 }
 0x2ec   :  { %v1137_v29 = vadd.f32 %v3908_v27, %v5250_v6  ;;  %4440 = vtanh.f32 %v1126_v25 }
 0x2ed   :  { %v4437_v30 = vpop.eup %4436  ;;  %v1128_v33 = vpop.f32.mrf.mxu0 }
 0x2ee   :  { %v4439_v34 = vpop.eup %4438  ;;  %v1129_v35 = vadd.f32 %v5250_v6, %v1128_v33  ;;  %v1302_v36 = vpack.c.bf16 %v4437_v30, %v4433_v26  ;;  %4442 = vtanh.f32 %v1137_v29 }
 0x2ef   :  { %v1303_v37 = vpack.c.bf16 %v4435_v28, %v4439_v34 }
 0x2f0   :  { %4444 = vtanh.f32 %v1129_v35  ;;  %3973 = vmatprep.mubr.msk.bf16.mxu1 %vm1355_vm0, %v1302_v36 }
 0x2f1   :  { %4446 = vtanh.f32 %v1134_v31  ;;  %3974 = vmatmul.mubr.msk.bf16.gmra.mxu1 %vm1355_vm0, %v1303_v37 }
 0x2f7   :  { %v3911_v38 = vpop.f32.mrf.mxu0 }
 0x2f8   :  { %v1150_v46 = vadd.f32 %v3911_v38, %v5250_v6 }
 0x2f9   :  { %v1141_v39 = vpop.f32.mrf.mxu0  ;;  %v4441_v41 = vpop.eup %4440 }
 0x2fa   :  { %v1142_v40 = vadd.f32 %v5250_v6, %v1141_v39 }
 0x2fb   :  { %v3912_v42 = vpop.f32.mrf.mxu0  ;;  %v4443_v43 = vpop.eup %4442 }
 0x2fc   :  { %v1153_v44 = vadd.f32 %v3912_v42, %v5250_v6  ;;  %4448 = vtanh.f32 %v1142_v40 }
 0x2fd   :  { %v4445_v45 = vpop.eup %4444  ;;  %v1144_v47 = vpop.f32.mrf.mxu0 }
 0x2fe   :  { %v4447_v48 = vpop.eup %4446  ;;  %v1145_v49 = vadd.f32 %v5250_v6, %v1144_v47  ;;  %v1304_v50 = vpack.c.bf16 %v4445_v45, %v4441_v41  ;;  %4450 = vtanh.f32 %v1153_v44 }
 0x2ff   :  { %v1305_v51 = vpack.c.bf16 %v4443_v43, %v4447_v48 }
 0x300   :  { %4452 = vtanh.f32 %v1145_v49  ;;  %3977 = vmatprep.mubr.msk.bf16.mxu1 %vm1355_vm0, %v1304_v50 }
 0x301   :  { %4454 = vtanh.f32 %v1150_v46  ;;  %3978 = vmatmul.mubr.msk.bf16.gmra.mxu1 %vm1355_vm0, %v1305_v51  ;;  %v5348_v46 = vld [vmem:[#allocation8] ss:$0 sm:$0xff]  ;;  %v4204_v51 = vld [vmem:[%s5887_s9 + $0x18] sm:$0xff]  }
 0x302   :  { %4069 = vmatprep.subr.bf16.mxu0 %v4204_v51 }
 0x303   :  { %4070 = vmatpush3.bf16.msra.mxu0 %v4204_v51 }
 0x307   :  { %v3915_v52 = vpop.f32.mrf.mxu0 }
 0x308   :  { %v1166_v61 = vadd.f32 %v3915_v52, %v5250_v6 }
 0x309   :  { %v1157_v54 = vpop.f32.mrf.mxu0  ;;  %v4449_v56 = vpop.eup %4448 }
 0x30a   :  { %v1158_v55 = vadd.f32 %v5250_v6, %v1157_v54 }
 0x30b   :  { %v3916_v57 = vpop.f32.mrf.mxu0  ;;  %v4451_v58 = vpop.eup %4450 }
 0x30c   :  { %v1169_v59 = vadd.f32 %v3916_v57, %v5250_v6  ;;  %4456 = vtanh.f32 %v1158_v55 }
 0x30d   :  { %v4453_v60 = vpop.eup %4452  ;;  %v1160_v62 = vpop.f32.mrf.mxu0 }
 0x30e   :  { %v4455_v63 = vpop.eup %4454  ;;  %v1161_v1 = vadd.f32 %v5250_v6, %v1160_v62  ;;  %v1306_v2 = vpack.c.bf16 %v4453_v60, %v4449_v56  ;;  %4458 = vtanh.f32 %v1169_v59 }
 0x30f   :  { %v1307_v3 = vpack.c.bf16 %v4451_v58, %v4455_v63 }
 0x310   :  { %4460 = vtanh.f32 %v1161_v1  ;;  %3981 = vmatprep.mubr.msk.bf16.mxu1 %vm1355_vm0, %v1306_v2 }
 0x311   :  { %4462 = vtanh.f32 %v1166_v61  ;;  %3982 = vmatmul.mubr.msk.bf16.gmra.mxu1 %vm1355_vm0, %v1307_v3 }
 0x317   :  { %v3919_v4 = vpop.f32.mrf.mxu0 }
 0x318   :  { %v1182_v12 = vadd.f32 %v3919_v4, %v5250_v6 }
 0x319   :  { %v1173_v5 = vpop.f32.mrf.mxu0  ;;  %v4457_v7 = vpop.eup %4456 }
 0x31a   :  { %v1174_v32 = vadd.f32 %v5250_v6, %v1173_v5 }
 0x31b   :  { %v3920_v8 = vpop.f32.mrf.mxu0  ;;  %v4459_v9 = vpop.eup %4458 }
 0x31c   :  { %v1185_v10 = vadd.f32 %v3920_v8, %v5250_v6  ;;  %4464 = vtanh.f32 %v1174_v32 }
 0x31d   :  { %v4461_v11 = vpop.eup %4460  ;;  %v1176_v53 = vpop.f32.mrf.mxu0 }
 0x31e   :  { %v4463_v13 = vpop.eup %4462  ;;  %v1177_v14 = vadd.f32 %v5250_v6, %v1176_v53  ;;  %v1308_v15 = vpack.c.bf16 %v4461_v11, %v4457_v7  ;;  %4466 = vtanh.f32 %v1185_v10 }
 0x31f   :  { %v1309_v16 = vpack.c.bf16 %v4459_v9, %v4463_v13 }
 0x320   :  { %4468 = vtanh.f32 %v1177_v14  ;;  %3985 = vmatprep.mubr.msk.bf16.mxu1 %vm1355_vm0, %v1308_v15 }
 0x321   :  { %4470 = vtanh.f32 %v1182_v12  ;;  %3986 = vmatmul.mubr.msk.bf16.gmra.mxu1 %vm1355_vm0, %v1309_v16 }
 0x327   :  { %v3923_v17 = vpop.f32.mrf.mxu1 }
 0x328   :  { %v1198_v25 = vadd.f32 %v3923_v17, %v5250_v6 }
 0x329   :  { %v1189_v18 = vpop.f32.mrf.mxu1  ;;  %v4465_v20 = vpop.eup %4464 }
 0x32a   :  { %v1190_v19 = vadd.f32 %v5250_v6, %v1189_v18 }
 0x32b   :  { %v3924_v21 = vpop.f32.mrf.mxu1  ;;  %v4467_v22 = vpop.eup %4466 }
 0x32c   :  { %v1201_v23 = vadd.f32 %v3924_v21, %v5250_v6  ;;  %4472 = vtanh.f32 %v1190_v19 }
 0x32d   :  { %v4469_v24 = vpop.eup %4468  ;;  %v1192_v26 = vpop.f32.mrf.mxu1 }
 0x32e   :  { %v4471_v27 = vpop.eup %4470  ;;  %v1193_v28 = vadd.f32 %v5250_v6, %v1192_v26  ;;  %v1310_v29 = vpack.c.bf16 %v4469_v24, %v4465_v20  ;;  %4474 = vtanh.f32 %v1201_v23 }
 0x32f   :  { %v1311_v30 = vpack.c.bf16 %v4467_v22, %v4471_v27 }
 0x330   :  { %4476 = vtanh.f32 %v1193_v28  ;;  %3989 = vmatprep.mubr.msk.bf16.mxu1 %vm1355_vm0, %v1310_v29 }
 0x331   :  { %4478 = vtanh.f32 %v1198_v25  ;;  %3990 = vmatmul.mubr.msk.bf16.gmra.mxu1 %vm1355_vm0, %v1311_v30 }
 0x337   :  { %v3927_v31 = vpop.f32.mrf.mxu1 }
 0x338   :  { %v1214_v40 = vadd.f32 %v3927_v31, %v5250_v6 }
 0x339   :  { %v1205_v33 = vpop.f32.mrf.mxu1  ;;  %v4473_v35 = vpop.eup %4472 }
 0x33a   :  { %v1206_v34 = vadd.f32 %v5250_v6, %v1205_v33 }
 0x33b   :  { %v3928_v36 = vpop.f32.mrf.mxu1  ;;  %v4475_v37 = vpop.eup %4474 }
 0x33c   :  { %v1217_v38 = vadd.f32 %v3928_v36, %v5250_v6  ;;  %4480 = vtanh.f32 %v1206_v34 }
 0x33d   :  { %v4477_v39 = vpop.eup %4476  ;;  %v1208_v41 = vpop.f32.mrf.mxu1 }
 0x33e   :  { %v4479_v42 = vpop.eup %4478  ;;  %v1209_v43 = vadd.f32 %v5250_v6, %v1208_v41  ;;  %v1312_v44 = vpack.c.bf16 %v4477_v39, %v4473_v35  ;;  %4482 = vtanh.f32 %v1217_v38  ;;  %v4205_v35 = vld [vmem:[%s5887_s9 + $0x10] sm:$0xff]  }
 0x33f   :  { %v1313_v45 = vpack.c.bf16 %v4475_v37, %v4479_v42  ;;  %4071 = vmatprep.subr.bf16.mxu0 %v4205_v35 }
 0x340   :  { %4484 = vtanh.f32 %v1209_v43  ;;  %3993 = vmatprep.mubr.msk.bf16.mxu1 %vm1355_vm0, %v1312_v44  ;;  %4072 = vmatpush3.bf16.msra.mxu0 %v4205_v35 }
 0x341   :  { %4486 = vtanh.f32 %v1214_v40  ;;  %3994 = vmatmul.mubr.msk.bf16.gmra.mxu1 %vm1355_vm0, %v1313_v45 }
 0x342   :  { %v3939_v47 = vpop.f32.mrf.mxu1 }
 0x343   :  { %v1495_v48 = vadd.f32 %v3939_v47, %v5348_v46 }
 0x344   :  { %v1486_v49 = vpop.f32.mrf.mxu1 }
 0x345   :  { %v3261_v50 = vsel %vm1796_vm1, %v1495_v48, 0.0  ;;  %v1487_v6 = vadd.f32 %v5348_v46, %v1486_v49 }
 0x346   :  { %3325 = vst [vmem:[#allocation16 + $0x10] sm:$0xff] %v3261_v50  ;;  %v3940_v52 = vpop.f32.mrf.mxu1 }
 0x347   :  { %v3259_v54 = vsel %vm1796_vm1, %v1487_v6, 0.0  ;;  %v1498_v55 = vadd.f32 %v3940_v52, %v5348_v46 }
 0x348   :  { %3323 = vst [vmem:[#allocation16] sm:$0xff] %v3259_v54  ;;  %v1489_v56 = vpop.f32.mrf.mxu1 }
 0x349   :  { %v3262_v57 = vsel %vm1796_vm1, %v1498_v55, 0.0  ;;  %v1490_v58 = vadd.f32 %v5348_v46, %v1489_v56  ;;  %v4481_v60 = vpop.eup %4480  ;;  %v1742_v21 = vpack.c.bf16 %v1498_v55, %v1495_v48 }
 0x34a   :  { %3326 = vst [vmem:[#allocation16 + $0x18] sm:$0xff] %v3262_v57  ;;  %v3943_v59 = vpop.f32.mrf.mxu1 }
 0x34b   :  { %v3260_v61 = vsel %vm1796_vm1, %v1490_v58, 0.0  ;;  %v5363_v62 = vadd.f32 %v3943_v59, %v5348_v46  ;;  %v4483_v63 = vpop.eup %4482  ;;  %v1741_v11 = vpack.c.bf16 %v1490_v58, %v1487_v6 }
 0x34c   :  { %3324 = vst [vmem:[#allocation16 + $0x8] sm:$0xff] %v3260_v61  ;;  %v1502_v1 = vpop.f32.mrf.mxu1 }
 0x34d   :  { %v4485_v2 = vpop.eup %4484  ;;  %v3265_v3 = vsel %vm1796_vm1, %v5363_v62, 0.0  ;;  %v1503_v4 = vadd.f32 %v5348_v46, %v1502_v1 }
 0x34e   :  { %v4487_v5 = vpop.eup %4486  ;;  %3329 = vst [vmem:[#allocation16 + $0x30] sm:$0xff] %v3265_v3  ;;  %v3944_v32 = vpop.f32.mrf.mxu1  ;;  %v1314_v7 = vpack.c.bf16 %v4485_v2, %v4481_v60 }
 0x34f   :  { %v3263_v8 = vsel %vm1796_vm1, %v1503_v4, 0.0  ;;  %v1514_v9 = vadd.f32 %v3944_v32, %v5348_v46  ;;  %v1315_v10 = vpack.c.bf16 %v4483_v63, %v4487_v5 }
 0x350   :  { %3327 = vst [vmem:[#allocation16 + $0x20] sm:$0xff] %v3263_v8  ;;  %v1505_v12 = vpop.f32.mrf.mxu1  ;;  %3997 = vmatprep.mubr.msk.bf16.mxu1 %vm1355_vm0, %v1314_v7 }
 0x351   :  { %v3266_v53 = vsel %vm1796_vm1, %v1514_v9, 0.0  ;;  %v1506_v13 = vadd.f32 %v5348_v46, %v1505_v12  ;;  %3998 = vmatmul.mubr.msk.bf16.gmra.mxu1 %vm1355_vm0, %v1315_v10  ;;  %v1744_v37 = vpack.c.bf16 %v1514_v9, %v5363_v62 }
 0x352   :  { %3330 = vst [vmem:[#allocation16 + $0x38] sm:$0xff] %v3266_v53  ;;  %v3947_v14 = vpop.f32.mrf.mxu1  ;;  %4005 = vmatprep.mubr.msk.bf16.mxu1 %vm1796_vm1, %v1741_v11  ;;  %v4206_v53 = vld [vmem:[%s5887_s9 + $0x8] sm:$0xff]  }
 0x353   :  { %v3264_v15 = vsel %vm1796_vm1, %v1506_v13, 0.0  ;;  %v1527_v16 = vadd.f32 %v3947_v14, %v5348_v46  ;;  %v1743_v24 = vpack.c.bf16 %v1506_v13, %v1503_v4  ;;  %4073 = vmatprep.subr.bf16.mxu0 %v4206_v53 }
 0x354   :  { %3328 = vst [vmem:[#allocation16 + $0x28] sm:$0xff] %v3264_v15  ;;  %v1518_v17 = vpop.f32.mrf.mxu1  ;;  %4074 = vmatpush3.bf16.msra.mxu0 %v4206_v53 }
 0x355   :  { %v3269_v18 = vsel %vm1796_vm1, %v1527_v16, 0.0  ;;  %v1519_v19 = vadd.f32 %v5348_v46, %v1518_v17 }
 0x356   :  { %3333 = vst [vmem:[#allocation16 + $0x50] sm:$0xff] %v3269_v18  ;;  %v3948_v20 = vpop.f32.mrf.mxu1 }
 0x357   :  { %v3267_v22 = vsel %vm1796_vm1, %v1519_v19, 0.0  ;;  %v1530_v23 = vadd.f32 %v3948_v20, %v5348_v46 }
 0x358   :  { %3331 = vst [vmem:[#allocation16 + $0x40] sm:$0xff] %v3267_v22  ;;  %v1521_v25 = vpop.f32.mrf.mxu1 }
 0x359   :  { %v3270_v26 = vsel %vm1796_vm1, %v1530_v23, 0.0  ;;  %v1522_v27 = vadd.f32 %v5348_v46, %v1521_v25  ;;  %4006 = vmatmul.mubr.msk.bf16.vlgmr.msra.gmra.mxu1 %vm1796_vm1, %v1742_v21  ;;  %v1746_v51 = vpack.c.bf16 %v1530_v23, %v1527_v16 }
 0x35a   :  { %3334 = vst [vmem:[#allocation16 + $0x58] sm:$0xff] %v3270_v26  ;;  %v3951_v28 = vpop.f32.mrf.mxu1  ;;  %4009 = vmatprep.mubr.msk.bf16.mxu1 %vm1796_vm1, %v1743_v24 }
 0x35b   :  { %v3268_v29 = vsel %vm1796_vm1, %v1522_v27, 0.0  ;;  %v1543_v30 = vadd.f32 %v3951_v28, %v5348_v46  ;;  %v1745_v40 = vpack.c.bf16 %v1522_v27, %v1519_v19 }
 0x35c   :  { %3332 = vst [vmem:[#allocation16 + $0x48] sm:$0xff] %v3268_v29  ;;  %v1534_v31 = vpop.f32.mrf.mxu1 }
 0x35d   :  { %v3273_v33 = vsel %vm1796_vm1, %v1543_v30, 0.0  ;;  %v1535_v34 = vadd.f32 %v5348_v46, %v1534_v31 }
 0x35e   :  { %3337 = vst [vmem:[#allocation16 + $0x70] sm:$0xff] %v3273_v33  ;;  %v3952_v36 = vpop.f32.mrf.mxu1 }
 0x35f   :  { %v3271_v38 = vsel %vm1796_vm1, %v1535_v34, 0.0  ;;  %v1546_v39 = vadd.f32 %v3952_v36, %v5348_v46 }
 0x360   :  { %3335 = vst [vmem:[#allocation16 + $0x60] sm:$0xff] %v3271_v38  ;;  %v1537_v41 = vpop.f32.mrf.mxu1 }
 0x361   :  { %v3274_v42 = vsel %vm1796_vm1, %v1546_v39, 0.0  ;;  %v1538_v43 = vadd.f32 %v5348_v46, %v1537_v41  ;;  %4010 = vmatmul.mubr.msk.bf16.gmra.mxu1 %vm1796_vm1, %v1744_v37  ;;  %v1748_v60 = vpack.c.bf16 %v1546_v39, %v1543_v30 }
 0x362   :  { %3338 = vst [vmem:[#allocation16 + $0x78] sm:$0xff] %v3274_v42  ;;  %v3955_v44 = vpop.f32.mrf.mxu1  ;;  %4013 = vmatprep.mubr.msk.bf16.mxu1 %vm1796_vm1, %v1745_v40  ;;  %v4207_v40 = vld [vmem:[%s5887_s9] sm:$0xff]  }
 0x363   :  { %v3272_v45 = vsel %vm1796_vm1, %v1538_v43, 0.0  ;;  %v1559_v47 = vadd.f32 %v3955_v44, %v5348_v46  ;;  %v1747_v55 = vpack.c.bf16 %v1538_v43, %v1535_v34  ;;  %4075 = vmatprep.subr.bf16.mxu0 %v4207_v40 }
 0x364   :  { %3336 = vst [vmem:[#allocation16 + $0x68] sm:$0xff] %v3272_v45  ;;  %v1550_v48 = vpop.f32.mrf.mxu1  ;;  %4076 = vmatpush3.bf16.msra.mxu0 %v4207_v40 }
 0x365   :  { %v3277_v49 = vsel %vm1796_vm1, %v1559_v47, 0.0  ;;  %v1551_v50 = vadd.f32 %v5348_v46, %v1550_v48 }
 0x366   :  { %3341 = vst [vmem:[#allocation16 + $0x90] sm:$0xff] %v3277_v49  ;;  %v3956_v6 = vpop.f32.mrf.mxu1 }
 0x367   :  { %v3275_v52 = vsel %vm1796_vm1, %v1551_v50, 0.0  ;;  %v1562_v54 = vadd.f32 %v3956_v6, %v5348_v46 }
 0x368   :  { %3339 = vst [vmem:[#allocation16 + $0x80] sm:$0xff] %v3275_v52  ;;  %v1553_v56 = vpop.f32.mrf.mxu1 }
 0x369   :  { %v3278_v57 = vsel %vm1796_vm1, %v1562_v54, 0.0  ;;  %v1554_v58 = vadd.f32 %v5348_v46, %v1553_v56  ;;  %4014 = vmatmul.mubr.msk.bf16.gmra.mxu1 %vm1796_vm1, %v1746_v51  ;;  %v1750_v7 = vpack.c.bf16 %v1562_v54, %v1559_v47 }
 0x36a   :  { %3342 = vst [vmem:[#allocation16 + $0x98] sm:$0xff] %v3278_v57  ;;  %4017 = vmatprep.mubr.msk.bf16.mxu1 %vm1796_vm1, %v1747_v55 }
 0x36b   :  { %v3276_v59 = vsel %vm1796_vm1, %v1554_v58, 0.0  ;;  %v1749_v61 = vpack.c.bf16 %v1554_v58, %v1551_v50 }
 0x36c   :  { %3340 = vst [vmem:[#allocation16 + $0x88] sm:$0xff] %v3276_v59 }
 0x371   :  { %v3959_v62 = vpop.f32.mrf.mxu1  ;;  %4018 = vmatmul.mubr.msk.bf16.gmra.mxu1 %vm1796_vm1, %v1748_v60 }
 0x372   :  { %v1575_v63 = vadd.f32 %v3959_v62, %v5348_v46  ;;  %4021 = vmatprep.mubr.msk.bf16.mxu1 %vm1796_vm1, %v1749_v61 }
 0x373   :  { %v1566_v1 = vpop.f32.mrf.mxu1 }
 0x374   :  { %v3281_v2 = vsel %vm1796_vm1, %v1575_v63, 0.0  ;;  %v1567_v3 = vadd.f32 %v5348_v46, %v1566_v1 }
 0x375   :  { %3345 = vst [vmem:[#allocation16 + $0xb0] sm:$0xff] %v3281_v2  ;;  %v3960_v4 = vpop.f32.mrf.mxu1 }
 0x376   :  { %v3279_v5 = vsel %vm1796_vm1, %v1567_v3, 0.0  ;;  %v1578_v32 = vadd.f32 %v3960_v4, %v5348_v46 }
 0x377   :  { %3343 = vst [vmem:[#allocation16 + $0xa0] sm:$0xff] %v3279_v5  ;;  %v1569_v8 = vpop.f32.mrf.mxu1 }
 0x378   :  { %v3282_v9 = vsel %vm1796_vm1, %v1578_v32, 0.0  ;;  %v1570_v10 = vadd.f32 %v5348_v46, %v1569_v8  ;;  %v1752_v13 = vpack.c.bf16 %v1578_v32, %v1575_v63 }
 0x379   :  { %3346 = vst [vmem:[#allocation16 + $0xb8] sm:$0xff] %v3282_v9  ;;  %4022 = vmatmul.mubr.msk.bf16.gmra.mxu1 %vm1796_vm1, %v1750_v7 }
 0x37a   :  { %v1751_v11 = vpack.c.bf16 %v1570_v10, %v1567_v3  ;;  %v3280_v12 = vsel %vm1796_vm1, %v1570_v10, 0.0 }
 0x37b   :  { %3344 = vst [vmem:[#allocation16 + $0xa8] sm:$0xff] %v3280_v12 }
 0x37c   :  { %4025 = vmatprep.mubr.msk.bf16.mxu1 %vm1796_vm1, %v1751_v11 }
 0x381   :  { %v3963_v14 = vpop.f32.mrf.mxu1  ;;  %4026 = vmatmul.mubr.msk.bf16.gmra.mxu1 %vm1796_vm1, %v1752_v13 }
 0x382   :  { %v1591_v15 = vadd.f32 %v3963_v14, %v5348_v46 }
 0x383   :  { %v1582_v16 = vpop.f32.mrf.mxu1 }
 0x384   :  { %v3285_v17 = vsel %vm1796_vm1, %v1591_v15, 0.0  ;;  %v1583_v18 = vadd.f32 %v5348_v46, %v1582_v16 }
 0x385   :  { %3349 = vst [vmem:[#allocation16 + $0xd0] sm:$0xff] %v3285_v17  ;;  %v3964_v19 = vpop.f32.mrf.mxu1 }
 0x386   :  { %v3283_v20 = vsel %vm1796_vm1, %v1583_v18, 0.0  ;;  %v1594_v21 = vadd.f32 %v3964_v19, %v5348_v46 }
 0x387   :  { %3347 = vst [vmem:[#allocation16 + $0xc0] sm:$0xff] %v3283_v20  ;;  %v1585_v22 = vpop.f32.mrf.mxu1 }
 0x388   :  { %v3286_v23 = vsel %vm1796_vm1, %v1594_v21, 0.0  ;;  %v1586_v24 = vadd.f32 %v5348_v46, %v1585_v22  ;;  %v1754_v27 = vpack.c.bf16 %v1594_v21, %v1591_v15 }
 0x389   :  { %3350 = vst [vmem:[#allocation16 + $0xd8] sm:$0xff] %v3286_v23 }
 0x38a   :  { %v1753_v25 = vpack.c.bf16 %v1586_v24, %v1583_v18  ;;  %v3284_v26 = vsel %vm1796_vm1, %v1586_v24, 0.0 }
 0x38b   :  { %3348 = vst [vmem:[#allocation16 + $0xc8] sm:$0xff] %v3284_v26 }
 0x38c   :  { %4029 = vmatprep.mubr.msk.bf16.mxu1 %vm1796_vm1, %v1753_v25 }
 0x38d   :  { %4030 = vmatmul.mubr.msk.bf16.gmra.mxu1 %vm1796_vm1, %v1754_v27 }
 0x391   :  { %v3967_v28 = vpop.f32.mrf.mxu1 }
 0x392   :  { %v1607_v29 = vadd.f32 %v3967_v28, %v5348_v46 }
 0x393   :  { %v1598_v30 = vpop.f32.mrf.mxu1 }
 0x394   :  { %v3289_v31 = vsel %vm1796_vm1, %v1607_v29, 0.0  ;;  %v1599_v33 = vadd.f32 %v5348_v46, %v1598_v30 }
 0x395   :  { %3353 = vst [vmem:[#allocation16 + $0xf0] sm:$0xff] %v3289_v31  ;;  %v3968_v34 = vpop.f32.mrf.mxu1 }
 0x396   :  { %v3287_v35 = vsel %vm1796_vm1, %v1599_v33, 0.0  ;;  %v1610_v36 = vadd.f32 %v3968_v34, %v5348_v46 }
 0x397   :  { %3351 = vst [vmem:[#allocation16 + $0xe0] sm:$0xff] %v3287_v35  ;;  %v1601_v37 = vpop.f32.mrf.mxu1 }
 0x398   :  { %v3290_v38 = vsel %vm1796_vm1, %v1610_v36, 0.0  ;;  %v1602_v39 = vadd.f32 %v5348_v46, %v1601_v37  ;;  %v1756_v43 = vpack.c.bf16 %v1610_v36, %v1607_v29 }
 0x399   :  { %3354 = vst [vmem:[#allocation16 + $0xf8] sm:$0xff] %v3290_v38 }
 0x39a   :  { %v1755_v41 = vpack.c.bf16 %v1602_v39, %v1599_v33  ;;  %v3288_v42 = vsel %vm1796_vm1, %v1602_v39, 0.0 }
 0x39b   :  { %3352 = vst [vmem:[#allocation16 + $0xe8] sm:$0xff] %v3288_v42 }
 0x39c   :  { %4033 = vmatprep.mubr.msk.bf16.mxu1 %vm1796_vm1, %v1755_v41 }
 0x39d   :  { %4034 = vmatmul.mubr.msk.bf16.gmra.mxu1 %vm1796_vm1, %v1756_v43 }
 0x3a1   :  { %v3971_v44 = vpop.f32.mrf.mxu1 }
 0x3a2   :  { %v1623_v45 = vadd.f32 %v3971_v44, %v5348_v46 }
 0x3a3   :  { %v1614_v47 = vpop.f32.mrf.mxu1 }
 0x3a4   :  { %v3293_v48 = vsel %vm1796_vm1, %v1623_v45, 0.0  ;;  %v1615_v49 = vadd.f32 %v5348_v46, %v1614_v47 }
 0x3a5   :  { %3357 = vst [vmem:[#allocation16 + $0x110] sm:$0xff] %v3293_v48  ;;  %v3972_v50 = vpop.f32.mrf.mxu1 }
 0x3a6   :  { %v3291_v6 = vsel %vm1796_vm1, %v1615_v49, 0.0  ;;  %v1626_v51 = vadd.f32 %v3972_v50, %v5348_v46 }
 0x3a7   :  { %3355 = vst [vmem:[#allocation16 + $0x100] sm:$0xff] %v3291_v6  ;;  %v1617_v52 = vpop.f32.mrf.mxu1 }
 0x3a8   :  { %v3294_v54 = vsel %vm1796_vm1, %v1626_v51, 0.0  ;;  %v1618_v55 = vadd.f32 %v5348_v46, %v1617_v52  ;;  %v1758_v58 = vpack.c.bf16 %v1626_v51, %v1623_v45 }
 0x3a9   :  { %3358 = vst [vmem:[#allocation16 + $0x118] sm:$0xff] %v3294_v54 }
 0x3aa   :  { %v1757_v56 = vpack.c.bf16 %v1618_v55, %v1615_v49  ;;  %v3292_v57 = vsel %vm1796_vm1, %v1618_v55, 0.0 }
 0x3ab   :  { %3356 = vst [vmem:[#allocation16 + $0x108] sm:$0xff] %v3292_v57 }
 0x3ac   :  { %4037 = vmatprep.mubr.msk.bf16.mxu1 %vm1796_vm1, %v1757_v56 }
 0x3ad   :  { %4038 = vmatmul.mubr.msk.bf16.gmra.mxu1 %vm1796_vm1, %v1758_v58 }
 0x3b1   :  { %v3975_v59 = vpop.f32.mrf.mxu1 }
 0x3b2   :  { %v1639_v60 = vadd.f32 %v3975_v59, %v5348_v46 }
 0x3b3   :  { %v1630_v61 = vpop.f32.mrf.mxu1 }
 0x3b4   :  { %v3297_v62 = vsel %vm1796_vm1, %v1639_v60, 0.0  ;;  %v1631_v63 = vadd.f32 %v5348_v46, %v1630_v61 }
 0x3b5   :  { %3361 = vst [vmem:[#allocation16 + $0x130] sm:$0xff] %v3297_v62  ;;  %v3976_v1 = vpop.f32.mrf.mxu1 }
 0x3b6   :  { %v3295_v2 = vsel %vm1796_vm1, %v1631_v63, 0.0  ;;  %v1642_v3 = vadd.f32 %v3976_v1, %v5348_v46 }
 0x3b7   :  { %3359 = vst [vmem:[#allocation16 + $0x120] sm:$0xff] %v3295_v2  ;;  %v1633_v4 = vpop.f32.mrf.mxu1 }
 0x3b8   :  { %v3298_v5 = vsel %vm1796_vm1, %v1642_v3, 0.0  ;;  %v1634_v32 = vadd.f32 %v5348_v46, %v1633_v4  ;;  %v1760_v9 = vpack.c.bf16 %v1642_v3, %v1639_v60 }
 0x3b9   :  { %3362 = vst [vmem:[#allocation16 + $0x138] sm:$0xff] %v3298_v5 }
 0x3ba   :  { %v1759_v7 = vpack.c.bf16 %v1634_v32, %v1631_v63  ;;  %v3296_v8 = vsel %vm1796_vm1, %v1634_v32, 0.0 }
 0x3bb   :  { %3360 = vst [vmem:[#allocation16 + $0x128] sm:$0xff] %v3296_v8 }
 0x3bc   :  { %4041 = vmatprep.mubr.msk.bf16.mxu1 %vm1796_vm1, %v1759_v7 }
 0x3bd   :  { %4042 = vmatmul.mubr.msk.bf16.gmra.mxu1 %vm1796_vm1, %v1760_v9 }
 0x3c1   :  { %v3979_v10 = vpop.f32.mrf.mxu1 }
 0x3c2   :  { %v1655_v11 = vadd.f32 %v3979_v10, %v5348_v46 }
 0x3c3   :  { %v1646_v12 = vpop.f32.mrf.mxu1 }
 0x3c4   :  { %v3301_v53 = vsel %vm1796_vm1, %v1655_v11, 0.0  ;;  %v1647_v13 = vadd.f32 %v5348_v46, %v1646_v12 }
 0x3c5   :  { %3365 = vst [vmem:[#allocation16 + $0x150] sm:$0xff] %v3301_v53  ;;  %v3980_v14 = vpop.f32.mrf.mxu1  ;;  %v4208_v53 = vld [vmem:[#allocation14 + $0x70] ss:$8 sps:$4 sm:$0xff]  }
 0x3c6   :  { %v3299_v15 = vsel %vm1796_vm1, %v1647_v13, 0.0  ;;  %v1658_v16 = vadd.f32 %v3980_v14, %v5348_v46 }
 0x3c7   :  { %3363 = vst [vmem:[#allocation16 + $0x140] sm:$0xff] %v3299_v15  ;;  %v1649_v17 = vpop.f32.mrf.mxu1 }
 0x3c8   :  { %v3302_v18 = vsel %vm1796_vm1, %v1658_v16, 0.0  ;;  %v1650_v19 = vadd.f32 %v5348_v46, %v1649_v17  ;;  %v1762_v22 = vpack.c.bf16 %v1658_v16, %v1655_v11 }
 0x3c9   :  { %3366 = vst [vmem:[#allocation16 + $0x158] sm:$0xff] %v3302_v18 }
 0x3ca   :  { %v1761_v20 = vpack.c.bf16 %v1650_v19, %v1647_v13  ;;  %v3300_v21 = vsel %vm1796_vm1, %v1650_v19, 0.0  ;;  %v4210_v13 = vld [vmem:[#allocation14 + $0x74] ss:$8 sps:$4 sm:$0xff]  }
 0x3cb   :  { %3364 = vst [vmem:[#allocation16 + $0x148] sm:$0xff] %v3300_v21  ;;  %2906 = vmatprep.subr.bf16.mxu1 %v4210_v13 }
 0x3cc   :  { %4045 = vmatprep.mubr.msk.bf16.mxu1 %vm1796_vm1, %v1761_v20  ;;  %2907 = vmatpush1.bf16.msra.mxu1 %v4208_v53 }
 0x3cd   :  { %4046 = vmatmul.mubr.msk.bf16.gmra.mxu1 %vm1796_vm1, %v1762_v22 }
 0x3d1   :  { %v3983_v23 = vpop.f32.mrf.mxu1 }
 0x3d2   :  { %v1671_v24 = vadd.f32 %v3983_v23, %v5348_v46 }
 0x3d3   :  { %v1662_v25 = vpop.f32.mrf.mxu1 }
 0x3d4   :  { %v3305_v26 = vsel %vm1796_vm1, %v1671_v24, 0.0  ;;  %v1663_v27 = vadd.f32 %v5348_v46, %v1662_v25 }
 0x3d5   :  { %3369 = vst [vmem:[#allocation16 + $0x170] sm:$0xff] %v3305_v26  ;;  %v3984_v28 = vpop.f32.mrf.mxu1 }
 0x3d6   :  { %v3303_v29 = vsel %vm1796_vm1, %v1663_v27, 0.0  ;;  %v1674_v30 = vadd.f32 %v3984_v28, %v5348_v46  ;;  %v4211_v28 = vld [vmem:[#allocation14 + $0x60] ss:$8 sps:$4 sm:$0xff]  }
 0x3d7   :  { %3367 = vst [vmem:[#allocation16 + $0x160] sm:$0xff] %v3303_v29  ;;  %v1665_v31 = vpop.f32.mrf.mxu1  ;;  %v4213_v29 = vld [vmem:[#allocation14 + $0x64] ss:$8 sps:$4 sm:$0xff]  }
 0x3d8   :  { %v3306_v33 = vsel %vm1796_vm1, %v1674_v30, 0.0  ;;  %v1666_v34 = vadd.f32 %v5348_v46, %v1665_v31  ;;  %v1764_v37 = vpack.c.bf16 %v1674_v30, %v1671_v24  ;;  %2908 = vmatprep.subr.bf16.mxu1 %v4213_v29 }
 0x3d9   :  { %3370 = vst [vmem:[#allocation16 + $0x178] sm:$0xff] %v3306_v33  ;;  %2909 = vmatpush1.bf16.msra.mxu1 %v4211_v28 }
 0x3da   :  { %v1763_v35 = vpack.c.bf16 %v1666_v34, %v1663_v27  ;;  %v3304_v36 = vsel %vm1796_vm1, %v1666_v34, 0.0 }
 0x3db   :  { %3368 = vst [vmem:[#allocation16 + $0x168] sm:$0xff] %v3304_v36 }
 0x3dc   :  { %4049 = vmatprep.mubr.msk.bf16.mxu1 %vm1796_vm1, %v1763_v35 }
 0x3dd   :  { %4050 = vmatmul.mubr.msk.bf16.gmra.mxu1 %vm1796_vm1, %v1764_v37  ;;  %v5527_v37 = vld [vmem:[#allocation11] ss:$0 sm:$0xff] }
 0x3e1   :  { %v3987_v38 = vpop.f32.mrf.mxu1 }
 0x3e2   :  { %v1687_v39 = vadd.f32 %v3987_v38, %v5348_v46 }
 0x3e3   :  { %v1678_v40 = vpop.f32.mrf.mxu1 }
 0x3e4   :  { %v3309_v41 = vsel %vm1796_vm1, %v1687_v39, 0.0  ;;  %v1679_v42 = vadd.f32 %v5348_v46, %v1678_v40 }
 0x3e5   :  { %3373 = vst [vmem:[#allocation16 + $0x190] sm:$0xff] %v3309_v41  ;;  %v3988_v43 = vpop.f32.mrf.mxu1 }
 0x3e6   :  { %v3307_v44 = vsel %vm1796_vm1, %v1679_v42, 0.0  ;;  %v1690_v45 = vadd.f32 %v3988_v43, %v5348_v46 }
 0x3e7   :  { %3371 = vst [vmem:[#allocation16 + $0x180] sm:$0xff] %v3307_v44  ;;  %v1681_v47 = vpop.f32.mrf.mxu1 }
 0x3e8   :  { %v3310_v48 = vsel %vm1796_vm1, %v1690_v45, 0.0  ;;  %v1682_v49 = vadd.f32 %v5348_v46, %v1681_v47  ;;  %v1766_v51 = vpack.c.bf16 %v1690_v45, %v1687_v39 }
 0x3e9   :  { %3374 = vst [vmem:[#allocation16 + $0x198] sm:$0xff] %v3310_v48 }
 0x3ea   :  { %v1765_v50 = vpack.c.bf16 %v1682_v49, %v1679_v42  ;;  %v3308_v6 = vsel %vm1796_vm1, %v1682_v49, 0.0 }
 0x3eb   :  { %3372 = vst [vmem:[#allocation16 + $0x188] sm:$0xff] %v3308_v6 }
 0x3ec   :  { %4053 = vmatprep.mubr.msk.bf16.mxu1 %vm1796_vm1, %v1765_v50 }
 0x3ed   :  { %4054 = vmatmul.mubr.msk.bf16.gmra.mxu1 %vm1796_vm1, %v1766_v51  ;;  %v4214_v51 = vld [vmem:[#allocation14 + $0x50] ss:$8 sps:$4 sm:$0xff]  }
 0x3f1   :  { %v3991_v52 = vpop.f32.mrf.mxu1 }
 0x3f2   :  { %v1703_v54 = vadd.f32 %v3991_v52, %v5348_v46  ;;  %v4216_v52 = vld [vmem:[#allocation14 + $0x54] ss:$8 sps:$4 sm:$0xff]  }
 0x3f3   :  { %v1694_v55 = vpop.f32.mrf.mxu1  ;;  %2910 = vmatprep.subr.bf16.mxu1 %v4216_v52 }
 0x3f4   :  { %v3313_v56 = vsel %vm1796_vm1, %v1703_v54, 0.0  ;;  %v1695_v57 = vadd.f32 %v5348_v46, %v1694_v55  ;;  %2911 = vmatpush1.bf16.msra.mxu1 %v4214_v51 }
 0x3f5   :  { %3377 = vst [vmem:[#allocation16 + $0x1b0] sm:$0xff] %v3313_v56  ;;  %v3992_v58 = vpop.f32.mrf.mxu1 }
 0x3f6   :  { %v3311_v59 = vsel %vm1796_vm1, %v1695_v57, 0.0  ;;  %v1706_v60 = vadd.f32 %v3992_v58, %v5348_v46 }
 0x3f7   :  { %3375 = vst [vmem:[#allocation16 + $0x1a0] sm:$0xff] %v3311_v59  ;;  %v1697_v61 = vpop.f32.mrf.mxu1 }
 0x3f8   :  { %v3314_v62 = vsel %vm1796_vm1, %v1706_v60, 0.0  ;;  %v1698_v63 = vadd.f32 %v5348_v46, %v1697_v61  ;;  %v1768_v3 = vpack.c.bf16 %v1706_v60, %v1703_v54 }
 0x3f9   :  { %3378 = vst [vmem:[#allocation16 + $0x1b8] sm:$0xff] %v3314_v62 }
 0x3fa   :  { %v1767_v1 = vpack.c.bf16 %v1698_v63, %v1695_v57  ;;  %v3312_v2 = vsel %vm1796_vm1, %v1698_v63, 0.0 }
 0x3fb   :  { %3376 = vst [vmem:[#allocation16 + $0x1a8] sm:$0xff] %v3312_v2 }
 0x3fc   :  { %4057 = vmatprep.mubr.msk.bf16.mxu1 %vm1796_vm1, %v1767_v1 }
 0x3fd   :  { %4058 = vmatmul.mubr.msk.bf16.gmra.mxu1 %vm1796_vm1, %v1768_v3 }
 0x401   :  { %v3995_v4 = vpop.f32.mrf.mxu1 }
 0x402   :  { %v1719_v5 = vadd.f32 %v3995_v4, %v5348_v46 }
 0x403   :  { %v1710_v32 = vpop.f32.mrf.mxu1 }
 0x404   :  { %v3317_v7 = vsel %vm1796_vm1, %v1719_v5, 0.0  ;;  %v1711_v8 = vadd.f32 %v5348_v46, %v1710_v32 }
 0x405   :  { %3381 = vst [vmem:[#allocation16 + $0x1d0] sm:$0xff] %v3317_v7  ;;  %v3996_v9 = vpop.f32.mrf.mxu1 }
 0x406   :  { %v3315_v10 = vsel %vm1796_vm1, %v1711_v8, 0.0  ;;  %v1722_v11 = vadd.f32 %v3996_v9, %v5348_v46 }
 0x407   :  { %3379 = vst [vmem:[#allocation16 + $0x1c0] sm:$0xff] %v3315_v10  ;;  %v1713_v12 = vpop.f32.mrf.mxu1 }
 0x408   :  { %v3318_v14 = vsel %vm1796_vm1, %v1722_v11, 0.0  ;;  %v1714_v15 = vadd.f32 %v5348_v46, %v1713_v12  ;;  %v1770_v18 = vpack.c.bf16 %v1722_v11, %v1719_v5 }
 0x409   :  { %3382 = vst [vmem:[#allocation16 + $0x1d8] sm:$0xff] %v3318_v14 }
 0x40a   :  { %v1769_v16 = vpack.c.bf16 %v1714_v15, %v1711_v8  ;;  %v3316_v17 = vsel %vm1796_vm1, %v1714_v15, 0.0  ;;  %v4217_v15 = vld [vmem:[#allocation14 + $0x40] ss:$8 sps:$4 sm:$0xff]  }
 0x40b   :  { %3380 = vst [vmem:[#allocation16 + $0x1c8] sm:$0xff] %v3316_v17 }
 0x40c   :  { %4061 = vmatprep.mubr.msk.bf16.mxu1 %vm1796_vm1, %v1769_v16  ;;  %v4219_v16 = vld [vmem:[#allocation14 + $0x44] ss:$8 sps:$4 sm:$0xff]  }
 0x40d   :  { %4062 = vmatmul.mubr.msk.bf16.gmra.mxu1 %vm1796_vm1, %v1770_v18  ;;  %2912 = vmatprep.subr.bf16.mxu1 %v4219_v16 }
 0x40e   :  { %2913 = vmatpush1.bf16.msra.mxu1 %v4217_v15 }
 0x411   :  { %v3999_v19 = vpop.f32.mrf.mxu1 }
 0x412   :  { %v1735_v20 = vadd.f32 %v3999_v19, %v5348_v46 }
 0x413   :  { %v1726_v21 = vpop.f32.mrf.mxu1 }
 0x414   :  { %v3321_v22 = vsel %vm1796_vm1, %v1735_v20, 0.0  ;;  %v1727_v23 = vadd.f32 %v5348_v46, %v1726_v21 }
 0x415   :  { %3385 = vst [vmem:[#allocation16 + $0x1f0] sm:$0xff] %v3321_v22  ;;  %v4000_v24 = vpop.f32.mrf.mxu1 }
 0x416   :  { %v3319_v25 = vsel %vm1796_vm1, %v1727_v23, 0.0  ;;  %v1738_v26 = vadd.f32 %v4000_v24, %v5348_v46 }
 0x417   :  { %3383 = vst [vmem:[#allocation16 + $0x1e0] sm:$0xff] %v3319_v25  ;;  %v1729_v27 = vpop.f32.mrf.mxu1 }
 0x418   :  { %v3322_v30 = vsel %vm1796_vm1, %v1738_v26, 0.0  ;;  %v1730_v31 = vadd.f32 %v5348_v46, %v1729_v27  ;;  %v1772_v36 = vpack.c.bf16 %v1738_v26, %v1735_v20 }
 0x419   :  { %3386 = vst [vmem:[#allocation16 + $0x1f8] sm:$0xff] %v3322_v30  ;;  %v4007_v33 = vpop.f32.mrf.mxu1 }
 0x41a   :  { %v1771_v34 = vpack.c.bf16 %v1730_v31, %v1727_v23  ;;  %v3320_v35 = vsel %vm1796_vm1, %v1730_v31, 0.0  ;;  %v1936_v41 = vadd.f32 %v4007_v33, %v5527_v37 }
 0x41b   :  { %3384 = vst [vmem:[#allocation16 + $0x1e8] sm:$0xff] %v3320_v35  ;;  %v1927_v38 = vpop.f32.mrf.mxu1 }
 0x41c   :  { %v1928_v39 = vadd.f32 %v5527_v37, %v1927_v38  ;;  %4065 = vmatprep.mubr.msk.bf16.mxu1 %vm1796_vm1, %v1771_v34 }
 0x41d   :  { %v4008_v40 = vpop.f32.mrf.mxu1  ;;  %4066 = vmatmul.mubr.msk.bf16.gmra.mxu1 %vm1796_vm1, %v1772_v36 }
 0x41e   :  { %v1939_v46 = vadd.f32 %v4008_v40, %v5527_v37  ;;  %2938 = vmatprep.mubr.bf16.mxu1 %v4972_v0  ;;  %4488 = vtanh.f32 %v1928_v39 }
 0x41f   :  { %v1930_v42 = vpop.f32.mrf.mxu1 }
 0x420   :  { %v1931_v43 = vadd.f32 %v5527_v37, %v1930_v42  ;;  %4490 = vtanh.f32 %v1939_v46 }
 0x421   :  { %v4011_v44 = vpop.f32.mrf.mxu1 }
 0x422   :  { %4492 = vtanh.f32 %v1931_v43  ;;  %v1952_v50 = vadd.f32 %v4011_v44, %v5527_v37 }
 0x423   :  { %4494 = vtanh.f32 %v1936_v41  ;;  %v1943_v45 = vpop.f32.mrf.mxu1 }
 0x424   :  { %v1944_v47 = vadd.f32 %v5527_v37, %v1943_v45 }
 0x425   :  { %v4012_v48 = vpop.f32.mrf.mxu1 }
 0x426   :  { %v1955_v49 = vadd.f32 %v4012_v48, %v5527_v37  ;;  %4496 = vtanh.f32 %v1944_v47  ;;  %v4220_v47 = vld [vmem:[#allocation14 + $0x30] ss:$8 sps:$4 sm:$0xff]   ;;  %v4222_v48 = vld [vmem:[#allocation14 + $0x34] ss:$8 sps:$4 sm:$0xff]  }
 0x427   :  { %v1946_v6 = vpop.f32.mrf.mxu1  ;;  %2914 = vmatprep.subr.bf16.mxu1 %v4222_v48 }
 0x428   :  { %v1947_v54 = vadd.f32 %v5527_v37, %v1946_v6  ;;  %4498 = vtanh.f32 %v1955_v49  ;;  %2915 = vmatpush1.bf16.msra.mxu1 %v4220_v47 }
 0x429   :  { %v4015_v55 = vpop.f32.mrf.mxu1 }
 0x42a   :  { %4500 = vtanh.f32 %v1947_v54  ;;  %v1968_v63 = vadd.f32 %v4015_v55, %v5527_v37 }
 0x42b   :  { %4502 = vtanh.f32 %v1952_v50  ;;  %v1959_v56 = vpop.f32.mrf.mxu1  ;;  %v4489_v58 = vpop.eup %4488 }
 0x42c   :  { %v1960_v57 = vadd.f32 %v5527_v37, %v1959_v56 }
 0x42d   :  { %v4016_v59 = vpop.f32.mrf.mxu1  ;;  %v4491_v60 = vpop.eup %4490 }
 0x42e   :  { %v1971_v61 = vadd.f32 %v4016_v59, %v5527_v37  ;;  %4504 = vtanh.f32 %v1960_v57 }
 0x42f   :  { %v4493_v62 = vpop.eup %4492  ;;  %v1962_v1 = vpop.f32.mrf.mxu1 }
 0x430   :  { %v4495_v2 = vpop.eup %4494  ;;  %v1963_v3 = vadd.f32 %v5527_v37, %v1962_v1  ;;  %v2246_v4 = vpack.c.bf16 %v4493_v62, %v4489_v58  ;;  %4506 = vtanh.f32 %v1971_v61 }
 0x431   :  { %v2247_v5 = vpack.c.bf16 %v4491_v60, %v4495_v2  ;;  %v4019_v32 = vpop.f32.mrf.mxu1 }
 0x432   :  { %4508 = vtanh.f32 %v1963_v3  ;;  %4077 = vmatprep.mubr.msk.bf16.mxu0 %vm1355_vm0, %v2246_v4  ;;  %v1984_v13 = vadd.f32 %v4019_v32, %v5527_v37 }
 0x433   :  { %4510 = vtanh.f32 %v1968_v63  ;;  %v1975_v7 = vpop.f32.mrf.mxu1  ;;  %4078 = vmatmul.mubr.msk.bf16.vlgmr.msra.gmra.mxu0 %vm1355_vm0, %v2247_v5  ;;  %v4497_v9 = vpop.eup %4496 }
 0x434   :  { %v1976_v8 = vadd.f32 %v5527_v37, %v1975_v7  ;;  %v4223_v7 = vld [vmem:[#allocation14 + $0x20] ss:$8 sps:$4 sm:$0xff]  }
 0x435   :  { %v4020_v10 = vpop.f32.mrf.mxu1  ;;  %v4499_v11 = vpop.eup %4498 }
 0x436   :  { %v1987_v12 = vadd.f32 %v4020_v10, %v5527_v37  ;;  %4512 = vtanh.f32 %v1976_v8  ;;  %v4225_v8 = vld [vmem:[#allocation14 + $0x24] ss:$8 sps:$4 sm:$0xff]  }
 0x437   :  { %v4501_v53 = vpop.eup %4500  ;;  %v1978_v14 = vpop.f32.mrf.mxu1  ;;  %2916 = vmatprep.subr.bf16.mxu1 %v4225_v8 }
 0x438   :  { %v4503_v17 = vpop.eup %4502  ;;  %v1979_v18 = vadd.f32 %v5527_v37, %v1978_v14  ;;  %v2248_v19 = vpack.c.bf16 %v4501_v53, %v4497_v9  ;;  %4514 = vtanh.f32 %v1987_v12  ;;  %2917 = vmatpush1.bf16.msra.mxu1 %v4223_v7 }
 0x439   :  { %v4023_v20 = vpop.f32.mrf.mxu1  ;;  %v2249_v21 = vpack.c.bf16 %v4499_v11, %v4503_v17 }
 0x43a   :  { %4516 = vtanh.f32 %v1979_v18  ;;  %4081 = vmatprep.mubr.msk.bf16.mxu0 %vm1355_vm0, %v2248_v19  ;;  %v2000_v29 = vadd.f32 %v4023_v20, %v5527_v37 }
 0x43b   :  { %4518 = vtanh.f32 %v1984_v13  ;;  %v1991_v22 = vpop.f32.mrf.mxu1  ;;  %4082 = vmatmul.mubr.msk.bf16.gmra.mxu0 %vm1355_vm0, %v2249_v21  ;;  %v4505_v24 = vpop.eup %4504 }
 0x43c   :  { %v1992_v23 = vadd.f32 %v5527_v37, %v1991_v22 }
 0x43d   :  { %v4024_v25 = vpop.f32.mrf.mxu1  ;;  %v4507_v26 = vpop.eup %4506 }
 0x43e   :  { %v2003_v27 = vadd.f32 %v4024_v25, %v5527_v37  ;;  %4520 = vtanh.f32 %v1992_v23  ;;  %v4226_v25 = vld [vmem:[#allocation14 + $0x10] ss:$8 sps:$4 sm:$0xff]  }
 0x43f   :  { %v4509_v28 = vpop.eup %4508  ;;  %v1994_v30 = vpop.f32.mrf.mxu1 }
 0x440   :  { %v4511_v31 = vpop.eup %4510  ;;  %v1995_v33 = vadd.f32 %v5527_v37, %v1994_v30  ;;  %v2250_v34 = vpack.c.bf16 %v4509_v28, %v4505_v24  ;;  %4522 = vtanh.f32 %v2003_v27 }
 0x441   :  { %v4027_v35 = vpop.f32.mrf.mxu1  ;;  %v2251_v36 = vpack.c.bf16 %v4507_v26, %v4511_v31  ;;  %v4228_v26 = vld [vmem:[#allocation14 + $0x14] ss:$8 sps:$4 sm:$0xff]  }
 0x442   :  { %4524 = vtanh.f32 %v1995_v33  ;;  %4085 = vmatprep.mubr.msk.bf16.mxu0 %vm1355_vm0, %v2250_v34  ;;  %v2016_v44 = vadd.f32 %v4027_v35, %v5527_v37  ;;  %2918 = vmatprep.subr.bf16.mxu1 %v4228_v26 }
 0x443   :  { %4526 = vtanh.f32 %v2000_v29  ;;  %v2007_v38 = vpop.f32.mrf.mxu1  ;;  %4086 = vmatmul.mubr.msk.bf16.gmra.mxu0 %vm1355_vm0, %v2251_v36  ;;  %v4513_v40 = vpop.eup %4512  ;;  %2919 = vmatpush1.bf16.msra.mxu1 %v4226_v25 }
 0x444   :  { %v2008_v39 = vadd.f32 %v5527_v37, %v2007_v38 }
 0x445   :  { %v4028_v46 = vpop.f32.mrf.mxu1  ;;  %v4515_v41 = vpop.eup %4514 }
 0x446   :  { %v2019_v42 = vadd.f32 %v4028_v46, %v5527_v37  ;;  %4528 = vtanh.f32 %v2008_v39 }
 0x447   :  { %v4517_v43 = vpop.eup %4516  ;;  %v2010_v45 = vpop.f32.mrf.mxu1 }
 0x448   :  { %v4519_v49 = vpop.eup %4518  ;;  %v2011_v50 = vadd.f32 %v5527_v37, %v2010_v45  ;;  %v2252_v6 = vpack.c.bf16 %v4517_v43, %v4513_v40  ;;  %4530 = vtanh.f32 %v2019_v42 }
 0x449   :  { %v2253_v51 = vpack.c.bf16 %v4515_v41, %v4519_v49 }
 0x44a   :  { %4532 = vtanh.f32 %v2011_v50  ;;  %4089 = vmatprep.mubr.msk.bf16.mxu0 %vm1355_vm0, %v2252_v6 }
 0x44b   :  { %4534 = vtanh.f32 %v2016_v44  ;;  %4090 = vmatmul.mubr.msk.bf16.gmra.mxu0 %vm1355_vm0, %v2253_v51  ;;  %v4521_v52 = vpop.eup %4520 }
 0x44d   :  { %v4031_v54 = vpop.f32.mrf.mxu1  ;;  %v4523_v55 = vpop.eup %4522 }
 0x44e   :  { %v2032_v1 = vadd.f32 %v4031_v54, %v5527_v37 }
 0x44f   :  { %v4525_v56 = vpop.eup %4524  ;;  %v2023_v57 = vpop.f32.mrf.mxu1 }
 0x450   :  { %v4527_v58 = vpop.eup %4526  ;;  %v2024_v59 = vadd.f32 %v5527_v37, %v2023_v57  ;;  %v2254_v60 = vpack.c.bf16 %v4525_v56, %v4521_v52  ;;  %v4231_v57 = vld [vmem:[#allocation14 + $0x4] ss:$8 sps:$4 sm:$0xff]  }
 0x451   :  { %v4032_v61 = vpop.f32.mrf.mxu1  ;;  %v2255_v62 = vpack.c.bf16 %v4523_v55, %v4527_v58  ;;  %v4229_v58 = vld [vmem:[#allocation14] ss:$8 sps:$4 sm:$0xff]   ;;  %2920 = vmatprep.subr.bf16.mxu1 %v4231_v57 }
 0x452   :  { %v2035_v63 = vadd.f32 %v4032_v61, %v5527_v37  ;;  %4093 = vmatprep.mubr.msk.bf16.mxu0 %vm1355_vm0, %v2254_v60  ;;  %4536 = vtanh.f32 %v2024_v59  ;;  %2921 = vmatpush1.bf16.msra.mxu1 %v4229_v58 }
 0x453   :  { %v2026_v2 = vpop.f32.mrf.mxu1  ;;  %4094 = vmatmul.mubr.msk.bf16.gmra.mxu0 %vm1355_vm0, %v2255_v62  ;;  %v4529_v4 = vpop.eup %4528 }
 0x454   :  { %v2027_v3 = vadd.f32 %v5527_v37, %v2026_v2  ;;  %4538 = vtanh.f32 %v2035_v63 }
 0x455   :  { %v4531_v5 = vpop.eup %4530 }
 0x456   :  { %4540 = vtanh.f32 %v2027_v3 }
 0x457   :  { %v4533_v32 = vpop.eup %4532  ;;  %4542 = vtanh.f32 %v2032_v1 }
 0x458   :  { %v4535_v9 = vpop.eup %4534  ;;  %v2256_v10 = vpack.c.bf16 %v4533_v32, %v4529_v4 }
 0x459   :  { %v2257_v11 = vpack.c.bf16 %v4531_v5, %v4535_v9 }
 0x45a   :  { %4097 = vmatprep.mubr.msk.bf16.mxu0 %vm1355_vm0, %v2256_v10 }
 0x45b   :  { %4098 = vmatmul.mubr.msk.bf16.gmra.mxu0 %vm1355_vm0, %v2257_v11 }
 0x45d   :  { %v4035_v12 = vpop.f32.mrf.mxu1 }
 0x45e   :  { %v2048_v19 = vadd.f32 %v4035_v12, %v5527_v37 }
 0x45f   :  { %v2039_v53 = vpop.f32.mrf.mxu1  ;;  %v4537_v14 = vpop.eup %4536 }
 0x460   :  { %v2040_v13 = vadd.f32 %v5527_v37, %v2039_v53 }
 0x461   :  { %v4036_v15 = vpop.f32.mrf.mxu1  ;;  %v4539_v16 = vpop.eup %4538 }
 0x462   :  { %v2051_v17 = vadd.f32 %v4036_v15, %v5527_v37  ;;  %4544 = vtanh.f32 %v2040_v13 }
 0x463   :  { %v4541_v18 = vpop.eup %4540  ;;  %v2042_v20 = vpop.f32.mrf.mxu1 }
 0x464   :  { %v4543_v21 = vpop.eup %4542  ;;  %v2043_v22 = vadd.f32 %v5527_v37, %v2042_v20  ;;  %v2258_v23 = vpack.c.bf16 %v4541_v18, %v4537_v14  ;;  %4546 = vtanh.f32 %v2051_v17 }
 0x465   :  { %v2259_v24 = vpack.c.bf16 %v4539_v16, %v4543_v21 }
 0x466   :  { %4548 = vtanh.f32 %v2043_v22  ;;  %4101 = vmatprep.mubr.msk.bf16.mxu0 %vm1355_vm0, %v2258_v23 }
 0x467   :  { %4550 = vtanh.f32 %v2048_v19  ;;  %4102 = vmatmul.mubr.msk.bf16.gmra.mxu0 %vm1355_vm0, %v2259_v24 }
 0x46d   :  { %v4039_v27 = vpop.f32.mrf.mxu1 }
 0x46e   :  { %v2064_v36 = vadd.f32 %v4039_v27, %v5527_v37 }
 0x46f   :  { %v2055_v28 = vpop.f32.mrf.mxu1  ;;  %v4545_v30 = vpop.eup %4544 }
 0x470   :  { %v2056_v29 = vadd.f32 %v5527_v37, %v2055_v28 }
 0x471   :  { %v4040_v31 = vpop.f32.mrf.mxu1  ;;  %v4547_v33 = vpop.eup %4546 }
 0x472   :  { %v2067_v34 = vadd.f32 %v4040_v31, %v5527_v37  ;;  %4552 = vtanh.f32 %v2056_v29 }
 0x473   :  { %v4549_v35 = vpop.eup %4548  ;;  %v2058_v38 = vpop.f32.mrf.mxu1 }
 0x474   :  { %v4551_v39 = vpop.eup %4550  ;;  %v2059_v40 = vadd.f32 %v5527_v37, %v2058_v38  ;;  %v2260_v46 = vpack.c.bf16 %v4549_v35, %v4545_v30  ;;  %4554 = vtanh.f32 %v2067_v34 }
 0x475   :  { %v2261_v41 = vpack.c.bf16 %v4547_v33, %v4551_v39 }
 0x476   :  { %4556 = vtanh.f32 %v2059_v40  ;;  %4105 = vmatprep.mubr.msk.bf16.mxu0 %vm1355_vm0, %v2260_v46 }
 0x477   :  { %4558 = vtanh.f32 %v2064_v36  ;;  %4106 = vmatmul.mubr.msk.bf16.gmra.mxu0 %vm1355_vm0, %v2261_v41 }
 0x47d   :  { %v4043_v42 = vpop.f32.mrf.mxu1 }
 0x47e   :  { %v2080_v6 = vadd.f32 %v4043_v42, %v5527_v37 }
 0x47f   :  { %v2071_v43 = vpop.f32.mrf.mxu1  ;;  %v4553_v45 = vpop.eup %4552 }
 0x480   :  { %v2072_v44 = vadd.f32 %v5527_v37, %v2071_v43 }
 0x481   :  { %v4044_v47 = vpop.f32.mrf.mxu1  ;;  %v4555_v48 = vpop.eup %4554 }
 0x482   :  { %v2083_v49 = vadd.f32 %v4044_v47, %v5527_v37  ;;  %4560 = vtanh.f32 %v2072_v44 }
 0x483   :  { %v4557_v50 = vpop.eup %4556  ;;  %v2074_v51 = vpop.f32.mrf.mxu1 }
 0x484   :  { %v4559_v52 = vpop.eup %4558  ;;  %v2075_v54 = vadd.f32 %v5527_v37, %v2074_v51  ;;  %v2262_v55 = vpack.c.bf16 %v4557_v50, %v4553_v45  ;;  %4562 = vtanh.f32 %v2083_v49 }
 0x485   :  { %v2263_v56 = vpack.c.bf16 %v4555_v48, %v4559_v52 }
 0x486   :  { %4564 = vtanh.f32 %v2075_v54  ;;  %4109 = vmatprep.mubr.msk.bf16.mxu0 %vm1355_vm0, %v2262_v55 }
 0x487   :  { %4566 = vtanh.f32 %v2080_v6  ;;  %4110 = vmatmul.mubr.msk.bf16.gmra.mxu0 %vm1355_vm0, %v2263_v56 }
 0x48d   :  { %v4047_v59 = vpop.f32.mrf.mxu1 }
 0x48e   :  { %v2096_v4 = vadd.f32 %v4047_v59, %v5527_v37 }
 0x48f   :  { %v2087_v60 = vpop.f32.mrf.mxu1  ;;  %v4561_v62 = vpop.eup %4560 }
 0x490   :  { %v2088_v61 = vadd.f32 %v5527_v37, %v2087_v60 }
 0x491   :  { %v4048_v63 = vpop.f32.mrf.mxu1  ;;  %v4563_v1 = vpop.eup %4562 }
 0x492   :  { %v2099_v2 = vadd.f32 %v4048_v63, %v5527_v37  ;;  %4568 = vtanh.f32 %v2088_v61 }
 0x493   :  { %v4565_v3 = vpop.eup %4564  ;;  %v2090_v5 = vpop.f32.mrf.mxu1 }
 0x494   :  { %v4567_v32 = vpop.eup %4566  ;;  %v2091_v7 = vadd.f32 %v5527_v37, %v2090_v5  ;;  %v2264_v8 = vpack.c.bf16 %v4565_v3, %v4561_v62  ;;  %4570 = vtanh.f32 %v2099_v2 }
 0x495   :  { %v2265_v9 = vpack.c.bf16 %v4563_v1, %v4567_v32 }
 0x496   :  { %4572 = vtanh.f32 %v2091_v7  ;;  %4113 = vmatprep.mubr.msk.bf16.mxu0 %vm1355_vm0, %v2264_v8 }
 0x497   :  { %4574 = vtanh.f32 %v2096_v4  ;;  %4114 = vmatmul.mubr.msk.bf16.gmra.mxu0 %vm1355_vm0, %v2265_v9 }
 0x49d   :  { %v4051_v10 = vpop.f32.mrf.mxu1 }
 0x49e   :  { %v2112_v17 = vadd.f32 %v4051_v10, %v5527_v37 }
 0x49f   :  { %v2103_v11 = vpop.f32.mrf.mxu1  ;;  %v4569_v53 = vpop.eup %4568 }
 0x4a0   :  { %v2104_v12 = vadd.f32 %v5527_v37, %v2103_v11 }
 0x4a1   :  { %v4052_v13 = vpop.f32.mrf.mxu1  ;;  %v4571_v14 = vpop.eup %4570 }
 0x4a2   :  { %v2115_v15 = vadd.f32 %v4052_v13, %v5527_v37  ;;  %4576 = vtanh.f32 %v2104_v12 }
 0x4a3   :  { %v4573_v16 = vpop.eup %4572  ;;  %v2106_v18 = vpop.f32.mrf.mxu1 }
 0x4a4   :  { %v4575_v19 = vpop.eup %4574  ;;  %v2107_v20 = vadd.f32 %v5527_v37, %v2106_v18  ;;  %v2266_v21 = vpack.c.bf16 %v4573_v16, %v4569_v53  ;;  %4578 = vtanh.f32 %v2115_v15 }
 0x4a5   :  { %v2267_v22 = vpack.c.bf16 %v4571_v14, %v4575_v19 }
 0x4a6   :  { %4580 = vtanh.f32 %v2107_v20  ;;  %4117 = vmatprep.mubr.msk.bf16.mxu0 %vm1355_vm0, %v2266_v21 }
 0x4a7   :  { %4582 = vtanh.f32 %v2112_v17  ;;  %4118 = vmatmul.mubr.msk.bf16.gmra.mxu0 %vm1355_vm0, %v2267_v22 }
 0x4ad   :  { %v4055_v23 = vpop.f32.mrf.mxu1 }
 0x4ae   :  { %v2128_v31 = vadd.f32 %v4055_v23, %v5527_v37 }
 0x4af   :  { %v2119_v24 = vpop.f32.mrf.mxu1  ;;  %v4577_v26 = vpop.eup %4576 }
 0x4b0   :  { %v2120_v25 = vadd.f32 %v5527_v37, %v2119_v24 }
 0x4b1   :  { %v4056_v27 = vpop.f32.mrf.mxu1  ;;  %v4579_v28 = vpop.eup %4578 }
 0x4b2   :  { %v2131_v29 = vadd.f32 %v4056_v27, %v5527_v37  ;;  %4584 = vtanh.f32 %v2120_v25  ;;  %v5626_v25 = vld [vmem:[#allocation13] ss:$0 sm:$0xff] }
 0x4b3   :  { %v4581_v30 = vpop.eup %4580  ;;  %v2122_v33 = vpop.f32.mrf.mxu1 }
 0x4b4   :  { %v4583_v34 = vpop.eup %4582  ;;  %v2123_v35 = vadd.f32 %v5527_v37, %v2122_v33  ;;  %v2268_v36 = vpack.c.bf16 %v4581_v30, %v4577_v26  ;;  %4586 = vtanh.f32 %v2131_v29 }
 0x4b5   :  { %v2269_v38 = vpack.c.bf16 %v4579_v28, %v4583_v34 }
 0x4b6   :  { %4588 = vtanh.f32 %v2123_v35  ;;  %4121 = vmatprep.mubr.msk.bf16.mxu0 %vm1355_vm0, %v2268_v36 }
 0x4b7   :  { %4590 = vtanh.f32 %v2128_v31  ;;  %4122 = vmatmul.mubr.msk.bf16.gmra.mxu0 %vm1355_vm0, %v2269_v38 }
 0x4bd   :  { %v4059_v39 = vpop.f32.mrf.mxu1 }
 0x4be   :  { %v2144_v47 = vadd.f32 %v4059_v39, %v5527_v37 }
 0x4bf   :  { %v2135_v40 = vpop.f32.mrf.mxu1  ;;  %v4585_v41 = vpop.eup %4584 }
 0x4c0   :  { %v2136_v46 = vadd.f32 %v5527_v37, %v2135_v40 }
 0x4c1   :  { %v4060_v42 = vpop.f32.mrf.mxu1  ;;  %v4587_v43 = vpop.eup %4586 }
 0x4c2   :  { %v2147_v44 = vadd.f32 %v4060_v42, %v5527_v37  ;;  %4592 = vtanh.f32 %v2136_v46 }
 0x4c3   :  { %v4589_v45 = vpop.eup %4588  ;;  %v2138_v48 = vpop.f32.mrf.mxu1 }
 0x4c4   :  { %v4591_v49 = vpop.eup %4590  ;;  %v2139_v50 = vadd.f32 %v5527_v37, %v2138_v48  ;;  %v2270_v6 = vpack.c.bf16 %v4589_v45, %v4585_v41  ;;  %4594 = vtanh.f32 %v2147_v44 }
 0x4c5   :  { %v2271_v51 = vpack.c.bf16 %v4587_v43, %v4591_v49 }
 0x4c6   :  { %4596 = vtanh.f32 %v2139_v50  ;;  %4125 = vmatprep.mubr.msk.bf16.mxu0 %vm1355_vm0, %v2270_v6 }
 0x4c7   :  { %4598 = vtanh.f32 %v2144_v47  ;;  %4126 = vmatmul.mubr.msk.bf16.gmra.mxu0 %vm1355_vm0, %v2271_v51 }
 0x4cd   :  { %v4063_v52 = vpop.f32.mrf.mxu1 }
 0x4ce   :  { %v2160_v61 = vadd.f32 %v4063_v52, %v5527_v37 }
 0x4cf   :  { %v2151_v54 = vpop.f32.mrf.mxu1  ;;  %v4593_v56 = vpop.eup %4592 }
 0x4d0   :  { %v2152_v55 = vadd.f32 %v5527_v37, %v2151_v54 }
 0x4d1   :  { %v4064_v57 = vpop.f32.mrf.mxu1  ;;  %v4595_v58 = vpop.eup %4594 }
 0x4d2   :  { %v2163_v59 = vadd.f32 %v4064_v57, %v5527_v37  ;;  %4600 = vtanh.f32 %v2152_v55 }
 0x4d3   :  { %v4597_v60 = vpop.eup %4596  ;;  %v2154_v62 = vpop.f32.mrf.mxu1 }
 0x4d4   :  { %v4599_v63 = vpop.eup %4598  ;;  %v2155_v1 = vadd.f32 %v5527_v37, %v2154_v62  ;;  %v2272_v2 = vpack.c.bf16 %v4597_v60, %v4593_v56  ;;  %4602 = vtanh.f32 %v2163_v59 }
 0x4d5   :  { %v2273_v3 = vpack.c.bf16 %v4595_v58, %v4599_v63 }
 0x4d6   :  { %4604 = vtanh.f32 %v2155_v1  ;;  %4129 = vmatprep.mubr.msk.bf16.mxu0 %vm1355_vm0, %v2272_v2 }
 0x4d7   :  { %4606 = vtanh.f32 %v2160_v61  ;;  %4130 = vmatmul.mubr.msk.bf16.gmra.mxu0 %vm1355_vm0, %v2273_v3 }
 0x4dd   :  { %v4067_v4 = vpop.f32.mrf.mxu1 }
 0x4de   :  { %v2176_v12 = vadd.f32 %v4067_v4, %v5527_v37 }
 0x4df   :  { %v2167_v5 = vpop.f32.mrf.mxu1  ;;  %v4601_v7 = vpop.eup %4600 }
 0x4e0   :  { %v2168_v32 = vadd.f32 %v5527_v37, %v2167_v5 }
 0x4e1   :  { %v4068_v8 = vpop.f32.mrf.mxu1  ;;  %v4603_v9 = vpop.eup %4602 }
 0x4e2   :  { %v2179_v10 = vadd.f32 %v4068_v8, %v5527_v37  ;;  %4608 = vtanh.f32 %v2168_v32 }
 0x4e3   :  { %v4605_v11 = vpop.eup %4604  ;;  %v2170_v53 = vpop.f32.mrf.mxu1 }
 0x4e4   :  { %v4607_v13 = vpop.eup %4606  ;;  %v2171_v14 = vadd.f32 %v5527_v37, %v2170_v53  ;;  %v2274_v15 = vpack.c.bf16 %v4605_v11, %v4601_v7  ;;  %4610 = vtanh.f32 %v2179_v10 }
 0x4e5   :  { %v2275_v16 = vpack.c.bf16 %v4603_v9, %v4607_v13 }
 0x4e6   :  { %4612 = vtanh.f32 %v2171_v14  ;;  %4133 = vmatprep.mubr.msk.bf16.mxu0 %vm1355_vm0, %v2274_v15 }
 0x4e7   :  { %4614 = vtanh.f32 %v2176_v12  ;;  %4134 = vmatmul.mubr.msk.bf16.gmra.mxu0 %vm1355_vm0, %v2275_v16 }
 0x4ef   :  { %v4609_v17 = vpop.eup %4608 }
 0x4f1   :  { %v4611_v18 = vpop.eup %4610 }
 0x4f3   :  { %v4613_v19 = vpop.eup %4612  ;;  %v4079_v20 = vpop.f32.mrf.mxu0 }
 0x4f4   :  { %v4615_v21 = vpop.eup %4614  ;;  %v2276_v22 = vpack.c.bf16 %v4613_v19, %v4609_v17  ;;  %v2456_v34 = vadd.f32 %v4079_v20, %v5626_v25 }
 0x4f5   :  { %v2447_v23 = vpop.f32.mrf.mxu0  ;;  %v2277_v24 = vpack.c.bf16 %v4611_v18, %v4615_v21 }
 0x4f6   :  { %4137 = vmatprep.mubr.msk.bf16.mxu0 %vm1355_vm0, %v2276_v22  ;;  %v2448_v37 = vadd.f32 %v5626_v25, %v2447_v23 }
 0x4f7   :  { %v4080_v26 = vpop.f32.mrf.mxu0  ;;  %4138 = vmatmul.mubr.msk.bf16.gmra.mxu0 %vm1355_vm0, %v2277_v24 }
 0x4f8   :  { %4616 = vtanh.f32 %v2448_v37  ;;  %v2459_v31 = vadd.f32 %v4080_v26, %v5626_v25 }
 0x4f9   :  { %v2450_v27 = vpop.f32.mrf.mxu0 }
 0x4fa   :  { %v2451_v28 = vadd.f32 %v5626_v25, %v2450_v27 }
 0x4fb   :  { %v4083_v29 = vpop.f32.mrf.mxu0 }
 0x4fc   :  { %4618 = vtanh.f32 %v2451_v28  ;;  %v2472_v47 = vadd.f32 %v4083_v29, %v5626_v25 }
 0x4fd   :  { %v2463_v30 = vpop.f32.mrf.mxu0  ;;  %4620 = vtanh.f32 %v2459_v31 }
 0x4fe   :  { %4622 = vtanh.f32 %v2456_v34  ;;  %v2464_v40 = vadd.f32 %v5626_v25, %v2463_v30 }
 0x4ff   :  { %v4084_v33 = vpop.f32.mrf.mxu0 }
 0x500   :  { %v2475_v43 = vadd.f32 %v4084_v33, %v5626_v25 }
 0x501   :  { %v2466_v35 = vpop.f32.mrf.mxu0 }
 0x502   :  { %v2467_v36 = vadd.f32 %v5626_v25, %v2466_v35 }
 0x503   :  { %v4087_v38 = vpop.f32.mrf.mxu0 }
 0x504   :  { %4624 = vtanh.f32 %v2467_v36  ;;  %v2488_v61 = vadd.f32 %v4087_v38, %v5626_v25 }
 0x505   :  { %v4617_v39 = vpop.eup %4616  ;;  %v2479_v42 = vpop.f32.mrf.mxu0  ;;  %4626 = vtanh.f32 %v2464_v40 }
 0x506   :  { %4628 = vtanh.f32 %v2475_v43  ;;  %v2480_v54 = vadd.f32 %v5626_v25, %v2479_v42 }
 0x507   :  { %v4088_v45 = vpop.f32.mrf.mxu0  ;;  %4630 = vtanh.f32 %v2472_v47 }
 0x508   :  { %v2491_v58 = vadd.f32 %v4088_v45, %v5626_v25 }
 0x509   :  { %v4619_v46 = vpop.eup %4618  ;;  %v2482_v50 = vpop.f32.mrf.mxu0 }
 0x50a   :  { %v2766_v41 = vpack.c.bf16 %v4619_v46, %v4617_v39  ;;  %v4621_v44 = vpop.eup %4620  ;;  %v2483_v6 = vadd.f32 %v5626_v25, %v2482_v50 }
 0x50b   :  { %v4623_v48 = vpop.eup %4622  ;;  %v4091_v52 = vpop.f32.mrf.mxu0 }
 0x50c   :  { %2939 = vmatmul.mubr.bf16.vlgmr.msra.gmra.mxu1 %v2766_v41  ;;  %v2767_v49 = vpack.c.bf16 %v4621_v44, %v4623_v48  ;;  %4632 = vtanh.f32 %v2483_v6  ;;  %v2504_v12 = vadd.f32 %v4091_v52, %v5626_v25 }
 0x50d   :  { %2948 = vmatprep.mubr.bf16.mxu1 %v4972_v0  ;;  %v2495_v57 = vpop.f32.mrf.mxu0  ;;  %4634 = vtanh.f32 %v2480_v54 }
 0x50e   :  { %4636 = vtanh.f32 %v2491_v58  ;;  %v2496_v5 = vadd.f32 %v5626_v25, %v2495_v57 }
 0x50f   :  { %v4092_v60 = vpop.f32.mrf.mxu0  ;;  %4638 = vtanh.f32 %v2488_v61 }
 0x510   :  { %v2507_v9 = vadd.f32 %v4092_v60, %v5626_v25 }
 0x511   :  { %v4625_v51 = vpop.eup %4624  ;;  %v2498_v1 = vpop.f32.mrf.mxu0 }
 0x512   :  { %v4627_v55 = vpop.eup %4626  ;;  %v2499_v2 = vadd.f32 %v5626_v25, %v2498_v1 }
 0x513   :  { %v2768_v56 = vpack.c.bf16 %v4625_v51, %v4627_v55  ;;  %v4629_v59 = vpop.eup %4628  ;;  %v4095_v4 = vpop.f32.mrf.mxu0 }
 0x514   :  { %2949 = vmatmul.mubr.bf16.gmra.mxu1 %v2767_v49  ;;  %v4631_v62 = vpop.eup %4630  ;;  %4640 = vtanh.f32 %v2499_v2  ;;  %v2520_v37 = vadd.f32 %v4095_v4, %v5626_v25 }
 0x515   :  { %2958 = vmatprep.mubr.bf16.mxu1 %v4972_v0  ;;  %v2769_v63 = vpack.c.bf16 %v4629_v59, %v4631_v62  ;;  %v2511_v8 = vpop.f32.mrf.mxu0  ;;  %4642 = vtanh.f32 %v2496_v5 }
 0x516   :  { %4644 = vtanh.f32 %v2507_v9  ;;  %v2512_v18 = vadd.f32 %v5626_v25, %v2511_v8 }
 0x517   :  { %v4096_v11 = vpop.f32.mrf.mxu0  ;;  %4646 = vtanh.f32 %v2504_v12 }
 0x518   :  { %v2523_v22 = vadd.f32 %v4096_v11, %v5626_v25 }
 0x519   :  { %v4633_v3 = vpop.eup %4632  ;;  %v2514_v14 = vpop.f32.mrf.mxu0 }
 0x51a   :  { %v4635_v32 = vpop.eup %4634  ;;  %v2515_v15 = vadd.f32 %v5626_v25, %v2514_v14 }
 0x51b   :  { %v2770_v7 = vpack.c.bf16 %v4633_v3, %v4635_v32  ;;  %v4637_v10 = vpop.eup %4636  ;;  %v4099_v17 = vpop.f32.mrf.mxu0 }
 0x51c   :  { %2959 = vmatmul.mubr.bf16.gmra.mxu1 %v2768_v56  ;;  %v4639_v53 = vpop.eup %4638  ;;  %4648 = vtanh.f32 %v2515_v15  ;;  %v2536_v46 = vadd.f32 %v4099_v17, %v5626_v25 }
 0x51d   :  { %2968 = vmatprep.mubr.bf16.mxu1 %v4972_v0  ;;  %v2771_v13 = vpack.c.bf16 %v4637_v10, %v4639_v53  ;;  %v2527_v21 = vpop.f32.mrf.mxu0  ;;  %4650 = vtanh.f32 %v2512_v18 }
 0x51e   :  { %4652 = vtanh.f32 %v2523_v22  ;;  %v2528_v33 = vadd.f32 %v5626_v25, %v2527_v21 }
 0x51f   :  { %v4100_v24 = vpop.f32.mrf.mxu0  ;;  %4654 = vtanh.f32 %v2520_v37 }
 0x520   :  { %v2539_v38 = vadd.f32 %v4100_v24, %v5626_v25 }
 0x521   :  { %v4641_v16 = vpop.eup %4640  ;;  %v2530_v28 = vpop.f32.mrf.mxu0 }
 0x522   :  { %v4643_v19 = vpop.eup %4642  ;;  %v2531_v29 = vadd.f32 %v5626_v25, %v2530_v28 }
 0x523   :  { %v2772_v20 = vpack.c.bf16 %v4641_v16, %v4643_v19  ;;  %v4645_v23 = vpop.eup %4644 }
 0x524   :  { %2969 = vmatmul.mubr.bf16.gmra.mxu1 %v2769_v63  ;;  %v4647_v26 = vpop.eup %4646  ;;  %4656 = vtanh.f32 %v2531_v29 }
 0x525   :  { %2978 = vmatprep.mubr.bf16.mxu1 %v4972_v0  ;;  %v2773_v27 = vpack.c.bf16 %v4645_v23, %v4647_v26  ;;  %4658 = vtanh.f32 %v2528_v33 }
 0x526   :  { %4660 = vtanh.f32 %v2539_v38 }
 0x527   :  { %v4103_v31 = vpop.f32.mrf.mxu0  ;;  %4662 = vtanh.f32 %v2536_v46 }
 0x528   :  { %v2552_v55 = vadd.f32 %v4103_v31, %v5626_v25 }
 0x529   :  { %v4649_v30 = vpop.eup %4648  ;;  %v2543_v36 = vpop.f32.mrf.mxu0 }
 0x52a   :  { %v4651_v34 = vpop.eup %4650  ;;  %v2544_v48 = vadd.f32 %v5626_v25, %v2543_v36 }
 0x52b   :  { %v2774_v35 = vpack.c.bf16 %v4649_v30, %v4651_v34  ;;  %v4653_v39 = vpop.eup %4652  ;;  %v4104_v40 = vpop.f32.mrf.mxu0 }
 0x52c   :  { %2979 = vmatmul.mubr.bf16.gmra.mxu1 %v2770_v7  ;;  %v4655_v41 = vpop.eup %4654  ;;  %v2555_v51 = vadd.f32 %v4104_v40, %v5626_v25 }
 0x52d   :  { %2988 = vmatprep.mubr.bf16.mxu1 %v4972_v0  ;;  %v2775_v42 = vpack.c.bf16 %v4653_v39, %v4655_v41  ;;  %v2546_v43 = vpop.f32.mrf.mxu0 }
 0x52e   :  { %v2547_v44 = vadd.f32 %v5626_v25, %v2546_v43 }
 0x530   :  { %4664 = vtanh.f32 %v2547_v44 }
 0x531   :  { %v4657_v45 = vpop.eup %4656  ;;  %4666 = vtanh.f32 %v2544_v48 }
 0x532   :  { %v4659_v49 = vpop.eup %4658  ;;  %4668 = vtanh.f32 %v2555_v51 }
 0x533   :  { %v2776_v50 = vpack.c.bf16 %v4657_v45, %v4659_v49  ;;  %v4661_v52 = vpop.eup %4660  ;;  %4670 = vtanh.f32 %v2552_v55 }
 0x534   :  { %2989 = vmatmul.mubr.bf16.gmra.mxu1 %v2771_v13  ;;  %v4663_v56 = vpop.eup %4662 }
 0x535   :  { %2998 = vmatprep.mubr.bf16.mxu1 %v4972_v0  ;;  %v2777_v57 = vpack.c.bf16 %v4661_v52, %v4663_v56 }
 0x537   :  { %v4107_v47 = vpop.f32.mrf.mxu0 }
 0x538   :  { %v2568_v32 = vadd.f32 %v4107_v47, %v5626_v25 }
 0x539   :  { %v2559_v6 = vpop.f32.mrf.mxu0 }
 0x53a   :  { %v2560_v62 = vadd.f32 %v5626_v25, %v2559_v6 }
 0x53b   :  { %v4108_v54 = vpop.f32.mrf.mxu0 }
 0x53c   :  { %2999 = vmatmul.mubr.bf16.gmra.mxu1 %v2772_v20  ;;  %v2571_v3 = vadd.f32 %v4108_v54, %v5626_v25 }
 0x53d   :  { %3008 = vmatprep.mubr.bf16.mxu1 %v4972_v0  ;;  %v2562_v58 = vpop.f32.mrf.mxu0  ;;  %v4665_v60 = vpop.eup %4664 }
 0x53e   :  { %v2563_v59 = vadd.f32 %v5626_v25, %v2562_v58  ;;  %v4667_v63 = vpop.eup %4666 }
 0x53f   :  { %v2778_v1 = vpack.c.bf16 %v4665_v60, %v4667_v63  ;;  %v4669_v4 = vpop.eup %4668 }
 0x540   :  { %4672 = vtanh.f32 %v2563_v59  ;;  %v4671_v7 = vpop.eup %4670 }
 0x541   :  { %4674 = vtanh.f32 %v2560_v62  ;;  %v2779_v8 = vpack.c.bf16 %v4669_v4, %v4671_v7 }
 0x542   :  { %4676 = vtanh.f32 %v2571_v3 }
 0x543   :  { %4678 = vtanh.f32 %v2568_v32 }
 0x544   :  { %3009 = vmatmul.mubr.bf16.gmra.mxu1 %v2773_v27 }
 0x545   :  { %3018 = vmatprep.mubr.bf16.mxu1 %v4972_v0 }
 0x547   :  { %v4111_v61 = vpop.f32.mrf.mxu0 }
 0x548   :  { %v2584_v19 = vadd.f32 %v4111_v61, %v5626_v25 }
 0x549   :  { %v2575_v2 = vpop.f32.mrf.mxu0 }
 0x54a   :  { %v2576_v53 = vadd.f32 %v5626_v25, %v2575_v2 }
 0x54b   :  { %v4112_v5 = vpop.f32.mrf.mxu0 }
 0x54c   :  { %3019 = vmatmul.mubr.bf16.gmra.mxu1 %v2774_v35  ;;  %v2587_v16 = vadd.f32 %v4112_v5, %v5626_v25 }
 0x54d   :  { %3028 = vmatprep.mubr.bf16.mxu1 %v4972_v0  ;;  %v2578_v9 = vpop.f32.mrf.mxu0  ;;  %v4673_v11 = vpop.eup %4672 }
 0x54e   :  { %v2579_v10 = vadd.f32 %v5626_v25, %v2578_v9  ;;  %v4675_v13 = vpop.eup %4674 }
 0x54f   :  { %v2780_v14 = vpack.c.bf16 %v4673_v11, %v4675_v13  ;;  %v4677_v17 = vpop.eup %4676  ;;  %v2816_v11 = vlaneseq }
 0x550   :  { %4680 = vtanh.f32 %v2579_v10  ;;  %v4679_v20 = vpop.eup %4678 }
 0x551   :  { %4682 = vtanh.f32 %v2576_v53  ;;  %v2781_v21 = vpack.c.bf16 %v4677_v17, %v4679_v20 }
 0x552   :  { %4684 = vtanh.f32 %v2587_v16  ;;  %v2817_v16 = vshrl.u32 %v2816_v11, 7 }
 0x553   :  { %4686 = vtanh.f32 %v2584_v19 }
 0x554   :  { %3029 = vmatmul.mubr.bf16.gmra.mxu1 %v2775_v42  ;;  %v2818_v19 = vsub.s32 0, %v2817_v16 }
 0x555   :  { %3038 = vmatprep.mubr.bf16.mxu1 %v4972_v0 }
 0x557   :  { %v4115_v12 = vpop.f32.mrf.mxu0 }
 0x558   :  { %v2600_v34 = vadd.f32 %v4115_v12, %v5626_v25 }
 0x559   :  { %v2591_v15 = vpop.f32.mrf.mxu0 }
 0x55a   :  { %v2592_v26 = vadd.f32 %v5626_v25, %v2591_v15 }
 0x55b   :  { %v4116_v18 = vpop.f32.mrf.mxu0 }
 0x55c   :  { %3039 = vmatmul.mubr.bf16.gmra.mxu1 %v2776_v50  ;;  %v2603_v30 = vadd.f32 %v4116_v18, %v5626_v25 }
 0x55d   :  { %3048 = vmatprep.mubr.bf16.mxu1 %v4972_v0  ;;  %v2594_v22 = vpop.f32.mrf.mxu0  ;;  %v4681_v24 = vpop.eup %4680 }
 0x55e   :  { %v2595_v23 = vadd.f32 %v5626_v25, %v2594_v22  ;;  %v4683_v27 = vpop.eup %4682 }
 0x55f   :  { %v2782_v28 = vpack.c.bf16 %v4681_v24, %v4683_v27  ;;  %v4685_v31 = vpop.eup %4684  ;;  %v2822_v24 = vsub.s32 1, %v2817_v16 }
 0x560   :  { %4688 = vtanh.f32 %v2595_v23  ;;  %v4687_v35 = vpop.eup %4686 }
 0x561   :  { %4690 = vtanh.f32 %v2592_v26  ;;  %v2783_v36 = vpack.c.bf16 %v4685_v31, %v4687_v35 }
 0x562   :  { %4692 = vtanh.f32 %v2603_v30 }
 0x563   :  { %4694 = vtanh.f32 %v2600_v34 }
 0x564   :  { %3049 = vmatmul.mubr.bf16.gmra.mxu1 %v2777_v57 }
 0x565   :  { %3058 = vmatprep.mubr.bf16.mxu1 %v4972_v0 }
 0x567   :  { %v4119_v37 = vpop.f32.mrf.mxu0 }
 0x568   :  { %v2616_v49 = vadd.f32 %v4119_v37, %v5626_v25 }
 0x569   :  { %v2607_v29 = vpop.f32.mrf.mxu0 }
 0x56a   :  { %v2608_v41 = vadd.f32 %v5626_v25, %v2607_v29 }
 0x56b   :  { %v4120_v33 = vpop.f32.mrf.mxu0 }
 0x56c   :  { %3059 = vmatmul.mubr.bf16.gmra.mxu1 %v2778_v1  ;;  %v2619_v45 = vadd.f32 %v4120_v33, %v5626_v25 }
 0x56d   :  { %3068 = vmatprep.mubr.bf16.mxu1 %v4972_v0  ;;  %v2610_v38 = vpop.f32.mrf.mxu0  ;;  %v4689_v40 = vpop.eup %4688 }
 0x56e   :  { %v2611_v39 = vadd.f32 %v5626_v25, %v2610_v38  ;;  %v4691_v42 = vpop.eup %4690 }
 0x56f   :  { %v2784_v43 = vpack.c.bf16 %v4689_v40, %v4691_v42  ;;  %v4693_v47 = vpop.eup %4692 }
 0x570   :  { %4696 = vtanh.f32 %v2611_v39  ;;  %v4695_v50 = vpop.eup %4694 }
 0x571   :  { %4698 = vtanh.f32 %v2608_v41  ;;  %v2785_v6 = vpack.c.bf16 %v4693_v47, %v4695_v50 }
 0x572   :  { %4700 = vtanh.f32 %v2619_v45 }
 0x573   :  { %4702 = vtanh.f32 %v2616_v49 }
 0x574   :  { %3069 = vmatmul.mubr.bf16.gmra.mxu1 %v2779_v8 }
 0x575   :  { %3078 = vmatprep.mubr.bf16.mxu1 %v4972_v0 }
 0x577   :  { %v4123_v46 = vpop.f32.mrf.mxu0 }
 0x578   :  { %v2632_v63 = vadd.f32 %v4123_v46, %v5626_v25 }
 0x579   :  { %v2623_v44 = vpop.f32.mrf.mxu0 }
 0x57a   :  { %v2624_v56 = vadd.f32 %v5626_v25, %v2623_v44 }
 0x57b   :  { %v4124_v48 = vpop.f32.mrf.mxu0 }
 0x57c   :  { %3079 = vmatmul.mubr.bf16.gmra.mxu1 %v2780_v14  ;;  %v2635_v60 = vadd.f32 %v4124_v48, %v5626_v25 }
 0x57d   :  { %3088 = vmatprep.mubr.bf16.mxu1 %v4972_v0  ;;  %v2626_v51 = vpop.f32.mrf.mxu0  ;;  %v4697_v54 = vpop.eup %4696 }
 0x57e   :  { %v2627_v52 = vadd.f32 %v5626_v25, %v2626_v51  ;;  %v4699_v57 = vpop.eup %4698 }
 0x57f   :  { %v2786_v58 = vpack.c.bf16 %v4697_v54, %v4699_v57  ;;  %v4701_v61 = vpop.eup %4700 }
 0x580   :  { %4704 = vtanh.f32 %v2627_v52  ;;  %v4703_v1 = vpop.eup %4702 }
 0x581   :  { %4706 = vtanh.f32 %v2624_v56  ;;  %v2787_v2 = vpack.c.bf16 %v4701_v61, %v4703_v1 }
 0x582   :  { %4708 = vtanh.f32 %v2635_v60 }
 0x583   :  { %4710 = vtanh.f32 %v2632_v63 }
 0x584   :  { %3089 = vmatmul.mubr.bf16.gmra.mxu1 %v2781_v21  ;;  %v2814_v21 = vld [vmem:[%s5890_s12] sm:$0x3]  ;;  %s4973_s12 = smov [#allocation16]  }
 0x585   :  { %3098 = vmatprep.mubr.bf16.mxu1 %v4972_v0  ;;  %v5713_v27 = vrot.slane %v2814_v21, %v2818_v19  ;;  %v5715_v30 = vrot.slane %v2814_v21, %v2822_v24  ;;  %s3520_s25 = sshll.u32 %s4973_s12, 4  ;;  %s3521_s25 = int_to_ptr.vmem [resolvable:$true] %s3520_s25 }
 0x586   :  { %s4904_s26 = scalar_lea.vmem %s3521_s25, 8192  ;;  %p4909_p13 = scmp.lt.s32.totalorder %s3521_s25, %s3521_s25 }
 0x587   :  { %v4127_v55 = vpop.f32.mrf.mxu0  ;;  %p4905_p12 = scmp.ne.s32.totalorder %s3521_s25, %s4904_s26  ;;  %p4910_p0 = scmp.lt.s32.totalorder %s4904_s26, %s4904_s26 }
 0x588   :  { %v2648_v14 = vadd.f32 %v4127_v55, %v5626_v25 }
 0x589   :  { %v2639_v59 = vpop.f32.mrf.mxu0  ;;  %p4911_p1 = por %p4910_p0, %p4909_p13 }
 0x58a   :  { %v2640_v7 = vadd.f32 %v5626_v25, %v2639_v59 }
 0x58b   :  { %v4128_v62 = vpop.f32.mrf.mxu0  ;;  %p4912_p2 = pnand %p4911_p1, %p4905_p12 }
 0x58c   :  { %3099 = vmatmul.mubr.bf16.gmra.mxu1 %v2782_v28  ;;  %v2651_v12 = vadd.f32 %v4128_v62, %v5626_v25 }
 0x58d   :  { %3108 = vmatprep.mubr.bf16.mxu1 %v4972_v0  ;;  %v2642_v3 = vpop.f32.mrf.mxu0  ;;  %v4705_v5 = vpop.eup %4704 }
 0x58e   :  { %v2643_v4 = vadd.f32 %v5626_v25, %v2642_v3  ;;  %v4707_v8 = vpop.eup %4706 }
 0x58f   :  { %v2788_v9 = vpack.c.bf16 %v4705_v5, %v4707_v8  ;;  %v4709_v53 = vpop.eup %4708 }
 0x590   :  { %4712 = vtanh.f32 %v2643_v4  ;;  %v4711_v15 = vpop.eup %4710 }
 0x591   :  { %4714 = vtanh.f32 %v2640_v7  ;;  %v2789_v17 = vpack.c.bf16 %v4709_v53, %v4711_v15 }
 0x592   :  { %4716 = vtanh.f32 %v2651_v12 }
 0x593   :  { %4718 = vtanh.f32 %v2648_v14 }
 0x594   :  { %3109 = vmatmul.mubr.bf16.gmra.mxu1 %v2783_v36 }
 0x595   :  { %3118 = vmatprep.mubr.bf16.mxu1 %v4972_v0 }
 0x597   :  { %v4131_v32 = vpop.f32.mrf.mxu0 }
 0x598   :  { %v2664_v40 = vadd.f32 %v4131_v32, %v5626_v25 }
 0x599   :  { %v2655_v10 = vpop.f32.mrf.mxu0 }
 0x59a   :  { %v2656_v37 = vadd.f32 %v5626_v25, %v2655_v10 }
 0x59b   :  { %v4132_v13 = vpop.f32.mrf.mxu0 }
 0x59c   :  { %3119 = vmatmul.mubr.bf16.gmra.mxu1 %v2784_v43  ;;  %v2667_v34 = vadd.f32 %v4132_v13, %v5626_v25 }
 0x59d   :  { %3128 = vmatprep.mubr.bf16.mxu1 %v4972_v0  ;;  %v2658_v18 = vpop.f32.mrf.mxu0  ;;  %v4713_v22 = vpop.eup %4712 }
 0x59e   :  { %v2659_v20 = vadd.f32 %v5626_v25, %v2658_v18  ;;  %v4715_v26 = vpop.eup %4714 }
 0x59f   :  { %v2790_v28 = vpack.c.bf16 %v4713_v22, %v4715_v26  ;;  %v4717_v36 = vpop.eup %4716 }
 0x5a0   :  { %4720 = vtanh.f32 %v2659_v20  ;;  %v4719_v41 = vpop.eup %4718 }
 0x5a1   :  { %4722 = vtanh.f32 %v2656_v37  ;;  %v2791_v44 = vpack.c.bf16 %v4717_v36, %v4719_v41 }
 0x5a2   :  { %4724 = vtanh.f32 %v2667_v34 }
 0x5a3   :  { %4726 = vtanh.f32 %v2664_v40 }
 0x5a4   :  { %3129 = vmatmul.mubr.bf16.gmra.mxu1 %v2785_v6 }
 0x5a5   :  { %3138 = vmatprep.mubr.bf16.mxu1 %v4972_v0 }
 0x5a7   :  { %v5710_v23 = vpop.f32.mrf.mxu0 }
 0x5a8   :  { %v2680_v7 = vadd.f32 %v5710_v23, %v5626_v25 }
 0x5a9   :  { %v2671_v29 = vpop.f32.mrf.mxu0 }
 0x5aa   :  { %v2672_v55 = vadd.f32 %v5626_v25, %v2671_v29 }
 0x5ab   :  { %v4136_v38 = vpop.f32.mrf.mxu0 }
 0x5ac   :  { %3139 = vmatmul.mubr.bf16.gmra.mxu1 %v2786_v58 }
 0x5ad   :  { %3148 = vmatprep.mubr.bf16.mxu1 %v4972_v0  ;;  %v2674_v45 = vpop.f32.mrf.mxu0  ;;  %v4721_v51 = vpop.eup %4720 }
 0x5ae   :  { %v2675_v50 = vadd.f32 %v5626_v25, %v2674_v45  ;;  %v4723_v57 = vpop.eup %4722 }
 0x5af   :  { %v2792_v60 = vpack.c.bf16 %v4721_v51, %v4723_v57  ;;  %v4725_v4 = vpop.eup %4724 }
 0x5b0   :  { %4728 = vtanh.f32 %v2675_v50 }
 0x5b1   :  { %4730 = vtanh.f32 %v2672_v55 }
 0x5b4   :  { %3149 = vmatmul.mubr.bf16.gmra.mxu1 %v2787_v2  ;;  %v2683_v2 = vadd.f32 %v4136_v38, %v5626_v25 }
 0x5b5   :  { %3158 = vmatprep.mubr.bf16.mxu1 %v4972_v0 }
 0x5b6   :  { %4732 = vtanh.f32 %v2683_v2 }
 0x5b7   :  { %v5727_v52 = vpop.f32.mrf.mxu0  ;;  %4734 = vtanh.f32 %v2680_v7 }
 0x5b8   :  { %v2696_v36 = vadd.f32 %v5727_v52, %v5626_v25 }
 0x5b9   :  { %v2687_v61 = vpop.f32.mrf.mxu0 }
 0x5ba   :  { %v2688_v20 = vadd.f32 %v5626_v25, %v2687_v61 }
 0x5bb   :  { %v4140_v5 = vpop.f32.mrf.mxu0 }
 0x5bc   :  { %3159 = vmatmul.mubr.bf16.gmra.mxu1 %v2788_v9  ;;  %v4727_v9 = vpop.eup %4726 }
 0x5bd   :  { %3168 = vmatprep.mubr.bf16.mxu1 %v4972_v0  ;;  %v2793_v12 = vpack.c.bf16 %v4725_v4, %v4727_v9  ;;  %v2690_v53 = vpop.f32.mrf.mxu0  ;;  %v4729_v18 = vpop.eup %4728 }
 0x5be   :  { %v2691_v16 = vadd.f32 %v5626_v25, %v2690_v53  ;;  %v4731_v22 = vpop.eup %4730 }
 0x5bf   :  { %v2794_v37 = vpack.c.bf16 %v4729_v18, %v4731_v22 }
 0x5c0   :  { %4736 = vtanh.f32 %v2691_v16 }
 0x5c1   :  { %4738 = vtanh.f32 %v2688_v20 }
 0x5c3   :  { %v4733_v34 = vpop.eup %4732 }
 0x5c4   :  { %3169 = vmatmul.mubr.bf16.gmra.mxu1 %v2789_v17 }
 0x5c5   :  { %3178 = vmatprep.mubr.bf16.mxu1 %v4972_v0 }
 0x5cc   :  { %v2940_v31 = vpop.f32.mrf.mxu1  ;;  %3179 = vmatmul.mubr.bf16.gmra.mxu1 %v2790_v28 }
 0x5cd   :  { %v2941_v33 = vadd.f32 %v2940_v31, %v5713_v27  ;;  %3188 = vmatprep.mubr.bf16.mxu1 %v4972_v0  ;;  %v2699_v31 = vadd.f32 %v4140_v5, %v5626_v25 }
 0x5ce   :  { %v2942_v35 = vpop.f32.mrf.mxu1 }
 0x5cf   :  { %3387 = vst [vmem:[#allocation17] sm:$0xff] %v2941_v33  ;;  %v2943_v39 = vadd.f32 %v2942_v35, %v5715_v30  ;;  %4740 = vtanh.f32 %v2699_v31 }
 0x5d0   :  { %v2944_v46 = vpop.f32.mrf.mxu1  ;;  %4742 = vtanh.f32 %v2696_v36 }
 0x5d1   :  { %3388 = vst [vmem:[#allocation17 + $0x8] sm:$0xff] %v2943_v39  ;;  %v2945_v42 = vadd.f32 %v2944_v46, %v5713_v27  ;;  %v4735_v39 = vpop.eup %4734 }
 0x5d2   :  { %v2946_v43 = vpop.f32.mrf.mxu1  ;;  %v2795_v41 = vpack.c.bf16 %v4733_v34, %v4735_v39  ;;  %v4737_v45 = vpop.eup %4736 }
 0x5d3   :  { %3389 = vst [vmem:[#allocation17 + $0x10] sm:$0xff] %v2945_v42  ;;  %v2947_v47 = vadd.f32 %v2946_v43, %v5715_v30 }
 0x5d4   :  { %v2950_v48 = vpop.f32.mrf.mxu1  ;;  %3189 = vmatmul.mubr.bf16.gmra.mxu1 %v2791_v44 }
 0x5d5   :  { %3390 = vst [vmem:[#allocation17 + $0x18] sm:$0xff] %v2947_v47  ;;  %v2951_v49 = vadd.f32 %v2950_v48, %v5713_v27  ;;  %3198 = vmatprep.mubr.bf16.mxu1 %v4972_v0 }
 0x5d6   :  { %v2952_v6 = vpop.f32.mrf.mxu1 }
 0x5d7   :  { %3391 = vst [vmem:[#allocation17 + $0x20] sm:$0xff] %v2951_v49  ;;  %v2953_v54 = vadd.f32 %v2952_v6, %v5715_v30  ;;  %v4739_v49 = vpop.eup %4738 }
 0x5d8   :  { %v2954_v56 = vpop.f32.mrf.mxu1  ;;  %v2796_v51 = vpack.c.bf16 %v4737_v45, %v4739_v49 }
 0x5d9   :  { %3392 = vst [vmem:[#allocation17 + $0x28] sm:$0xff] %v2953_v54  ;;  %v2955_v58 = vadd.f32 %v2954_v56, %v5713_v27 }
 0x5da   :  { %v2956_v59 = vpop.f32.mrf.mxu1 }
 0x5db   :  { %3393 = vst [vmem:[#allocation17 + $0x30] sm:$0xff] %v2955_v58  ;;  %v2957_v62 = vadd.f32 %v2956_v59, %v5715_v30 }
 0x5dc   :  { %v2960_v63 = vpop.f32.mrf.mxu1  ;;  %3199 = vmatmul.mubr.bf16.gmra.mxu1 %v2792_v60  ;;  %v4741_v57 = vpop.eup %4740 }
 0x5dd   :  { %3394 = vst [vmem:[#allocation17 + $0x38] sm:$0xff] %v2957_v62  ;;  %v2961_v1 = vadd.f32 %v2960_v63, %v5713_v27  ;;  %3208 = vmatprep.mubr.bf16.mxu1 %v4972_v0  ;;  %v4743_v60 = vpop.eup %4742 }
 0x5de   :  { %v2962_v3 = vpop.f32.mrf.mxu1  ;;  %v2797_v63 = vpack.c.bf16 %v4741_v57, %v4743_v60 }
 0x5df   :  { %3395 = vst [vmem:[#allocation17 + $0x40] sm:$0xff] %v2961_v1  ;;  %v2963_v32 = vadd.f32 %v2962_v3, %v5715_v30 }
 0x5e0   :  { %v2964_v8 = vpop.f32.mrf.mxu1 }
 0x5e1   :  { %3396 = vst [vmem:[#allocation17 + $0x48] sm:$0xff] %v2963_v32  ;;  %v2965_v10 = vadd.f32 %v2964_v8, %v5713_v27 }
 0x5e2   :  { %v2966_v11 = vpop.f32.mrf.mxu1 }
 0x5e3   :  { %3397 = vst [vmem:[#allocation17 + $0x50] sm:$0xff] %v2965_v10  ;;  %v2967_v13 = vadd.f32 %v2966_v11, %v5715_v30 }
 0x5e4   :  { %v2970_v14 = vpop.f32.mrf.mxu1  ;;  %3209 = vmatmul.mubr.bf16.gmra.mxu1 %v2793_v12 }
 0x5e5   :  { %3398 = vst [vmem:[#allocation17 + $0x58] sm:$0xff] %v2967_v13  ;;  %v2971_v15 = vadd.f32 %v2970_v14, %v5713_v27  ;;  %3218 = vmatprep.mubr.bf16.mxu1 %v4972_v0 }
 0x5e6   :  { %v2972_v17 = vpop.f32.mrf.mxu1 }
 0x5e7   :  { %3399 = vst [vmem:[#allocation17 + $0x60] sm:$0xff] %v2971_v15  ;;  %v2973_v19 = vadd.f32 %v2972_v17, %v5715_v30 }
 0x5e8   :  { %v2974_v21 = vpop.f32.mrf.mxu1 }
 0x5e9   :  { %3400 = vst [vmem:[#allocation17 + $0x68] sm:$0xff] %v2973_v19  ;;  %v2975_v23 = vadd.f32 %v2974_v21, %v5713_v27 }
 0x5ea   :  { %v2976_v24 = vpop.f32.mrf.mxu1 }
 0x5eb   :  { %3401 = vst [vmem:[#allocation17 + $0x70] sm:$0xff] %v2975_v23  ;;  %v2977_v26 = vadd.f32 %v2976_v24, %v5715_v30 }
 0x5ec   :  { %v2980_v28 = vpop.f32.mrf.mxu1  ;;  %3219 = vmatmul.mubr.bf16.gmra.mxu1 %v2794_v37 }
 0x5ed   :  { %3402 = vst [vmem:[#allocation17 + $0x78] sm:$0xff] %v2977_v26  ;;  %v2981_v29 = vadd.f32 %v2980_v28, %v5713_v27  ;;  %3228 = vmatprep.mubr.bf16.mxu1 %v4972_v0 }
 0x5ee   :  { %v2982_v33 = vpop.f32.mrf.mxu1 }
 0x5ef   :  { %3403 = vst [vmem:[#allocation17 + $0x80] sm:$0xff] %v2981_v29  ;;  %v2983_v35 = vadd.f32 %v2982_v33, %v5715_v30 }
 0x5f0   :  { %v2984_v38 = vpop.f32.mrf.mxu1 }
 0x5f1   :  { %3404 = vst [vmem:[#allocation17 + $0x88] sm:$0xff] %v2983_v35  ;;  %v2985_v40 = vadd.f32 %v2984_v38, %v5713_v27 }
 0x5f2   :  { %v2986_v46 = vpop.f32.mrf.mxu1 }
 0x5f3   :  { %3405 = vst [vmem:[#allocation17 + $0x90] sm:$0xff] %v2985_v40  ;;  %v2987_v42 = vadd.f32 %v2986_v46, %v5715_v30 }
 0x5f4   :  { %v2990_v43 = vpop.f32.mrf.mxu1  ;;  %3229 = vmatmul.mubr.bf16.gmra.mxu1 %v2795_v41 }
 0x5f5   :  { %3406 = vst [vmem:[#allocation17 + $0x98] sm:$0xff] %v2987_v42  ;;  %v2991_v44 = vadd.f32 %v2990_v43, %v5713_v27  ;;  %3238 = vmatprep.mubr.bf16.mxu1 %v4972_v0 }
 0x5f6   :  { %v2992_v25 = vpop.f32.mrf.mxu1 }
 0x5f7   :  { %3407 = vst [vmem:[#allocation17 + $0xa0] sm:$0xff] %v2991_v44  ;;  %v2993_v47 = vadd.f32 %v2992_v25, %v5715_v30 }
 0x5f8   :  { %v2994_v48 = vpop.f32.mrf.mxu1 }
 0x5f9   :  { %3408 = vst [vmem:[#allocation17 + $0xa8] sm:$0xff] %v2993_v47  ;;  %v2995_v50 = vadd.f32 %v2994_v48, %v5713_v27 }
 0x5fa   :  { %v2996_v6 = vpop.f32.mrf.mxu1 }
 0x5fb   :  { %3409 = vst [vmem:[#allocation17 + $0xb0] sm:$0xff] %v2995_v50  ;;  %v2997_v52 = vadd.f32 %v2996_v6, %v5715_v30 }
 0x5fc   :  { %v3000_v54 = vpop.f32.mrf.mxu1  ;;  %3239 = vmatmul.mubr.bf16.gmra.mxu1 %v2796_v51 }
 0x5fd   :  { %3410 = vst [vmem:[#allocation17 + $0xb8] sm:$0xff] %v2997_v52  ;;  %v3001_v55 = vadd.f32 %v3000_v54, %v5713_v27  ;;  %3248 = vmatprep.mubr.bf16.mxu1 %v4972_v0 }
 0x5fe   :  { %v3002_v56 = vpop.f32.mrf.mxu1 }
 0x5ff   :  { %3411 = vst [vmem:[#allocation17 + $0xc0] sm:$0xff] %v3001_v55  ;;  %v3003_v58 = vadd.f32 %v3002_v56, %v5715_v30 }
 0x600   :  { %v3004_v59 = vpop.f32.mrf.mxu1 }
 0x601   :  { %3412 = vst [vmem:[#allocation17 + $0xc8] sm:$0xff] %v3003_v58  ;;  %v3005_v61 = vadd.f32 %v3004_v59, %v5713_v27 }
 0x602   :  { %v3006_v62 = vpop.f32.mrf.mxu1 }
 0x603   :  { %3413 = vst [vmem:[#allocation17 + $0xd0] sm:$0xff] %v3005_v61  ;;  %v3007_v1 = vadd.f32 %v3006_v62, %v5715_v30 }
 0x604   :  { %v3010_v2 = vpop.f32.mrf.mxu1  ;;  %3249 = vmatmul.mubr.bf16.gmra.mxu1 %v2797_v63 }
 0x605   :  { %3414 = vst [vmem:[#allocation17 + $0xd8] sm:$0xff] %v3007_v1  ;;  %v3011_v0 = vadd.f32 %v3010_v2, %v5713_v27 }
 0x606   :  { %v3012_v3 = vpop.f32.mrf.mxu1 }
 0x607   :  { %3415 = vst [vmem:[#allocation17 + $0xe0] sm:$0xff] %v3011_v0  ;;  %v3013_v4 = vadd.f32 %v3012_v3, %v5715_v30 }
 0x608   :  { %v3014_v5 = vpop.f32.mrf.mxu1 }
 0x609   :  { %3416 = vst [vmem:[#allocation17 + $0xe8] sm:$0xff] %v3013_v4  ;;  %v3015_v32 = vadd.f32 %v3014_v5, %v5713_v27 }
 0x60a   :  { %v3016_v7 = vpop.f32.mrf.mxu1 }
 0x60b   :  { %3417 = vst [vmem:[#allocation17 + $0xf0] sm:$0xff] %v3015_v32  ;;  %v3017_v8 = vadd.f32 %v3016_v7, %v5715_v30 }
 0x60c   :  { %v3020_v9 = vpop.f32.mrf.mxu1 }
 0x60d   :  { %3418 = vst [vmem:[#allocation17 + $0xf8] sm:$0xff] %v3017_v8  ;;  %v3021_v10 = vadd.f32 %v3020_v9, %v5713_v27 }
 0x60e   :  { %v3022_v11 = vpop.f32.mrf.mxu1 }
 0x60f   :  { %3419 = vst [vmem:[#allocation17 + $0x100] sm:$0xff] %v3021_v10  ;;  %v3023_v12 = vadd.f32 %v3022_v11, %v5715_v30 }
 0x610   :  { %v3024_v53 = vpop.f32.mrf.mxu1 }
 0x611   :  { %3420 = vst [vmem:[#allocation17 + $0x108] sm:$0xff] %v3023_v12  ;;  %v3025_v13 = vadd.f32 %v3024_v53, %v5713_v27 }
 0x612   :  { %v3026_v14 = vpop.f32.mrf.mxu1 }
 0x613   :  { %3421 = vst [vmem:[#allocation17 + $0x110] sm:$0xff] %v3025_v13  ;;  %v3027_v15 = vadd.f32 %v3026_v14, %v5715_v30 }
 0x614   :  { %v3030_v16 = vpop.f32.mrf.mxu1 }
 0x615   :  { %3422 = vst [vmem:[#allocation17 + $0x118] sm:$0xff] %v3027_v15  ;;  %v3031_v17 = vadd.f32 %v3030_v16, %v5713_v27 }
 0x616   :  { %v3032_v18 = vpop.f32.mrf.mxu1 }
 0x617   :  { %3423 = vst [vmem:[#allocation17 + $0x120] sm:$0xff] %v3031_v17  ;;  %v3033_v19 = vadd.f32 %v3032_v18, %v5715_v30 }
 0x618   :  { %v3034_v20 = vpop.f32.mrf.mxu1 }
 0x619   :  { %3424 = vst [vmem:[#allocation17 + $0x128] sm:$0xff] %v3033_v19  ;;  %v3035_v21 = vadd.f32 %v3034_v20, %v5713_v27 }
 0x61a   :  { %v3036_v22 = vpop.f32.mrf.mxu1 }
 0x61b   :  { %3425 = vst [vmem:[#allocation17 + $0x130] sm:$0xff] %v3035_v21  ;;  %v3037_v23 = vadd.f32 %v3036_v22, %v5715_v30 }
 0x61c   :  { %v3040_v24 = vpop.f32.mrf.mxu1 }
 0x61d   :  { %3426 = vst [vmem:[#allocation17 + $0x138] sm:$0xff] %v3037_v23  ;;  %v3041_v37 = vadd.f32 %v3040_v24, %v5713_v27 }
 0x61e   :  { %v3042_v26 = vpop.f32.mrf.mxu1 }
 0x61f   :  { %3427 = vst [vmem:[#allocation17 + $0x140] sm:$0xff] %v3041_v37  ;;  %v3043_v28 = vadd.f32 %v3042_v26, %v5715_v30 }
 0x620   :  { %v3044_v29 = vpop.f32.mrf.mxu1 }
 0x621   :  { %3428 = vst [vmem:[#allocation17 + $0x148] sm:$0xff] %v3043_v28  ;;  %v3045_v31 = vadd.f32 %v3044_v29, %v5713_v27 }
 0x622   :  { %v3046_v33 = vpop.f32.mrf.mxu1 }
 0x623   :  { %3429 = vst [vmem:[#allocation17 + $0x150] sm:$0xff] %v3045_v31  ;;  %v3047_v34 = vadd.f32 %v3046_v33, %v5715_v30 }
 0x624   :  { %v3050_v35 = vpop.f32.mrf.mxu1 }
 0x625   :  { %3430 = vst [vmem:[#allocation17 + $0x158] sm:$0xff] %v3047_v34  ;;  %v3051_v36 = vadd.f32 %v3050_v35, %v5713_v27 }
 0x626   :  { %v3052_v38 = vpop.f32.mrf.mxu1 }
 0x627   :  { %3431 = vst [vmem:[#allocation17 + $0x160] sm:$0xff] %v3051_v36  ;;  %v3053_v39 = vadd.f32 %v3052_v38, %v5715_v30 }
 0x628   :  { %v3054_v40 = vpop.f32.mrf.mxu1 }
 0x629   :  { %3432 = vst [vmem:[#allocation17 + $0x168] sm:$0xff] %v3053_v39  ;;  %v3055_v46 = vadd.f32 %v3054_v40, %v5713_v27 }
 0x62a   :  { %v3056_v41 = vpop.f32.mrf.mxu1 }
 0x62b   :  { %3433 = vst [vmem:[#allocation17 + $0x170] sm:$0xff] %v3055_v46  ;;  %v3057_v42 = vadd.f32 %v3056_v41, %v5715_v30 }
 0x62c   :  { %v3060_v43 = vpop.f32.mrf.mxu1 }
 0x62d   :  { %3434 = vst [vmem:[#allocation17 + $0x178] sm:$0xff] %v3057_v42  ;;  %v3061_v44 = vadd.f32 %v3060_v43, %v5713_v27 }
 0x62e   :  { %v3062_v25 = vpop.f32.mrf.mxu1 }
 0x62f   :  { %3435 = vst [vmem:[#allocation17 + $0x180] sm:$0xff] %v3061_v44  ;;  %v3063_v45 = vadd.f32 %v3062_v25, %v5715_v30 }
 0x630   :  { %v3064_v47 = vpop.f32.mrf.mxu1 }
 0x631   :  { %3436 = vst [vmem:[#allocation17 + $0x188] sm:$0xff] %v3063_v45  ;;  %v3065_v48 = vadd.f32 %v3064_v47, %v5713_v27 }
 0x632   :  { %v3066_v49 = vpop.f32.mrf.mxu1 }
 0x633   :  { %3437 = vst [vmem:[#allocation17 + $0x190] sm:$0xff] %v3065_v48  ;;  %v3067_v50 = vadd.f32 %v3066_v49, %v5715_v30 }
 0x634   :  { %v3070_v6 = vpop.f32.mrf.mxu1 }
 0x635   :  { %3438 = vst [vmem:[#allocation17 + $0x198] sm:$0xff] %v3067_v50  ;;  %v3071_v51 = vadd.f32 %v3070_v6, %v5713_v27 }
 0x636   :  { %v3072_v52 = vpop.f32.mrf.mxu1 }
 0x637   :  { %3439 = vst [vmem:[#allocation17 + $0x1a0] sm:$0xff] %v3071_v51  ;;  %v3073_v54 = vadd.f32 %v3072_v52, %v5715_v30 }
 0x638   :  { %v3074_v55 = vpop.f32.mrf.mxu1 }
 0x639   :  { %3440 = vst [vmem:[#allocation17 + $0x1a8] sm:$0xff] %v3073_v54  ;;  %v3075_v56 = vadd.f32 %v3074_v55, %v5713_v27 }
 0x63a   :  { %v3076_v57 = vpop.f32.mrf.mxu1 }
 0x63b   :  { %3441 = vst [vmem:[#allocation17 + $0x1b0] sm:$0xff] %v3075_v56  ;;  %v3077_v58 = vadd.f32 %v3076_v57, %v5715_v30 }
 0x63c   :  { %v3080_v59 = vpop.f32.mrf.mxu1 }
 0x63d   :  { %3442 = vst [vmem:[#allocation17 + $0x1b8] sm:$0xff] %v3077_v58  ;;  %v3081_v60 = vadd.f32 %v3080_v59, %v5713_v27 }
 0x63e   :  { %v3082_v61 = vpop.f32.mrf.mxu1 }
 0x63f   :  { %3443 = vst [vmem:[#allocation17 + $0x1c0] sm:$0xff] %v3081_v60  ;;  %v3083_v62 = vadd.f32 %v3082_v61, %v5715_v30 }
 0x640   :  { %v3084_v63 = vpop.f32.mrf.mxu1 }
 0x641   :  { %3444 = vst [vmem:[#allocation17 + $0x1c8] sm:$0xff] %v3083_v62  ;;  %v3085_v1 = vadd.f32 %v3084_v63, %v5713_v27 }
 0x642   :  { %v3086_v2 = vpop.f32.mrf.mxu1 }
 0x643   :  { %3445 = vst [vmem:[#allocation17 + $0x1d0] sm:$0xff] %v3085_v1  ;;  %v3087_v0 = vadd.f32 %v3086_v2, %v5715_v30 }
 0x644   :  { %v3090_v3 = vpop.f32.mrf.mxu1 }
 0x645   :  { %3446 = vst [vmem:[#allocation17 + $0x1d8] sm:$0xff] %v3087_v0  ;;  %v3091_v4 = vadd.f32 %v3090_v3, %v5713_v27 }
 0x646   :  { %v3092_v5 = vpop.f32.mrf.mxu1 }
 0x647   :  { %3447 = vst [vmem:[#allocation17 + $0x1e0] sm:$0xff] %v3091_v4  ;;  %v3093_v32 = vadd.f32 %v3092_v5, %v5715_v30 }
 0x648   :  { %v3094_v7 = vpop.f32.mrf.mxu1 }
 0x649   :  { %3448 = vst [vmem:[#allocation17 + $0x1e8] sm:$0xff] %v3093_v32  ;;  %v3095_v8 = vadd.f32 %v3094_v7, %v5713_v27 }
 0x64a   :  { %v3096_v9 = vpop.f32.mrf.mxu1 }
 0x64b   :  { %3449 = vst [vmem:[#allocation17 + $0x1f0] sm:$0xff] %v3095_v8  ;;  %v3097_v10 = vadd.f32 %v3096_v9, %v5715_v30 }
 0x64c   :  { %v3100_v11 = vpop.f32.mrf.mxu1 }
 0x64d   :  { %3450 = vst [vmem:[#allocation17 + $0x1f8] sm:$0xff] %v3097_v10  ;;  %v3101_v12 = vadd.f32 %v3100_v11, %v5713_v27 }
 0x64e   :  { %v3102_v53 = vpop.f32.mrf.mxu1 }
 0x64f   :  { %4915 = shalt.err (!%p4912_p2)
}
 0x650   :  { %3526 = dma.vmem_to_hbm [thread:$0]  %s3521_s25, 8192, %s5891_s13, [#allocation4], %s4970_s7, %s4970_s7, %s4971_s8   ;;  %3451 = vst [vmem:[#allocation17 + $0x200] sm:$0xff] %v3101_v12  ;;  %v3103_v13 = vadd.f32 %v3102_v53, %v5715_v30  ;;  %v3104_v14 = vpop.f32.mrf.mxu1 }
 0x651   :  { %v3105_v15 = vadd.f32 %v3104_v14, %v5713_v27  ;;  %s4974_s13 = smov [#allocation17]  }
 0x652   :  { %3452 = vst [vmem:[#allocation17 + $0x208] sm:$0xff] %v3103_v13  ;;  %v3106_v16 = vpop.f32.mrf.mxu1  ;;  %s3532_s7 = sshll.u32 %s4974_s13, 4  ;;  %s3533_s7 = int_to_ptr.vmem [resolvable:$true] %s3532_s7 }
 0x653   :  { %3453 = vst [vmem:[#allocation17 + $0x210] sm:$0xff] %v3105_v15  ;;  %v3107_v17 = vadd.f32 %v3106_v16, %v5715_v30  ;;  %s4924_s8 = scalar_lea.vmem %s3533_s7, 16384  ;;  %p4929_p4 = scmp.lt.s32.totalorder %s3533_s7, %s3533_s7 }
 0x654   :  { %v3110_v18 = vpop.f32.mrf.mxu1  ;;  %p4925_p3 = scmp.ne.s32.totalorder %s3533_s7, %s4924_s8  ;;  %p4930_p5 = scmp.lt.s32.totalorder %s4924_s8, %s4924_s8 }
 0x655   :  { %3454 = vst [vmem:[#allocation17 + $0x218] sm:$0xff] %v3107_v17  ;;  %v3111_v19 = vadd.f32 %v3110_v18, %v5713_v27 }
 0x656   :  { %v3112_v20 = vpop.f32.mrf.mxu1  ;;  %p4931_p6 = por %p4930_p5, %p4929_p4 }
 0x657   :  { %3455 = vst [vmem:[#allocation17 + $0x220] sm:$0xff] %v3111_v19  ;;  %v3113_v21 = vadd.f32 %v3112_v20, %v5715_v30 }
 0x658   :  { %v3114_v22 = vpop.f32.mrf.mxu1  ;;  %p4932_p7 = pnand %p4931_p6, %p4925_p3 }
 0x659   :  { %3456 = vst [vmem:[#allocation17 + $0x228] sm:$0xff] %v3113_v21  ;;  %v3115_v23 = vadd.f32 %v3114_v22, %v5713_v27 }
 0x65a   :  { %v3116_v24 = vpop.f32.mrf.mxu1 }
 0x65b   :  { %3457 = vst [vmem:[#allocation17 + $0x230] sm:$0xff] %v3115_v23  ;;  %v3117_v37 = vadd.f32 %v3116_v24, %v5715_v30 }
 0x65c   :  { %v3120_v26 = vpop.f32.mrf.mxu1 }
 0x65d   :  { %3458 = vst [vmem:[#allocation17 + $0x238] sm:$0xff] %v3117_v37  ;;  %v3121_v28 = vadd.f32 %v3120_v26, %v5713_v27 }
 0x65e   :  { %v3122_v29 = vpop.f32.mrf.mxu1 }
 0x65f   :  { %3459 = vst [vmem:[#allocation17 + $0x240] sm:$0xff] %v3121_v28  ;;  %v3123_v31 = vadd.f32 %v3122_v29, %v5715_v30 }
 0x660   :  { %v3124_v33 = vpop.f32.mrf.mxu1 }
 0x661   :  { %3460 = vst [vmem:[#allocation17 + $0x248] sm:$0xff] %v3123_v31  ;;  %v3125_v34 = vadd.f32 %v3124_v33, %v5713_v27 }
 0x662   :  { %v3126_v35 = vpop.f32.mrf.mxu1 }
 0x663   :  { %3461 = vst [vmem:[#allocation17 + $0x250] sm:$0xff] %v3125_v34  ;;  %v3127_v36 = vadd.f32 %v3126_v35, %v5715_v30 }
 0x664   :  { %v3130_v38 = vpop.f32.mrf.mxu1 }
 0x665   :  { %3462 = vst [vmem:[#allocation17 + $0x258] sm:$0xff] %v3127_v36  ;;  %v3131_v39 = vadd.f32 %v3130_v38, %v5713_v27 }
 0x666   :  { %v3132_v40 = vpop.f32.mrf.mxu1 }
 0x667   :  { %3463 = vst [vmem:[#allocation17 + $0x260] sm:$0xff] %v3131_v39  ;;  %v3133_v46 = vadd.f32 %v3132_v40, %v5715_v30 }
 0x668   :  { %v3134_v41 = vpop.f32.mrf.mxu1 }
 0x669   :  { %3464 = vst [vmem:[#allocation17 + $0x268] sm:$0xff] %v3133_v46  ;;  %v3135_v42 = vadd.f32 %v3134_v41, %v5713_v27 }
 0x66a   :  { %v3136_v43 = vpop.f32.mrf.mxu1 }
 0x66b   :  { %3465 = vst [vmem:[#allocation17 + $0x270] sm:$0xff] %v3135_v42  ;;  %v3137_v44 = vadd.f32 %v3136_v43, %v5715_v30 }
 0x66c   :  { %v3140_v25 = vpop.f32.mrf.mxu1 }
 0x66d   :  { %3466 = vst [vmem:[#allocation17 + $0x278] sm:$0xff] %v3137_v44  ;;  %v3141_v45 = vadd.f32 %v3140_v25, %v5713_v27 }
 0x66e   :  { %v3142_v47 = vpop.f32.mrf.mxu1 }
 0x66f   :  { %3467 = vst [vmem:[#allocation17 + $0x280] sm:$0xff] %v3141_v45  ;;  %v3143_v48 = vadd.f32 %v3142_v47, %v5715_v30 }
 0x670   :  { %v3144_v49 = vpop.f32.mrf.mxu1 }
 0x671   :  { %3468 = vst [vmem:[#allocation17 + $0x288] sm:$0xff] %v3143_v48  ;;  %v3145_v50 = vadd.f32 %v3144_v49, %v5713_v27 }
 0x672   :  { %v3146_v6 = vpop.f32.mrf.mxu1 }
 0x673   :  { %3469 = vst [vmem:[#allocation17 + $0x290] sm:$0xff] %v3145_v50  ;;  %v3147_v51 = vadd.f32 %v3146_v6, %v5715_v30 }
 0x674   :  { %v3150_v52 = vpop.f32.mrf.mxu1 }
 0x675   :  { %3470 = vst [vmem:[#allocation17 + $0x298] sm:$0xff] %v3147_v51  ;;  %v3151_v54 = vadd.f32 %v3150_v52, %v5713_v27 }
 0x676   :  { %v3152_v55 = vpop.f32.mrf.mxu1 }
 0x677   :  { %3471 = vst [vmem:[#allocation17 + $0x2a0] sm:$0xff] %v3151_v54  ;;  %v3153_v56 = vadd.f32 %v3152_v55, %v5715_v30 }
 0x678   :  { %v3154_v57 = vpop.f32.mrf.mxu1 }
 0x679   :  { %3472 = vst [vmem:[#allocation17 + $0x2a8] sm:$0xff] %v3153_v56  ;;  %v3155_v58 = vadd.f32 %v3154_v57, %v5713_v27 }
 0x67a   :  { %v3156_v59 = vpop.f32.mrf.mxu1 }
 0x67b   :  { %3473 = vst [vmem:[#allocation17 + $0x2b0] sm:$0xff] %v3155_v58  ;;  %v3157_v60 = vadd.f32 %v3156_v59, %v5715_v30 }
 0x67c   :  { %v3160_v61 = vpop.f32.mrf.mxu1 }
 0x67d   :  { %3474 = vst [vmem:[#allocation17 + $0x2b8] sm:$0xff] %v3157_v60  ;;  %v3161_v62 = vadd.f32 %v3160_v61, %v5713_v27 }
 0x67e   :  { %v3162_v63 = vpop.f32.mrf.mxu1 }
 0x67f   :  { %3475 = vst [vmem:[#allocation17 + $0x2c0] sm:$0xff] %v3161_v62  ;;  %v3163_v1 = vadd.f32 %v3162_v63, %v5715_v30 }
 0x680   :  { %v3164_v2 = vpop.f32.mrf.mxu1 }
 0x681   :  { %3476 = vst [vmem:[#allocation17 + $0x2c8] sm:$0xff] %v3163_v1  ;;  %v3165_v0 = vadd.f32 %v3164_v2, %v5713_v27 }
 0x682   :  { %v3166_v3 = vpop.f32.mrf.mxu1 }
 0x683   :  { %3477 = vst [vmem:[#allocation17 + $0x2d0] sm:$0xff] %v3165_v0  ;;  %v3167_v4 = vadd.f32 %v3166_v3, %v5715_v30 }
 0x684   :  { %v3170_v5 = vpop.f32.mrf.mxu1 }
 0x685   :  { %3478 = vst [vmem:[#allocation17 + $0x2d8] sm:$0xff] %v3167_v4  ;;  %v3171_v32 = vadd.f32 %v3170_v5, %v5713_v27 }
 0x686   :  { %v3172_v7 = vpop.f32.mrf.mxu1 }
 0x687   :  { %3479 = vst [vmem:[#allocation17 + $0x2e0] sm:$0xff] %v3171_v32  ;;  %v3173_v8 = vadd.f32 %v3172_v7, %v5715_v30 }
 0x688   :  { %v3174_v9 = vpop.f32.mrf.mxu1 }
 0x689   :  { %3480 = vst [vmem:[#allocation17 + $0x2e8] sm:$0xff] %v3173_v8  ;;  %v3175_v10 = vadd.f32 %v3174_v9, %v5713_v27 }
 0x68a   :  { %v3176_v11 = vpop.f32.mrf.mxu1 }
 0x68b   :  { %3481 = vst [vmem:[#allocation17 + $0x2f0] sm:$0xff] %v3175_v10  ;;  %v3177_v12 = vadd.f32 %v3176_v11, %v5715_v30 }
 0x68c   :  { %v3180_v53 = vpop.f32.mrf.mxu1 }
 0x68d   :  { %3482 = vst [vmem:[#allocation17 + $0x2f8] sm:$0xff] %v3177_v12  ;;  %v3181_v13 = vadd.f32 %v3180_v53, %v5713_v27 }
 0x68e   :  { %v3182_v14 = vpop.f32.mrf.mxu1 }
 0x68f   :  { %3483 = vst [vmem:[#allocation17 + $0x300] sm:$0xff] %v3181_v13  ;;  %v3183_v15 = vadd.f32 %v3182_v14, %v5715_v30 }
 0x690   :  { %v3184_v16 = vpop.f32.mrf.mxu1 }
 0x691   :  { %3484 = vst [vmem:[#allocation17 + $0x308] sm:$0xff] %v3183_v15  ;;  %v3185_v17 = vadd.f32 %v3184_v16, %v5713_v27 }
 0x692   :  { %v3186_v18 = vpop.f32.mrf.mxu1 }
 0x693   :  { %3485 = vst [vmem:[#allocation17 + $0x310] sm:$0xff] %v3185_v17  ;;  %v3187_v19 = vadd.f32 %v3186_v18, %v5715_v30 }
 0x694   :  { %v3190_v20 = vpop.f32.mrf.mxu1 }
 0x695   :  { %3486 = vst [vmem:[#allocation17 + $0x318] sm:$0xff] %v3187_v19  ;;  %v3191_v21 = vadd.f32 %v3190_v20, %v5713_v27 }
 0x696   :  { %v3192_v22 = vpop.f32.mrf.mxu1 }
 0x697   :  { %3487 = vst [vmem:[#allocation17 + $0x320] sm:$0xff] %v3191_v21  ;;  %v3193_v23 = vadd.f32 %v3192_v22, %v5715_v30 }
 0x698   :  { %v3194_v24 = vpop.f32.mrf.mxu1 }
 0x699   :  { %3488 = vst [vmem:[#allocation17 + $0x328] sm:$0xff] %v3193_v23  ;;  %v3195_v37 = vadd.f32 %v3194_v24, %v5713_v27 }
 0x69a   :  { %v3196_v26 = vpop.f32.mrf.mxu1 }
 0x69b   :  { %3489 = vst [vmem:[#allocation17 + $0x330] sm:$0xff] %v3195_v37  ;;  %v3197_v28 = vadd.f32 %v3196_v26, %v5715_v30 }
 0x69c   :  { %v3200_v29 = vpop.f32.mrf.mxu1 }
 0x69d   :  { %3490 = vst [vmem:[#allocation17 + $0x338] sm:$0xff] %v3197_v28  ;;  %v3201_v31 = vadd.f32 %v3200_v29, %v5713_v27 }
 0x69e   :  { %v3202_v33 = vpop.f32.mrf.mxu1 }
 0x69f   :  { %3491 = vst [vmem:[#allocation17 + $0x340] sm:$0xff] %v3201_v31  ;;  %v3203_v34 = vadd.f32 %v3202_v33, %v5715_v30 }
 0x6a0   :  { %v3204_v35 = vpop.f32.mrf.mxu1 }
 0x6a1   :  { %3492 = vst [vmem:[#allocation17 + $0x348] sm:$0xff] %v3203_v34  ;;  %v3205_v36 = vadd.f32 %v3204_v35, %v5713_v27 }
 0x6a2   :  { %v3206_v38 = vpop.f32.mrf.mxu1 }
 0x6a3   :  { %3493 = vst [vmem:[#allocation17 + $0x350] sm:$0xff] %v3205_v36  ;;  %v3207_v39 = vadd.f32 %v3206_v38, %v5715_v30 }
 0x6a4   :  { %v3210_v40 = vpop.f32.mrf.mxu1 }
 0x6a5   :  { %3494 = vst [vmem:[#allocation17 + $0x358] sm:$0xff] %v3207_v39  ;;  %v3211_v46 = vadd.f32 %v3210_v40, %v5713_v27 }
 0x6a6   :  { %v3212_v41 = vpop.f32.mrf.mxu1 }
 0x6a7   :  { %3495 = vst [vmem:[#allocation17 + $0x360] sm:$0xff] %v3211_v46  ;;  %v3213_v42 = vadd.f32 %v3212_v41, %v5715_v30 }
 0x6a8   :  { %v3214_v43 = vpop.f32.mrf.mxu1 }
 0x6a9   :  { %3496 = vst [vmem:[#allocation17 + $0x368] sm:$0xff] %v3213_v42  ;;  %v3215_v44 = vadd.f32 %v3214_v43, %v5713_v27 }
 0x6aa   :  { %v3216_v25 = vpop.f32.mrf.mxu1 }
 0x6ab   :  { %3497 = vst [vmem:[#allocation17 + $0x370] sm:$0xff] %v3215_v44  ;;  %v3217_v45 = vadd.f32 %v3216_v25, %v5715_v30 }
 0x6ac   :  { %v3220_v47 = vpop.f32.mrf.mxu1 }
 0x6ad   :  { %3498 = vst [vmem:[#allocation17 + $0x378] sm:$0xff] %v3217_v45  ;;  %v3221_v48 = vadd.f32 %v3220_v47, %v5713_v27 }
 0x6ae   :  { %v3222_v49 = vpop.f32.mrf.mxu1 }
 0x6af   :  { %3499 = vst [vmem:[#allocation17 + $0x380] sm:$0xff] %v3221_v48  ;;  %v3223_v50 = vadd.f32 %v3222_v49, %v5715_v30 }
 0x6b0   :  { %v3224_v6 = vpop.f32.mrf.mxu1 }
 0x6b1   :  { %3500 = vst [vmem:[#allocation17 + $0x388] sm:$0xff] %v3223_v50  ;;  %v3225_v51 = vadd.f32 %v3224_v6, %v5713_v27 }
 0x6b2   :  { %v3226_v52 = vpop.f32.mrf.mxu1 }
 0x6b3   :  { %3501 = vst [vmem:[#allocation17 + $0x390] sm:$0xff] %v3225_v51  ;;  %v3227_v54 = vadd.f32 %v3226_v52, %v5715_v30 }
 0x6b4   :  { %v3230_v55 = vpop.f32.mrf.mxu1 }
 0x6b5   :  { %3502 = vst [vmem:[#allocation17 + $0x398] sm:$0xff] %v3227_v54  ;;  %v3231_v56 = vadd.f32 %v3230_v55, %v5713_v27 }
 0x6b6   :  { %v3232_v57 = vpop.f32.mrf.mxu1 }
 0x6b7   :  { %3503 = vst [vmem:[#allocation17 + $0x3a0] sm:$0xff] %v3231_v56  ;;  %v3233_v58 = vadd.f32 %v3232_v57, %v5715_v30 }
 0x6b8   :  { %v3234_v59 = vpop.f32.mrf.mxu1 }
 0x6b9   :  { %3504 = vst [vmem:[#allocation17 + $0x3a8] sm:$0xff] %v3233_v58  ;;  %v3235_v60 = vadd.f32 %v3234_v59, %v5713_v27 }
 0x6ba   :  { %v3236_v61 = vpop.f32.mrf.mxu1 }
 0x6bb   :  { %3505 = vst [vmem:[#allocation17 + $0x3b0] sm:$0xff] %v3235_v60  ;;  %v3237_v62 = vadd.f32 %v3236_v61, %v5715_v30 }
 0x6bc   :  { %v3240_v63 = vpop.f32.mrf.mxu1 }
 0x6bd   :  { %3506 = vst [vmem:[#allocation17 + $0x3b8] sm:$0xff] %v3237_v62  ;;  %v3241_v1 = vadd.f32 %v3240_v63, %v5713_v27 }
 0x6be   :  { %v3242_v2 = vpop.f32.mrf.mxu1 }
 0x6bf   :  { %3507 = vst [vmem:[#allocation17 + $0x3c0] sm:$0xff] %v3241_v1  ;;  %v3243_v0 = vadd.f32 %v3242_v2, %v5715_v30 }
 0x6c0   :  { %v3244_v3 = vpop.f32.mrf.mxu1 }
 0x6c1   :  { %3508 = vst [vmem:[#allocation17 + $0x3c8] sm:$0xff] %v3243_v0  ;;  %v3245_v4 = vadd.f32 %v3244_v3, %v5713_v27 }
 0x6c2   :  { %v3246_v5 = vpop.f32.mrf.mxu1 }
 0x6c3   :  { %3509 = vst [vmem:[#allocation17 + $0x3d0] sm:$0xff] %v3245_v4  ;;  %v3247_v32 = vadd.f32 %v3246_v5, %v5715_v30 }
 0x6c4   :  { %v3250_v7 = vpop.f32.mrf.mxu1 }
 0x6c5   :  { %3510 = vst [vmem:[#allocation17 + $0x3d8] sm:$0xff] %v3247_v32  ;;  %v3251_v8 = vadd.f32 %v3250_v7, %v5713_v27 }
 0x6c6   :  { %v3252_v9 = vpop.f32.mrf.mxu1 }
 0x6c7   :  { %3511 = vst [vmem:[#allocation17 + $0x3e0] sm:$0xff] %v3251_v8  ;;  %v3253_v10 = vadd.f32 %v3252_v9, %v5715_v30 }
 0x6c8   :  { %v3254_v11 = vpop.f32.mrf.mxu1 }
 0x6c9   :  { %3512 = vst [vmem:[#allocation17 + $0x3e8] sm:$0xff] %v3253_v10  ;;  %v3255_v12 = vadd.f32 %v3254_v11, %v5713_v27 }
 0x6ca   :  { %v3256_v53 = vpop.f32.mrf.mxu1 }
 0x6cb   :  { %3513 = vst [vmem:[#allocation17 + $0x3f0] sm:$0xff] %v3255_v12  ;;  %v3257_v13 = vadd.f32 %v3256_v53, %v5715_v30 }
 0x6cd   :  { %3514 = vst [vmem:[#allocation17 + $0x3f8] sm:$0xff] %v3257_v13 }
 0x6ce   :  { %4935 = shalt.err (!%p4932_p7)
}
 0x6cf   :  { %3538 = dma.vmem_to_hbm [thread:$0]  %s3533_s7, 16384, %s5892_s14, [#allocation18], %s4962_s6, %s4962_s6, %s4963_s16  }
 0x6d0   :  { %4954 = dma.done.wait [#allocation4], 8192  }
 0x6d1   :  { %4955 = vsyncadd [#allocation4], 4294959104 }
 0x6d2   :  { %4956 = dma.done.wait [#allocation18], 16384  }
 0x6d3   :  { %4957 = vsyncadd [#allocation18], 4294950912 }
 0x6d4   :  { %3545 = vsyncpa [#allocation3], 1 }
 0x6d5   :  { %3546 = vsyncpa [#allocation6], 1 }
 0x6d6   :  { %3547 = vsyncpa [#allocation9], 1 }
 0x6d7   :  { %3548 = vsyncpa [#allocation12], 1 }
 0x6d8   :  { %3549 = vsyncpa [#allocation15], 1 }
 0x6d9   :  { %3550 = vsyncpa [#allocation4], 1 }
 0x6da   :  { %3551 = vsyncpa [#allocation18], 1 }

</bundles_post_ra>
